<compile_context>
chip_gen: v5e
topology: v5e:2x2
jax: 0.10.0
libtpu: 0.0.40
codegen_flags: <defaults>
</compile_context>

<pallas_src>
import jax
import jax.numpy as jnp
from jax.experimental import pallas as pl
from jax.experimental.pallas import tpu as pltpu


def _round_up(x, m):
    return ((x + m - 1) // m) * m


def _epilogue_dtype():
    """bf16 epilogue (bias add + sigmoid) on chips with bf16 VPU/EUP (v6e/v7x);
    f32 elsewhere (v5e has no bf16 VALU/EUP and is MXU-bound anyway)."""
    try:
        kind = jax.devices()[0].device_kind.lower()
    except Exception:
        return jnp.float32
    if any(tag in kind for tag in ("v6", "v7", "7x")):
        return jnp.bfloat16
    return jnp.float32


def _choose_tile(batch, tile_b):
    """Pick an 8-aligned batch tile that (a) caps per-step VMEM at tile_b rows,
    (b) minimizes zero-pad waste, and (c) prefers >=2 grid steps so the batch
    axis can shard across v7x's two TensorCores."""
    b8 = _round_up(batch, 8)
    max_tile = min(tile_b, b8)
    best_tile, best_key = None, None
    for t in range(8, max_tile + 1, 8):
        steps = -(-b8 // t)
        pad = t * steps - b8
        # priority: minimal pad, then >=2 steps (megacore), then 128-aligned
        # tile (MXU-friendly M), then fewer steps (less per-step overhead).
        key = (pad, 0 if steps >= 2 else 1, 0 if t % 128 == 0 else 1, steps)
        if best_key is None or key < best_key:
            best_tile, best_key = t, key
    return best_tile


def _make_kernel(act_dtype):
    """Fused 3-layer MLP kernel; act_dtype is the bias/sigmoid epilogue dtype."""

    def kernel(x_ref, w1_ref, b1_ref, w2_ref, b2_ref, w3_ref, b3_ref, o_ref):
        # Layer 1: cast the f32 x tile to bf16 in-kernel (VPU, hidden under the
        # MXU), matmul with f32 accumulation, then bias + sigmoid in act_dtype.
        x_bf = x_ref[...].astype(jnp.bfloat16)
        a1 = jnp.dot(x_bf, w1_ref[...], preferred_element_type=jnp.float32)
        h1 = a1.astype(act_dtype) + b1_ref[...]
        # sigmoid(x) == 0.5*tanh(0.5*x) + 0.5  -> single EUP push per vreg.
        h1 = 0.5 * jnp.tanh(0.5 * h1) + 0.5

        # Layer 2 (no activation, matching the PyTorch forward()).
        a2 = jnp.dot(h1.astype(jnp.bfloat16), w2_ref[...],
                     preferred_element_type=jnp.float32)
        h2 = a2.astype(act_dtype) + b2_ref[...]

        # Layer 3 (deterministic nn.Linear), lane-dense padded output width.
        a3 = jnp.dot(h2.astype(jnp.bfloat16), w3_ref[...],
                     preferred_element_type=jnp.float32)
        o_ref[...] = (a3 + b3_ref[...]).astype(o_ref.dtype)

    return kernel


def bayesian_regressor_forward(x, params, *, tile_b=512):
    """x: (B, input_dim) f32. params: dict of sampled weights/biases (f32)."""
    w1, b1, w2, b2, w3, b3 = (params["w1"], params["b1"], params["w2"],
                              params["b2"], params["w3"], params["b3"])
    B, D = x.shape
    H = w1.shape[1]
    O = w3.shape[1]
    act_dtype = _epilogue_dtype()

    # Lane-dense input/output feature dims (pad to multiples of 128; padded
    # rows/cols are zeros so the math is unchanged; sliced back afterwards).
    D_pad = _round_up(D, 128)
    O_pad = _round_up(O, 128)
    if D_pad != D:
        w1 = jnp.pad(w1, ((0, D_pad - D), (0, 0)))
    if O_pad != O:
        w3 = jnp.pad(w3, ((0, 0), (0, O_pad - O)))
        b3 = jnp.pad(b3, ((0, 0), (0, O_pad - O)))

    # Batch tiling: minimal pad waste, >=2 grid steps when possible (v7x).
    tile = _choose_tile(B, tile_b)
    B_pad = tile * (-(-_round_up(B, 8) // tile))
    if (B_pad, D_pad) != (B, D):
        x = jnp.pad(x, ((0, B_pad - B), (0, D_pad - D)))

    # Weight dtypes: bf16 operands for the MXU (one-time cast, fine in the
    # wrapper); biases in the epilogue dtype; x stays f32 (cast in-kernel).
    w1_bf = w1.astype(jnp.bfloat16)
    w2_bf = w2.astype(jnp.bfloat16)
    w3_bf = w3.astype(jnp.bfloat16)
    b1_c = b1.astype(act_dtype)
    b2_c = b2.astype(act_dtype)
    b3_f = b3.astype(jnp.float32)

    grid = (B_pad // tile,)

    flops = 2 * B_pad * (D_pad * H + H * H + H * O_pad)
    bytes_accessed = (
        4 * x.size                                               # f32 x
        + 2 * (w1_bf.size + w2_bf.size + w3_bf.size)             # bf16 weights
        + b1_c.dtype.itemsize * b1_c.size
        + b2_c.dtype.itemsize * b2_c.size
        + 4 * b3_f.size
        + 4 * B_pad * O_pad)                                     # f32 output
    cost = pl.CostEstimate(flops=flops,
                           transcendentals=B_pad * H,            # one tanh/elem
                           bytes_accessed=bytes_accessed)

    out = pl.pallas_call(
        _make_kernel(act_dtype),
        out_shape=jax.ShapeDtypeStruct((B_pad, O_pad), jnp.float32),
        grid_spec=pltpu.PrefetchScalarGridSpec(
            num_scalar_prefetch=0,
            grid=grid,
            in_specs=[
                pl.BlockSpec((tile, D_pad), lambda i: (i, 0)),   # x tile (f32)
                # Weights/biases have grid-invariant index maps, so they stay
                # resident in VMEM and are not re-DMA'd per grid step.
                pl.BlockSpec((D_pad, H), lambda i: (0, 0)),      # W1
                pl.BlockSpec((1, H), lambda i: (0, 0)),          # b1
                pl.BlockSpec((H, H), lambda i: (0, 0)),          # W2
                pl.BlockSpec((1, H), lambda i: (0, 0)),          # b2
                pl.BlockSpec((H, O_pad), lambda i: (0, 0)),      # W3 (padded)
                pl.BlockSpec((1, O_pad), lambda i: (0, 0)),      # b3 (padded)
            ],
            out_specs=pl.BlockSpec((tile, O_pad), lambda i: (i, 0)),
        ),
        compiler_params=pltpu.CompilerParams(
            dimension_semantics=("parallel",),   # batch axis shards across TCs
            vmem_limit_bytes=48 << 20,           # v5e default is 16 MiB; <=64 on v7x
        ),
        cost_estimate=cost,
    )(x, w1_bf, b1_c, w2_bf, b2_c, w3_bf, b3_f)

    return out[:B, :O]


# ----------------------------- parameter setup -----------------------------

def _softplus(x):
    return jnp.log1p(jnp.exp(x))


def _sample_bayesian_linear(key, fan_in, fan_out):
    """Reparameterized weight/bias sample for a BayesianLinear layer.
    Returns W of shape (fan_in, fan_out) and b of shape (1, fan_out)."""
    k_mu_w, k_rho_w, k_eps_w, k_mu_b, k_rho_b, k_eps_b = jax.random.split(key, 6)
    w_mu = 0.1 * jax.random.normal(k_mu_w, (fan_in, fan_out), jnp.float32)
    w_rho = -3.0 + 0.1 * jax.random.normal(k_rho_w, (fan_in, fan_out), jnp.float32)
    w_eps = jax.random.normal(k_eps_w, (fan_in, fan_out), jnp.float32)
    w = w_mu + _softplus(w_rho) * w_eps

    b_mu = 0.1 * jax.random.normal(k_mu_b, (1, fan_out), jnp.float32)
    b_rho = -3.0 + 0.1 * jax.random.normal(k_rho_b, (1, fan_out), jnp.float32)
    b_eps = jax.random.normal(k_eps_b, (1, fan_out), jnp.float32)
    b = b_mu + _softplus(b_rho) * b_eps
    return w, b


def _init_linear(key, fan_in, fan_out):
    """Deterministic nn.Linear-style init: U(-1/sqrt(fan_in), 1/sqrt(fan_in))."""
    k_w, k_b = jax.random.split(key)
    bound = 1.0 / jnp.sqrt(float(fan_in))
    w = jax.random.uniform(k_w, (fan_in, fan_out), jnp.float32, -bound, bound)
    b = jax.random.uniform(k_b, (1, fan_out), jnp.float32, -bound, bound)
    return w, b


def make_params(key, input_dim, output_dim, hidden=1024):
    k1, k2, k3 = jax.random.split(key, 3)
    w1, b1 = _sample_bayesian_linear(k1, input_dim, hidden)   # blinear1
    w2, b2 = _sample_bayesian_linear(k2, hidden, hidden)      # blinear2
    w3, b3 = _init_linear(k3, hidden, output_dim)             # linear3
    # blinear3, linear1, linear2, lsig1 are unused in forward(); not built.
    return {"w1": w1, "b1": b1, "w2": w2, "b2": b2, "w3": w3, "b3": b3}


def reference_forward(x, p):
    """Pure-JAX reference mirroring the kernel's numerics (bf16 MXU operands,
    f32 accumulation, tanh-form sigmoid, epilogue dtype per chip)."""
    bf = jnp.bfloat16
    act = _epilogue_dtype()
    a1 = jnp.dot(x.astype(bf), p["w1"].astype(bf),
                 preferred_element_type=jnp.float32)
    h1 = a1.astype(act) + p["b1"].astype(act)
    h1 = 0.5 * jnp.tanh(0.5 * h1) + 0.5
    a2 = jnp.dot(h1.astype(bf), p["w2"].astype(bf),
                 preferred_element_type=jnp.float32)
    h2 = a2.astype(act) + p["b2"].astype(act)
    a3 = jnp.dot(h2.astype(bf), p["w3"].astype(bf),
                 preferred_element_type=jnp.float32)
    return a3 + p["b3"]


if __name__ == "__main__":
    INPUT_DIM = 16
    OUTPUT_DIM = 8
    BATCH = 16

    key = jax.random.PRNGKey(0)
    k_params, k_x = jax.random.split(key)
    params = make_params(k_params, INPUT_DIM, OUTPUT_DIM)
    x = jax.random.normal(k_x, (BATCH, INPUT_DIM), jnp.float32)

    out = bayesian_regressor_forward(x, params)
    out = jax.block_until_ready(out)

    ref = reference_forward(x, params)
    assert out.shape == (BATCH, OUTPUT_DIM)
    assert jnp.allclose(out, ref, atol=2e-2, rtol=2e-2), "mismatch vs reference"

    print("KERNEL_OK")
</pallas_src>

<mosaic_0001>
module attributes {stable_mosaic.version = 11 : i64} {
  func.func @kernel(%arg0: i32, %arg1: memref<8x128xf32, #tpu.memory_space<vmem>>, %arg2: memref<128x1024xbf16, #tpu.memory_space<vmem>>, %arg3: memref<1x1024xf32, #tpu.memory_space<vmem>>, %arg4: memref<1024x1024xbf16, #tpu.memory_space<vmem>>, %arg5: memref<1x1024xf32, #tpu.memory_space<vmem>>, %arg6: memref<1024x128xbf16, #tpu.memory_space<vmem>>, %arg7: memref<1x128xf32, #tpu.memory_space<vmem>>, %arg8: memref<8x128xf32, #tpu.memory_space<vmem>>) attributes {dimension_semantics = [#tpu.dimension_semantics<parallel>], iteration_bounds = array<i64: 2>, scalar_prefetch = 0 : i64, scratch_operands = 0 : i64, tpu.core_type = #tpu.core_type<tc>, window_params = [{transform_indices = @transform_0, window_bounds = array<i64: 8, 128>}, {pipeline_mode = #tpu.pipeline_mode<synchronous>, transform_indices = @transform_1, window_bounds = array<i64: 128, 1024>}, {pipeline_mode = #tpu.pipeline_mode<synchronous>, transform_indices = @transform_2, window_bounds = array<i64: 1, 1024>}, {pipeline_mode = #tpu.pipeline_mode<synchronous>, transform_indices = @transform_3, window_bounds = array<i64: 1024, 1024>}, {pipeline_mode = #tpu.pipeline_mode<synchronous>, transform_indices = @transform_4, window_bounds = array<i64: 1, 1024>}, {pipeline_mode = #tpu.pipeline_mode<synchronous>, transform_indices = @transform_5, window_bounds = array<i64: 1024, 128>}, {pipeline_mode = #tpu.pipeline_mode<synchronous>, transform_indices = @transform_6, window_bounds = array<i64: 1, 128>}, {transform_indices = @transform_7, window_bounds = array<i64: 8, 128>}]} {
    %c0 = arith.constant 0 : index
    %c0_0 = arith.constant 0 : index
    %0 = vector.load %arg1[%c0, %c0_0] : memref<8x128xf32, #tpu.memory_space<vmem>>, vector<8x128xf32>
    %1 = arith.truncf %0 : vector<8x128xf32> to vector<8x128xbf16>
    %c0_1 = arith.constant 0 : index
    %c0_2 = arith.constant 0 : index
    %2 = vector.load %arg2[%c0_1, %c0_2] : memref<128x1024xbf16, #tpu.memory_space<vmem>>, vector<128x1024xbf16>
    %cst = arith.constant dense<0.000000e+00> : vector<8x1024xf32>
    %3 = tpu.matmul %1, %2, %cst {dimension_numbers = #tpu.dot_dimension_numbers<[1], [0], [0], [1], [0, 0, 1, 1], [], []>} : vector<8x128xbf16>, vector<128x1024xbf16>, vector<8x1024xf32> -> vector<8x1024xf32>
    %c0_3 = arith.constant 0 : index
    %c0_4 = arith.constant 0 : index
    %4 = vector.load %arg3[%c0_3, %c0_4] : memref<1x1024xf32, #tpu.memory_space<vmem>>, vector<1x1024xf32>
    %5 = vector.broadcast %4 : vector<1x1024xf32> to vector<8x1024xf32>
    %6 = arith.addf %3, %5 : vector<8x1024xf32>
    %cst_5 = arith.constant 5.000000e-01 : f32
    %7 = vector.broadcast %cst_5 : f32 to vector<8x1024xf32>
    %8 = arith.mulf %7, %6 : vector<8x1024xf32>
    %9 = math.tanh %8 : vector<8x1024xf32>
    %cst_6 = arith.constant 5.000000e-01 : f32
    %10 = vector.broadcast %cst_6 : f32 to vector<8x1024xf32>
    %11 = arith.mulf %10, %9 : vector<8x1024xf32>
    %cst_7 = arith.constant 5.000000e-01 : f32
    %12 = vector.broadcast %cst_7 : f32 to vector<8x1024xf32>
    %13 = arith.addf %11, %12 : vector<8x1024xf32>
    %14 = arith.truncf %13 : vector<8x1024xf32> to vector<8x1024xbf16>
    %c0_8 = arith.constant 0 : index
    %c0_9 = arith.constant 0 : index
    %15 = vector.load %arg4[%c0_8, %c0_9] : memref<1024x1024xbf16, #tpu.memory_space<vmem>>, vector<1024x1024xbf16>
    %cst_10 = arith.constant dense<0.000000e+00> : vector<8x1024xf32>
    %16 = tpu.matmul %14, %15, %cst_10 {dimension_numbers = #tpu.dot_dimension_numbers<[1], [0], [0], [1], [0, 0, 1, 1], [], []>} : vector<8x1024xbf16>, vector<1024x1024xbf16>, vector<8x1024xf32> -> vector<8x1024xf32>
    %c0_11 = arith.constant 0 : index
    %c0_12 = arith.constant 0 : index
    %17 = vector.load %arg5[%c0_11, %c0_12] : memref<1x1024xf32, #tpu.memory_space<vmem>>, vector<1x1024xf32>
    %18 = vector.broadcast %17 : vector<1x1024xf32> to vector<8x1024xf32>
    %19 = arith.addf %16, %18 : vector<8x1024xf32>
    %20 = arith.truncf %19 : vector<8x1024xf32> to vector<8x1024xbf16>
    %c0_13 = arith.constant 0 : index
    %c0_14 = arith.constant 0 : index
    %21 = vector.load %arg6[%c0_13, %c0_14] : memref<1024x128xbf16, #tpu.memory_space<vmem>>, vector<1024x128xbf16>
    %cst_15 = arith.constant dense<0.000000e+00> : vector<8x128xf32>
    %22 = tpu.matmul %20, %21, %cst_15 {dimension_numbers = #tpu.dot_dimension_numbers<[1], [0], [0], [1], [0, 0, 1, 1], [], []>} : vector<8x1024xbf16>, vector<1024x128xbf16>, vector<8x128xf32> -> vector<8x128xf32>
    %c0_16 = arith.constant 0 : index
    %c0_17 = arith.constant 0 : index
    %23 = vector.load %arg7[%c0_16, %c0_17] : memref<1x128xf32, #tpu.memory_space<vmem>>, vector<1x128xf32>
    %24 = vector.broadcast %23 : vector<1x128xf32> to vector<8x128xf32>
    %25 = arith.addf %22, %24 : vector<8x128xf32>
    %c0_18 = arith.constant 0 : index
    %c0_19 = arith.constant 0 : index
    %26 = vector.load %arg8[%c0_18, %c0_19] : memref<8x128xf32, #tpu.memory_space<vmem>>, vector<8x128xf32>
    tpu.vector_store %arg8[%c0_18, %c0_19], %25 {strides = array<i32>} : memref<8x128xf32, #tpu.memory_space<vmem>>, vector<8x128xf32>,
    return
  }
  func.func @transform_0(%arg0: i32) -> (i32, i32) {
    %c0_i32 = arith.constant 0 : i32
    %c0_i32_0 = arith.constant 0 : i32
    return %arg0, %c0_i32 : i32, i32
  }
  func.func @transform_1(%arg0: i32) -> (i32, i32) {
    %c0_i32 = arith.constant 0 : i32
    %c0_i32_0 = arith.constant 0 : i32
    %c0_i32_1 = arith.constant 0 : i32
    return %c0_i32, %c0_i32_0 : i32, i32
  }
  func.func @transform_2(%arg0: i32) -> (i32, i32) {
    %c0_i32 = arith.constant 0 : i32
    %c0_i32_0 = arith.constant 0 : i32
    %c0_i32_1 = arith.constant 0 : i32
    return %c0_i32, %c0_i32_0 : i32, i32
  }
  func.func @transform_3(%arg0: i32) -> (i32, i32) {
    %c0_i32 = arith.constant 0 : i32
    %c0_i32_0 = arith.constant 0 : i32
    %c0_i32_1 = arith.constant 0 : i32
    return %c0_i32, %c0_i32_0 : i32, i32
  }
  func.func @transform_4(%arg0: i32) -> (i32, i32) {
    %c0_i32 = arith.constant 0 : i32
    %c0_i32_0 = arith.constant 0 : i32
    %c0_i32_1 = arith.constant 0 : i32
    return %c0_i32, %c0_i32_0 : i32, i32
  }
  func.func @transform_5(%arg0: i32) -> (i32, i32) {
    %c0_i32 = arith.constant 0 : i32
    %c0_i32_0 = arith.constant 0 : i32
    %c0_i32_1 = arith.constant 0 : i32
    return %c0_i32, %c0_i32_0 : i32, i32
  }
  func.func @transform_6(%arg0: i32) -> (i32, i32) {
    %c0_i32 = arith.constant 0 : i32
    %c0_i32_0 = arith.constant 0 : i32
    %c0_i32_1 = arith.constant 0 : i32
    return %c0_i32, %c0_i32_0 : i32, i32
  }
  func.func @transform_7(%arg0: i32) -> (i32, i32) {
    %c0_i32 = arith.constant 0 : i32
    %c0_i32_0 = arith.constant 0 : i32
    return %arg0, %c0_i32 : i32, i32
  }
}

</mosaic_0001>

<bundles_post_ra>
// kernel: tpu_custom_call.1
= control target key start
LH: loop header
LB: loop body
LE: loop exit
PB: predicated region body
PF: predicated region fallthrough
CT: control target
= control target key end

     0   :  { %s9683_s0 = inlined_call_operand.hbm [shape: f32[16,128], index: 0, kind: input, shape index: {}]   ;;  %s9684_s1 = inlined_call_operand.hbm [shape: bf16[128,1024], index: 1, kind: input, shape index: {}]   ;;  %s9685_s2 = inlined_call_operand.hbm [shape: f32[1,1024], index: 2, kind: input, shape index: {}]   ;;  %s9686_s3 = inlined_call_operand.hbm [shape: bf16[1024,1024], index: 3, kind: input, shape index: {}]   ;;  %s9687_s4 = inlined_call_operand.hbm [shape: f32[1,1024], index: 4, kind: input, shape index: {}]   ;;  %s9688_s5 = inlined_call_operand.hbm [shape: bf16[1024,128], index: 5, kind: input, shape index: {}]   ;;  %s9689_s6 = inlined_call_operand.hbm [shape: f32[1,128], index: 6, kind: input, shape index: {}]   ;;  %s9690_s7 = inlined_call_operand.hbm [shape: f32[16,128], index: 7, kind: output, shape index: {}]  }
   0x1   :  { %9691 = sst [smem:[#allocation20_spill]] %s9684_s1 }
   0x2   :  { %9692 = sst [smem:[#allocation21_spill]] %s9685_s2 }
   0x3   :  { %12 = vsyncpa [#allocation3], 0 }
   0x4   :  { %14 = vsyncpa [#allocation3 + $0x1], 0 }
   0x5   :  { %15 = vsyncpa [#allocation6], 0 }
   0x6   :  { %16 = vsyncpa [#allocation9], 0 }
   0x7   :  { %17 = vsyncpa [#allocation12], 0 }
   0x8   :  { %18 = vsyncpa [#allocation4], 0 }
   0x9   :  { %20 = vsyncpa [#allocation4 + $0x1], 0  ;;  %s9325_s24 = smov 0   ;;  %s9327_s25 = smov 0  }
   0xa   :  { %s9329_s26 = smov 0   ;;  %s9331_s27 = smov 0  }
   0xb LB: > { %s9693_s1 = sld [smem:[#allocation20_spill]]  ;;  %s9349_s8 = sadd.s32 4294967295, %s9273_s27   ;;  %s9273_s27 = sphi %s9331_s27, %s9706_s27   ;;  %s9269_s26 = sphi %s9329_s26, %s9705_s26   ;;  %s9265_s25 = sphi %s9327_s25, %s9704_s25   ;;  %s9261_s24 = sphi %s9325_s24, %s9703_s24  }
   0xc   : > { %p5632_p0 = scmp.ge.s32.totalorder %s9273_s27, 1  ;;  %p47_p1 = scmp.eq.s32.totalorder %s9349_s8, 0 }
   0xd   : > { %p209_p2 = scmp.lt.s32.totalorder %s9273_s27, 3  ;;  %s9275_s10 = smov [#allocation5]  }
   0xe   : > { %s222_s11 = sshll.u32 %s9275_s10, 4  ;;  %s246_s14 = sshll.u32 %s9686_s3, 4  ;;  %s223_s11 = int_to_ptr.vmem [resolvable:$true] %s222_s11  ;;  %s247_s14 = int_to_ptr.hbm [resolvable:$true] %s246_s14 }
   0xf   : > { %p9354_p3 = pnand %p5632_p0, %p209_p2  ;;  %s272_s18 = sshll.u32 %s9688_s5, 4  ;;  %s273_s18 = int_to_ptr.hbm [resolvable:$true] %s272_s18 }
  0x10   : > { %s9276_s19 = smov [#allocation8]   ;;  %s9277_s21 = smov 512  }
  0x11   : > { %s220_s30 = sshll.u32 %s9693_s1, 4  ;;  %p8883_p4 = pneg %p9354_p3  ;;  %s221_s30 = int_to_ptr.hbm [resolvable:$true] %s220_s30 }
  0x12   : > { %s248_s20 = sshll.u32 %s9276_s19, 4  ;;  %s9278_s22 = smov 32   ;;  %s249_s20 = int_to_ptr.vmem [resolvable:$true] %s248_s20 }
  0x13   : > { %p9366_p6 = pnand %p8883_p4, %p47_p1  ;;  %s9279_s23 = smov [#allocation11]  }
  0x14   : > { %s274_s28 = sshll.u32 %s9279_s23, 4  ;;  %s9696_s2 = sld [smem:[#allocation21_spill]]  ;;  %s275_s28 = int_to_ptr.vmem [resolvable:$true] %s274_s28 }
  0x15   : > { %8886 = dma.hbm_to_vmem [thread:$0]  (!%p9366_p6), %s221_s30, 8192, %s223_s11, [#allocation6], %s9277_s21, %s9277_s21, %s9278_s22  }
  0x16   : > { %8892 = dma.hbm_to_vmem [thread:$0]  (!%p9366_p6), %s247_s14, 65536, %s249_s20, [#allocation9], %s9277_s21, %s9277_s21, %s9278_s22  }
  0x17   : > { %s9280_s13 = smov 64   ;;  %s9281_s16 = smov 4  }
  0x18   : > { %8898 = dma.hbm_to_vmem [thread:$0]  (!%p9366_p6), %s273_s18, 8192, %s275_s28, [#allocation12], %s9280_s13, %s9280_s13, %s9281_s16  }
  0x19   : > { %s9282_s30 = smov [#allocation7]   ;;  %s261_s14 = sshll.u32 %s9687_s4, 4  ;;  %s262_s14 = int_to_ptr.hbm [resolvable:$true] %s261_s14 }
  0x1a   : > { %s235_s12 = sshll.u32 %s9696_s2, 4  ;;  %s237_s11 = sshll.u32 %s9282_s30, 4  ;;  %s236_s12 = int_to_ptr.hbm [resolvable:$true] %s235_s12  ;;  %s238_s11 = int_to_ptr.vmem [resolvable:$true] %s237_s11 }
  0x1b   : > { %8889 = dma.hbm_to_vmem [thread:$0]  (!%p9366_p6), %s236_s12, 128, %s238_s11, [#allocation6]  }
  0x1c   : > { %s287_s18 = sshll.u32 %s9689_s6, 4  ;;  %s9283_s22 = smov [#allocation10]   ;;  %s288_s18 = int_to_ptr.hbm [resolvable:$true] %s287_s18 }
  0x1d   : > { %s263_s23 = sshll.u32 %s9283_s22, 4  ;;  %s9284_s28 = smov [#allocation13]   ;;  %s264_s23 = int_to_ptr.vmem [resolvable:$true] %s263_s23 }
  0x1e   : > { %8895 = dma.hbm_to_vmem [thread:$0]  (!%p9366_p6), %s262_s14, 128, %s264_s23, [#allocation9]  }
  0x1f   : > { %s289_s29 = sshll.u32 %s9284_s28, 4  ;;  %s5631_s10 = sadd.s32 4294967294, %s9273_s27   ;;  %s290_s29 = int_to_ptr.vmem [resolvable:$true] %s289_s29 }
  0x20   : > { %8901 = dma.hbm_to_vmem [thread:$0]  (!%p9366_p6), %s288_s18, 16, %s290_s29, [#allocation12]  }
  0x21   : > { %s9396_s12 = sadd.s32 1, %s9273_s27   ;;  %s33_s16 = sadd.s32 1, %s9269_s26 }
  0x22   : > { %s30_s13 = ssub.s32 %s9273_s27, %s9396_s12  ;;  %p40_p8 = scmp.ne.s32.totalorder %s9269_s26, %s9265_s25 }
  0x23   : > { %p31_p7 = scmp.eq.s32.totalorder %s30_s13, 0  ;;  %p41_p9 = scmp.eq.s32.totalorder %s9273_s27, 0 }
  0x24   : > { %p46_p10 = scmp.ne.s32.totalorder %s9265_s25, %s9261_s24  ;;  %p196_p13 = scmp.eq.s32.totalorder %s9349_s8, 1 }
  0x25   : > { %s9407_s30 = scalar_select %p31_p7, %s9269_s26, %s33_s16  }
  0x26   : > { %p9409_p11 = por %p41_p9, %p40_p8  ;;  %p9415_p12 = por %p47_p1, %p46_p10 }
  0x27   : > { %p202_p0 = scmp.eq.s32.totalorder %s5631_s10, 1  ;;  %p8916_p2 = scmp.lt.s32.totalorder %s9273_s27, 2 }
  0x28   : > { %s300_s17 = sand.u32 1, %s9269_s26   ;;  %p9422_p4 = por %p196_p13, %p40_p8 }
  0x29   : > { %p9426_p6 = por %p202_p0, %p46_p10  ;;  %s5640_s20 = sshll.u32 %s300_s17, 3 }
  0x2a   : > { %s5641_s21 = sshll.u32 %s9273_s27, 3  ;;  %s304_s28 = scalar_lea.vmem [#allocation2], %s5640_s20 }
  0x2b   : > { %s308_s23 = scalar_lea.hbm %s9683_s0, %s5641_s21  ;;  %s312_s29 = sshll.u32 %s304_s28, 4  ;;  %s313_s29 = int_to_ptr.vmem [resolvable:$true] %s312_s29 }
  0x2c   : > { %s310_s13 = sshll.u32 %s308_s23, 4  ;;  %p9436_p7 = pnand %p8916_p2, %p9409_p11  ;;  %s311_s13 = int_to_ptr.hbm [resolvable:$true] %s310_s13 }
  0x2d   : > { %s301_s16 = scalar_lea.sflag [#allocation3], %s300_s17  ;;  %s9165_s1 = sshra.s32 %s311_s13, 4  ;;  %s9166_s1 = int_to_ptr.hbm [resolvable:$true] %s9165_s1 }
  0x2e   : > { %s9167_s2 = scalar_lea.hbm %s9166_s1, 8  ;;  %p9169_p9 = pneg %p9436_p7 }
  0x2f   : > { %p9168_p8 = scmp.ne.s32.totalorder %s9166_s1, %s9167_s2  ;;  %s9172_s18 = scalar_lea.hbm %s9683_s0, 16 }
  0x30   : > { %p9173_p11 = scmp.lt.s32.totalorder %s9166_s1, %s9683_s0  ;;  %p9174_p0 = scmp.lt.s32.totalorder %s9172_s18, %s9167_s2 }
  0x31   : > { %p9170_p10 = pnand %p9169_p9, %p9168_p8 }
  0x32   : > { %p9175_p2 = por %p9174_p0, %p9173_p11 }
  0x33   : > { %p9171_p13 = pneg %p9170_p10 }
  0x35   : > { %p9176_p5 = pnand %p9175_p2, %p9171_p13 }
  0x37   : > { %9179 = shalt.err (!%p9176_p5)
}
  0x38   : > { %8905 = dma.hbm_to_vmem [thread:$0]  (!%p9436_p7), %s311_s13, 128, %s313_s29, %s301_s16  }
  0x39   : > { %321 = sbr.rel (%p9354_p3) target bundleno = 1167 (0x48f), region = 48  ;;  %s9453_s17 = sand.u32 (!%p9354_p3), 1, %s9265_s25  }
  0x3a   : > { %s5643_s23 = sshll.u32 (!%p9354_p3), %s9453_s17, 3  ;;  %s324_s28 = scalar_lea.sflag (!%p9354_p3), [#allocation3], %s9453_s17 }
  0x3b   : > { %s9459_s1 = scalar_lea.vmem (!%p9354_p3), [#allocation2], %s5643_s23 }
  0x3e   : > { %9240 = dma.done.wait (%p9415_p12), %s324_s28, 128  }
  0x3f   : > { %9242 = vsyncadd (%p9415_p12), %s324_s28, 4294967168 }
  0x40   : > { %9244 = dma.done.wait (%p47_p1), [#allocation6], 8320  }
  0x41   : > { %9246 = vsyncadd (%p47_p1), [#allocation6], 4294958976 }
  0x42   : > { %9248 = dma.done.wait (%p47_p1), [#allocation9], 65664  }
  0x43   : > { %9250 = vsyncadd (%p47_p1), [#allocation9], 4294901632 }
  0x44   : > { %9252 = dma.done.wait (%p47_p1), [#allocation12], 8208  }
  0x45   : > { %9254 = vsyncadd (%p47_p1), [#allocation12], 4294959088  ;;  %v5877_v0 = vld [vmem:[#allocation5 + $0x1c0] sm:$0xf]  ;;  %v8271_v2 = vld [vmem:[#allocation5 + $0x1c4] sm:$0xf] }
  0x46   : > { %v8275_v1 = vld [vmem:[#allocation5 + $0x1dc] sm:$0xf0]  ;;  %v5879_v4 = vld [vmem:[#allocation5 + $0x1e0] sm:$0xf0]  ;;  %v5885_v5 = vld [vmem:[#allocation5 + $0x1c8] sm:$0xf] }
  0x47   : > { %v5878_v3 = vor.u32 %v8275_v1, %v5877_v0  ;;  %v8276_v6 = vld [vmem:[#allocation5 + $0x1e4] sm:$0xf0]  ;;  %v5882_v7 = vor.u32 %v8271_v2, %v5879_v4  ;;  %v8272_v9 = vld [vmem:[#allocation5 + $0x1cc] sm:$0xf]  ;;  %v5845_v11 = vld [vmem:[#allocation5 + $0x180] sm:$0xf] }
  0x48   : > { %v5886_v8 = vor.u32 %v8276_v6, %v5885_v5  ;;  %v5887_v10 = vld [vmem:[#allocation5 + $0x1e8] sm:$0xf0]  ;;  %v8267_v13 = vld [vmem:[#allocation5 + $0x19c] sm:$0xf0]  ;;  %v8263_v14 = vld [vmem:[#allocation5 + $0x184] sm:$0xf] }
  0x49   : > { %793 = vmatpush.bf16.msra.mxu0 %v5878_v3  ;;  %v5890_v12 = vor.u32 %v8272_v9, %v5887_v10  ;;  %v5847_v15 = vld [vmem:[#allocation5 + $0x1a0] sm:$0xf0]  ;;  %806 = vmatpush.bf16.msra.mxu1 %v5882_v7  ;;  %v5846_v16 = vor.u32 %v8267_v13, %v5845_v11  ;;  %v5853_v18 = vld [vmem:[#allocation5 + $0x188] sm:$0xf]  ;;  %v8264_v20 = vld [vmem:[#allocation5 + $0x18c] sm:$0xf] }
  0x4a   : > { %819 = vmatpush.bf16.msra.mxu2 %v5886_v8  ;;  %v5850_v17 = vor.u32 %v8263_v14, %v5847_v15  ;;  %v8268_v19 = vld [vmem:[#allocation5 + $0x1a4] sm:$0xf0]  ;;  %v5855_v22 = vld [vmem:[#allocation5 + $0x1a8] sm:$0xf0]  ;;  %v5813_v23 = vld [vmem:[#allocation5 + $0x140] sm:$0xf] }
  0x4b   : > { %832 = vmatpush.bf16.msra.mxu3 %v5890_v12  ;;  %v5854_v21 = vor.u32 %v8268_v19, %v5853_v18  ;;  %v8259_v24 = vld [vmem:[#allocation5 + $0x15c] sm:$0xf0]  ;;  %v5858_v25 = vor.u32 %v8264_v20, %v5855_v22  ;;  %v8255_v26 = vld [vmem:[#allocation5 + $0x144] sm:$0xf]  ;;  %v5821_v28 = vld [vmem:[#allocation5 + $0x148] sm:$0xf] }
  0x4c   : > { %v5815_v27 = vld [vmem:[#allocation5 + $0x160] sm:$0xf0]  ;;  %v5814_v29 = vor.u32 %v8259_v24, %v5813_v23  ;;  %v8260_v30 = vld [vmem:[#allocation5 + $0x164] sm:$0xf0]  ;;  %v8256_v31 = vld [vmem:[#allocation5 + $0x14c] sm:$0xf] }
  0x4d   : > { %794 = vmatpush.bf16.msra.mxu0 %v5846_v16  ;;  %v5823_v32 = vld [vmem:[#allocation5 + $0x168] sm:$0xf0]  ;;  %807 = vmatpush.bf16.msra.mxu1 %v5850_v17  ;;  %v5818_v33 = vor.u32 %v8255_v26, %v5815_v27  ;;  %v5822_v34 = vor.u32 %v8260_v30, %v5821_v28  ;;  %v5781_v35 = vld [vmem:[#allocation5 + $0x100] sm:$0xf]  ;;  %v8247_v37 = vld [vmem:[#allocation5 + $0x104] sm:$0xf] }
  0x4e   : > { %820 = vmatpush.bf16.msra.mxu2 %v5854_v21  ;;  %v8251_v36 = vld [vmem:[#allocation5 + $0x11c] sm:$0xf0]  ;;  %v5826_v38 = vor.u32 %v8256_v31, %v5823_v32  ;;  %v5783_v39 = vld [vmem:[#allocation5 + $0x120] sm:$0xf0]  ;;  %v5789_v40 = vld [vmem:[#allocation5 + $0x108] sm:$0xf] }
  0x4f   : > { %833 = vmatpush.bf16.msra.mxu3 %v5858_v25  ;;  %v8252_v41 = vld [vmem:[#allocation5 + $0x124] sm:$0xf0]  ;;  %v8248_v42 = vld [vmem:[#allocation5 + $0x10c] sm:$0xf]  ;;  %v5782_v44 = vor.u32 %v8251_v36, %v5781_v35  ;;  %v5786_v45 = vor.u32 %v8247_v37, %v5783_v39  ;;  %v5749_v47 = vld [vmem:[#allocation5 + $0xc0] sm:$0xf] }
  0x50   : > { %v5791_v43 = vld [vmem:[#allocation5 + $0x128] sm:$0xf0]  ;;  %v5790_v46 = vor.u32 %v8252_v41, %v5789_v40  ;;  %v8243_v48 = vld [vmem:[#allocation5 + $0xdc] sm:$0xf0]  ;;  %v8239_v49 = vld [vmem:[#allocation5 + $0xc4] sm:$0xf] }
  0x51   : > { %795 = vmatpush.bf16.msra.mxu0 %v5814_v29  ;;  %808 = vmatpush.bf16.msra.mxu1 %v5818_v33  ;;  %v5794_v50 = vor.u32 %v8248_v42, %v5791_v43  ;;  %v5751_v51 = vld [vmem:[#allocation5 + $0xe0] sm:$0xf0]  ;;  %v5757_v52 = vld [vmem:[#allocation5 + $0xc8] sm:$0xf]  ;;  %v8240_v54 = vld [vmem:[#allocation5 + $0xcc] sm:$0xf]  ;;  %v5750_v56 = vor.u32 %v8243_v48, %v5749_v47 }
  0x52   : > { %821 = vmatpush.bf16.msra.mxu2 %v5822_v34  ;;  %v8244_v53 = vld [vmem:[#allocation5 + $0xe4] sm:$0xf0]  ;;  %v5759_v55 = vld [vmem:[#allocation5 + $0xe8] sm:$0xf0]  ;;  %v5754_v57 = vor.u32 %v8239_v49, %v5751_v51  ;;  %v5717_v59 = vld [vmem:[#allocation5 + $0x80] sm:$0xf] }
  0x53   : > { %834 = vmatpush.bf16.msra.mxu3 %v5826_v38  ;;  %v5758_v58 = vor.u32 %v8244_v53, %v5757_v52  ;;  %v8235_v60 = vld [vmem:[#allocation5 + $0x9c] sm:$0xf0]  ;;  %v8231_v61 = vld [vmem:[#allocation5 + $0x84] sm:$0xf]  ;;  %v5762_v62 = vor.u32 %v8240_v54, %v5759_v55  ;;  %v5725_v0 = vld [vmem:[#allocation5 + $0x88] sm:$0xf] }
  0x54   : > { %v5719_v63 = vld [vmem:[#allocation5 + $0xa0] sm:$0xf0]  ;;  %v8236_v1 = vld [vmem:[#allocation5 + $0xa4] sm:$0xf0]  ;;  %v8232_v2 = vld [vmem:[#allocation5 + $0x8c] sm:$0xf]  ;;  %v5718_v4 = vor.u32 %v8235_v60, %v5717_v59 }
  0x55   : > { %796 = vmatpush.bf16.msra.mxu0 %v5782_v44  ;;  %809 = vmatpush.bf16.msra.mxu1 %v5786_v45  ;;  %v5727_v3 = vld [vmem:[#allocation5 + $0xa8] sm:$0xf0]  ;;  %v5722_v5 = vor.u32 %v8231_v61, %v5719_v63  ;;  %v5726_v6 = vor.u32 %v8236_v1, %v5725_v0  ;;  %v5685_v7 = vld [vmem:[#allocation5 + $0x40] sm:$0xf]  ;;  %v8223_v9 = vld [vmem:[#allocation5 + $0x44] sm:$0xf] }
  0x56   : > { %822 = vmatpush.bf16.msra.mxu2 %v5790_v46  ;;  %v8227_v8 = vld [vmem:[#allocation5 + $0x5c] sm:$0xf0]  ;;  %v5730_v10 = vor.u32 %v8232_v2, %v5727_v3  ;;  %v5687_v11 = vld [vmem:[#allocation5 + $0x60] sm:$0xf0]  ;;  %v5693_v12 = vld [vmem:[#allocation5 + $0x48] sm:$0xf] }
  0x57   : > { %835 = vmatpush.bf16.msra.mxu3 %v5794_v50  ;;  %v8228_v13 = vld [vmem:[#allocation5 + $0x64] sm:$0xf0]  ;;  %v8224_v14 = vld [vmem:[#allocation5 + $0x4c] sm:$0xf]  ;;  %v5686_v16 = vor.u32 %v8227_v8, %v5685_v7  ;;  %v5653_v17 = vld [vmem:[#allocation5] sm:$0xf]  ;;  %v5690_v19 = vor.u32 %v8223_v9, %v5687_v11 }
  0x58   : > { %v5695_v15 = vld [vmem:[#allocation5 + $0x68] sm:$0xf0]  ;;  %v8219_v18 = vld [vmem:[#allocation5 + $0x1c] sm:$0xf0]  ;;  %v5694_v20 = vor.u32 %v8228_v13, %v5693_v12  ;;  %v8215_v21 = vld [vmem:[#allocation5 + $0x4] sm:$0xf] }
  0x59   : > { %797 = vmatpush.bf16.msra.mxu0 %v5750_v56  ;;  %810 = vmatpush.bf16.msra.mxu1 %v5754_v57  ;;  %v5655_v22 = vld [vmem:[#allocation5 + $0x20] sm:$0xf0]  ;;  %v5661_v23 = vld [vmem:[#allocation5 + $0x8] sm:$0xf]  ;;  %v5698_v24 = vor.u32 %v8224_v14, %v5695_v15  ;;  %v8216_v26 = vld [vmem:[#allocation5 + $0xc] sm:$0xf]  ;;  %v5654_v31 = vor.u32 %v8219_v18, %v5653_v17 }
  0x5a   : > { %823 = vmatpush.bf16.msra.mxu2 %v5758_v58  ;;  %v8220_v25 = vld [vmem:[#allocation5 + $0x24] sm:$0xf0]  ;;  %v5663_v27 = vld [vmem:[#allocation5 + $0x28] sm:$0xf0]  ;;  %v5893_v28 = vld [vmem:[#allocation5 + $0x1d0] sm:$0xf]  ;;  %v5658_v35 = vor.u32 %v8215_v21, %v5655_v22 }
  0x5b   : > { %836 = vmatpush.bf16.msra.mxu3 %v5762_v62  ;;  %v8277_v29 = vld [vmem:[#allocation5 + $0x1ec] sm:$0xf0]  ;;  %v8273_v30 = vld [vmem:[#allocation5 + $0x1d4] sm:$0xf]  ;;  %v5901_v33 = vld [vmem:[#allocation5 + $0x1d8] sm:$0xf]  ;;  %v5662_v36 = vor.u32 %v8220_v25, %v5661_v23  ;;  %v5666_v40 = vor.u32 %v8216_v26, %v5663_v27 }
  0x5c   : > { %v5895_v32 = vld [vmem:[#allocation5 + $0x1f0] sm:$0xf0]  ;;  %v8278_v34 = vld [vmem:[#allocation5 + $0x1f4] sm:$0xf0]  ;;  %v8274_v37 = vld [vmem:[#allocation5 + $0x1dc] sm:$0xf]  ;;  %v5894_v41 = vor.u32 %v8277_v29, %v5893_v28 }
  0x5d   : > { %798 = vmatpush.bf16.msra.mxu0 %v5718_v4  ;;  %811 = vmatpush.bf16.msra.mxu1 %v5722_v5  ;;  %v5903_v38 = vld [vmem:[#allocation5 + $0x1f8] sm:$0xf0]  ;;  %v5898_v42 = vor.u32 %v8273_v30, %v5895_v32  ;;  %v5902_v43 = vor.u32 %v8278_v34, %v5901_v33  ;;  %v5861_v44 = vld [vmem:[#allocation5 + $0x190] sm:$0xf]  ;;  %v8265_v46 = vld [vmem:[#allocation5 + $0x194] sm:$0xf] }
  0x5e   : > { %824 = vmatpush.bf16.msra.mxu2 %v5726_v6  ;;  %v389_v39 = vld [vmem:[%s9459_s1] sm:$0xff]  ;;  %v5906_v47 = vor.u32 %v8274_v37, %v5903_v38  ;;  %s8212_s2 = sshll.u32 %s9349_s8, 3  ;;  %s388_s13 = scalar_lea.vmem [#allocation14], %s5643_s23 }
  0x5f   : > { %837 = vmatpush.bf16.msra.mxu3 %v5730_v10  ;;  %v8269_v45 = vld [vmem:[#allocation5 + $0x1ac] sm:$0xf0]  ;;  %v9478_v48 = vpack.c.bf16 %v389_v39, %v389_v39  ;;  %v5863_v49 = vld [vmem:[#allocation5 + $0x1b0] sm:$0xf0]  ;;  %v5869_v50 = vld [vmem:[#allocation5 + $0x198] sm:$0xf]  ;;  %s5499_s29 = scalar_lea.hbm %s9690_s7, %s8212_s2 }
  0x60   : > { %v8270_v51 = vld [vmem:[#allocation5 + $0x1b4] sm:$0xf0]  ;;  %v8266_v52 = vld [vmem:[#allocation5 + $0x19c] sm:$0xf]  ;;  %v5862_v54 = vor.u32 %v8269_v45, %v5861_v44  ;;  %v5866_v55 = vor.u32 %v8265_v46, %v5863_v49  ;;  %v5829_v57 = vld [vmem:[#allocation5 + $0x150] sm:$0xf] }
  0x61   : > { %799 = vmatpush.bf16.msra.mxu0 %v5686_v16  ;;  %812 = vmatpush.bf16.msra.mxu1 %v5690_v19  ;;  %v5871_v53 = vld [vmem:[#allocation5 + $0x1b8] sm:$0xf0]  ;;  %v5870_v56 = vor.u32 %v8270_v51, %v5869_v50  ;;  %v8261_v58 = vld [vmem:[#allocation5 + $0x16c] sm:$0xf0]  ;;  %v8257_v59 = vld [vmem:[#allocation5 + $0x154] sm:$0xf] }
  0x62   : > { %825 = vmatpush.bf16.msra.mxu2 %v5694_v20  ;;  %v5874_v60 = vor.u32 %v8266_v52, %v5871_v53  ;;  %v5831_v61 = vld [vmem:[#allocation5 + $0x170] sm:$0xf0]  ;;  %v5837_v62 = vld [vmem:[#allocation5 + $0x158] sm:$0xf]  ;;  %v8258_v0 = vld [vmem:[#allocation5 + $0x15c] sm:$0xf]  ;;  %v5830_v2 = vor.u32 %v8261_v58, %v5829_v57 }
  0x63   : > { %838 = vmatpush.bf16.msra.mxu3 %v5698_v24  ;;  %v8262_v63 = vld [vmem:[#allocation5 + $0x174] sm:$0xf0]  ;;  %v5839_v1 = vld [vmem:[#allocation5 + $0x178] sm:$0xf0]  ;;  %v5834_v3 = vor.u32 %v8257_v59, %v5831_v61  ;;  %v5797_v5 = vld [vmem:[#allocation5 + $0x110] sm:$0xf] }
  0x64   : > { %v5838_v4 = vor.u32 %v8262_v63, %v5837_v62  ;;  %v8253_v6 = vld [vmem:[#allocation5 + $0x12c] sm:$0xf0]  ;;  %v8249_v7 = vld [vmem:[#allocation5 + $0x114] sm:$0xf]  ;;  %v5842_v8 = vor.u32 %v8258_v0, %v5839_v1  ;;  %v5805_v10 = vld [vmem:[#allocation5 + $0x118] sm:$0xf] }
  0x65   : > { %800 = vmatpush.bf16.msra.mxu0 %v5654_v31  ;;  %813 = vmatpush.bf16.msra.mxu1 %v5658_v35  ;;  %v5799_v9 = vld [vmem:[#allocation5 + $0x130] sm:$0xf0]  ;;  %v8254_v11 = vld [vmem:[#allocation5 + $0x134] sm:$0xf0]  ;;  %v8250_v12 = vld [vmem:[#allocation5 + $0x11c] sm:$0xf]  ;;  %v5798_v14 = vor.u32 %v8253_v6, %v5797_v5 }
  0x66   : > { %826 = vmatpush.bf16.msra.mxu2 %v5662_v36  ;;  %v5807_v13 = vld [vmem:[#allocation5 + $0x138] sm:$0xf0]  ;;  %v5802_v15 = vor.u32 %v8249_v7, %v5799_v9  ;;  %v5806_v16 = vor.u32 %v8254_v11, %v5805_v10  ;;  %v5765_v17 = vld [vmem:[#allocation5 + $0xd0] sm:$0xf]  ;;  %v8241_v19 = vld [vmem:[#allocation5 + $0xd4] sm:$0xf] }
  0x67   : > { %839 = vmatpush.bf16.msra.mxu3 %v5666_v40  ;;  %v8245_v18 = vld [vmem:[#allocation5 + $0xec] sm:$0xf0]  ;;  %v5810_v20 = vor.u32 %v8250_v12, %v5807_v13  ;;  %v5767_v21 = vld [vmem:[#allocation5 + $0xf0] sm:$0xf0]  ;;  %v5773_v22 = vld [vmem:[#allocation5 + $0xd8] sm:$0xf] }
  0x68   : > { %801 = vmatmul.bf16.vlgmr.msra.gmra.mxu0 %v9478_v48  ;;  %814 = vmatmul.bf16.vlgmr.msra.gmra.mxu1 %v9478_v48  ;;  %v8246_v23 = vld [vmem:[#allocation5 + $0xf4] sm:$0xf0]  ;;  %v8242_v24 = vld [vmem:[#allocation5 + $0xdc] sm:$0xf]  ;;  %v5766_v26 = vor.u32 %v8245_v18, %v5765_v17  ;;  %v5770_v27 = vor.u32 %v8241_v19, %v5767_v21  ;;  %v5733_v29 = vld [vmem:[#allocation5 + $0x90] sm:$0xf] }
  0x69   : > { %845 = vmatpush.bf16.msrb.mxu0 %v5894_v41  ;;  %858 = vmatpush.bf16.msrb.mxu1 %v5898_v42  ;;  %v5775_v25 = vld [vmem:[#allocation5 + $0xf8] sm:$0xf0]  ;;  %v5774_v28 = vor.u32 %v8246_v23, %v5773_v22  ;;  %v8237_v30 = vld [vmem:[#allocation5 + $0xac] sm:$0xf0]  ;;  %v8233_v31 = vld [vmem:[#allocation5 + $0x94] sm:$0xf] }
  0x6a   : > { %871 = vmatpush.bf16.msrb.mxu2 %v5902_v43  ;;  %840 = vmatmul.bf16.vlgmr.msra.gmra.mxu3 %v9478_v48  ;;  %v5778_v32 = vor.u32 %v8242_v24, %v5775_v25  ;;  %v5735_v33 = vld [vmem:[#allocation5 + $0xb0] sm:$0xf0]  ;;  %v5741_v34 = vld [vmem:[#allocation5 + $0x98] sm:$0xf]  ;;  %v8234_v36 = vld [vmem:[#allocation5 + $0x9c] sm:$0xf]  ;;  %v5734_v38 = vor.u32 %v8237_v30, %v5733_v29 }
  0x6b   : > { %884 = vmatpush.bf16.msrb.mxu3 %v5906_v47  ;;  %827 = vmatmul.bf16.vlgmr.msra.gmra.mxu2 %v9478_v48  ;;  %v8238_v35 = vld [vmem:[#allocation5 + $0xb4] sm:$0xf0]  ;;  %v5743_v37 = vld [vmem:[#allocation5 + $0xb8] sm:$0xf0]  ;;  %v5738_v39 = vor.u32 %v8233_v31, %v5735_v33  ;;  %v5701_v41 = vld [vmem:[#allocation5 + $0x50] sm:$0xf] }
  0x6c   : > { %v5742_v40 = vor.u32 %v8238_v35, %v5741_v34  ;;  %v8229_v42 = vld [vmem:[#allocation5 + $0x6c] sm:$0xf0]  ;;  %v8225_v43 = vld [vmem:[#allocation5 + $0x54] sm:$0xf]  ;;  %v5746_v44 = vor.u32 %v8234_v36, %v5743_v37  ;;  %v5709_v46 = vld [vmem:[#allocation5 + $0x58] sm:$0xf] }
  0x6d   : > { %846 = vmatpush.bf16.msrb.mxu0 %v5862_v54  ;;  %859 = vmatpush.bf16.msrb.mxu1 %v5866_v55  ;;  %v5703_v45 = vld [vmem:[#allocation5 + $0x70] sm:$0xf0]  ;;  %v8230_v47 = vld [vmem:[#allocation5 + $0x74] sm:$0xf0]  ;;  %v8226_v49 = vld [vmem:[#allocation5 + $0x5c] sm:$0xf]  ;;  %v5702_v51 = vor.u32 %v8229_v42, %v5701_v41 }
  0x6e   : > { %872 = vmatpush.bf16.msrb.mxu2 %v5870_v56  ;;  %v5711_v50 = vld [vmem:[#allocation5 + $0x78] sm:$0xf0]  ;;  %v5669_v52 = vld [vmem:[#allocation5 + $0x10] sm:$0xf]  ;;  %v5706_v53 = vor.u32 %v8225_v43, %v5703_v45  ;;  %v5710_v54 = vor.u32 %v8230_v47, %v5709_v46  ;;  %v8217_v56 = vld [vmem:[#allocation5 + $0x14] sm:$0xf] }
  0x6f   : > { %885 = vmatpush.bf16.msrb.mxu3 %v5874_v60  ;;  %v8221_v55 = vld [vmem:[#allocation5 + $0x2c] sm:$0xf0]  ;;  %v5671_v57 = vld [vmem:[#allocation5 + $0x30] sm:$0xf0]  ;;  %v5714_v58 = vor.u32 %v8226_v49, %v5711_v50  ;;  %v5677_v59 = vld [vmem:[#allocation5 + $0x18] sm:$0xf] }
  0x70   : > { %v8222_v60 = vld [vmem:[#allocation5 + $0x34] sm:$0xf0]  ;;  %v8218_v61 = vld [vmem:[#allocation5 + $0x1c] sm:$0xf]  ;;  %v6133_v63 = vld [vmem:[#allocation8 + $0x1c0] sm:$0xf]  ;;  %v5670_v1 = vor.u32 %v8221_v55, %v5669_v52 }
  0x71   : > { %847 = vmatpush.bf16.msrb.mxu0 %v5830_v2  ;;  %860 = vmatpush.bf16.msrb.mxu1 %v5834_v3  ;;  %v5679_v62 = vld [vmem:[#allocation5 + $0x38] sm:$0xf0]  ;;  %v8339_v0 = vld [vmem:[#allocation8 + $0x1dc] sm:$0xf0]  ;;  %v5678_v5 = vor.u32 %v8222_v60, %v5677_v59  ;;  %s5501_s10 = sshll.u32 %s388_s13, 4  ;;  %s5503_s16 = sshll.u32 %s5499_s29, 4  ;;  %s5502_s10 = int_to_ptr.vmem [resolvable:$true] %s5501_s10  ;;  %s5504_s16 = int_to_ptr.hbm [resolvable:$true] %s5503_s16 }
  0x72   : > { %873 = vmatpush.bf16.msrb.mxu2 %v5838_v4  ;;  %v6389_v2 = vld [vmem:[#allocation8 + $0x3c0] sm:$0xf]  ;;  %v5674_v4 = vor.u32 %v8217_v56, %v5671_v57  ;;  %v5682_v6 = vor.u32 %v8218_v61, %v5679_v62  ;;  %v6134_v7 = vor.u32 %v8339_v0, %v6133_v63  ;;  %s5489_s20 = scalar_lea.sflag [#allocation4], %s9453_s17  ;;  %s9209_s21 = sshra.s32 %s5504_s16, 4  ;;  %s9210_s21 = int_to_ptr.hbm [resolvable:$true] %s9209_s21 }
  0x73   : > { %886 = vmatpush.bf16.msrb.mxu3 %v5842_v8  ;;  %v8403_v3 = vld [vmem:[#allocation8 + $0x3dc] sm:$0xf0]  ;;  %s9211_s18 = scalar_lea.hbm %s9210_s21, 8  ;;  %s9215_s11 = scalar_lea.hbm %s9690_s7, 16 }
  0x74   : > { %v6101_v8 = vld [vmem:[#allocation8 + $0x180] sm:$0xf]  ;;  %v6390_v11 = vor.u32 %v8403_v3, %v6389_v2  ;;  %p9212_p1 = scmp.ne.s32.totalorder %s9210_s21, %s9211_s18  ;;  %p9216_p12 = scmp.lt.s32.totalorder %s9210_s21, %s9690_s7 }
  0x75   : > { %848 = vmatpush.bf16.msrb.mxu0 %v5798_v14  ;;  %861 = vmatpush.bf16.msrb.mxu1 %v5802_v15  ;;  %v6645_v9 = vld [vmem:[#allocation8 + $0x5c0] sm:$0xf]  ;;  %p9217_p7 = scmp.lt.s32.totalorder %s9215_s11, %s9211_s18 }
  0x76   : > { %874 = vmatpush.bf16.msrb.mxu2 %v5806_v16  ;;  %v8467_v10 = vld [vmem:[#allocation8 + $0x5dc] sm:$0xf0]  ;;  %p9213_p3 = pnand %p9212_p1, %p9422_p4 }
  0x77   : > { %887 = vmatpush.bf16.msrb.mxu3 %v5810_v20  ;;  %v8331_v12 = vld [vmem:[#allocation8 + $0x19c] sm:$0xf0]  ;;  %v6646_v17 = vor.u32 %v8467_v10, %v6645_v9  ;;  %p9218_p8 = por %p9217_p7, %p9216_p12 }
  0x78   : > { %v6901_v13 = vld [vmem:[#allocation8 + $0x7c0] sm:$0xf]  ;;  %v6102_v18 = vor.u32 %v8331_v12, %v6101_v8  ;;  %p9214_p5 = pneg %p9213_p3 }
  0x79   : > { %849 = vmatpush.bf16.msrb.mxu0 %v5766_v26  ;;  %862 = vmatpush.bf16.msrb.mxu1 %v5770_v27  ;;  %v8531_v14 = vld [vmem:[#allocation8 + $0x7dc] sm:$0xf0] }
  0x7a   : > { %875 = vmatpush.bf16.msrb.mxu2 %v5774_v28  ;;  %v6357_v15 = vld [vmem:[#allocation8 + $0x380] sm:$0xf]  ;;  %v6902_v19 = vor.u32 %v8531_v14, %v6901_v13  ;;  %p9219_p9 = pnand %p9218_p8, %p9214_p5 }
  0x7b   : > { %888 = vmatpush.bf16.msrb.mxu3 %v5778_v32  ;;  %v8395_v16 = vld [vmem:[#allocation8 + $0x39c] sm:$0xf0] }
  0x7c   : > { %v6069_v20 = vld [vmem:[#allocation8 + $0x140] sm:$0xf]  ;;  %v6358_v23 = vor.u32 %v8395_v16, %v6357_v15 }
  0x7d   : > { %850 = vmatpush.bf16.msrb.mxu0 %v5734_v38  ;;  %863 = vmatpush.bf16.msrb.mxu1 %v5738_v39  ;;  %v6613_v21 = vld [vmem:[#allocation8 + $0x580] sm:$0xf] }
  0x7e   : > { %876 = vmatpush.bf16.msrb.mxu2 %v5742_v40  ;;  %v8459_v22 = vld [vmem:[#allocation8 + $0x59c] sm:$0xf0] }
  0x7f   : > { %889 = vmatpush.bf16.msrb.mxu3 %v5746_v44  ;;  %v8323_v24 = vld [vmem:[#allocation8 + $0x15c] sm:$0xf0]  ;;  %v6614_v29 = vor.u32 %v8459_v22, %v6613_v21 }
  0x80   : > { %v6869_v25 = vld [vmem:[#allocation8 + $0x780] sm:$0xf]  ;;  %v6070_v30 = vor.u32 %v8323_v24, %v6069_v20 }
  0x81   : > { %851 = vmatpush.bf16.msrb.mxu0 %v5702_v51  ;;  %864 = vmatpush.bf16.msrb.mxu1 %v5706_v53  ;;  %v8523_v26 = vld [vmem:[#allocation8 + $0x79c] sm:$0xf0] }
  0x82   : > { %877 = vmatpush.bf16.msrb.mxu2 %v5710_v54  ;;  %v6325_v27 = vld [vmem:[#allocation8 + $0x340] sm:$0xf]  ;;  %v6870_v31 = vor.u32 %v8523_v26, %v6869_v25 }
  0x83   : > { %890 = vmatpush.bf16.msrb.mxu3 %v5714_v58  ;;  %v8387_v28 = vld [vmem:[#allocation8 + $0x35c] sm:$0xf0] }
  0x84   : > { %v6037_v32 = vld [vmem:[#allocation8 + $0x100] sm:$0xf]  ;;  %v6326_v35 = vor.u32 %v8387_v28, %v6325_v27 }
  0x85   : > { %852 = vmatpush.bf16.msrb.mxu0 %v5670_v1  ;;  %865 = vmatpush.bf16.msrb.mxu1 %v5674_v4  ;;  %v6581_v33 = vld [vmem:[#allocation8 + $0x540] sm:$0xf] }
  0x86   : > { %878 = vmatpush.bf16.msrb.mxu2 %v5678_v5  ;;  %v8451_v34 = vld [vmem:[#allocation8 + $0x55c] sm:$0xf0] }
  0x87   : > { %891 = vmatpush.bf16.msrb.mxu3 %v5682_v6  ;;  %v8315_v36 = vld [vmem:[#allocation8 + $0x11c] sm:$0xf0]  ;;  %v6582_v41 = vor.u32 %v8451_v34, %v6581_v33 }
  0x88   : > { %853 = vmatmul.bf16.vlgmr.msrb.gmra.mxu0 %v9478_v48  ;;  %866 = vmatmul.bf16.vlgmr.msrb.gmra.mxu1 %v9478_v48  ;;  %v6837_v37 = vld [vmem:[#allocation8 + $0x740] sm:$0xf] }
  0x89   : > { %4027 = vmatpush.bf16.msra.mxu0 %v6134_v7  ;;  %4040 = vmatpush.bf16.msra.mxu1 %v6390_v11  ;;  %v8515_v38 = vld [vmem:[#allocation8 + $0x75c] sm:$0xf0] }
  0x8a   : > { %879 = vmatmul.bf16.vlgmr.msrb.gmra.mxu2 %v9478_v48  ;;  %892 = vmatmul.bf16.vlgmr.msrb.gmra.mxu3 %v9478_v48  ;;  %v6293_v39 = vld [vmem:[#allocation8 + $0x300] sm:$0xf]  ;;  %v6038_v48 = vor.u32 %v8315_v36, %v6037_v32  ;;  %v6838_v43 = vor.u32 %v8515_v38, %v6837_v37 }
  0x8b   : > { %4053 = vmatpush.bf16.msra.mxu2 %v6646_v17  ;;  %4066 = vmatpush.bf16.msra.mxu3 %v6902_v19  ;;  %v8379_v40 = vld [vmem:[#allocation8 + $0x31c] sm:$0xf0] }
  0x8c   : > { %v6005_v42 = vld [vmem:[#allocation8 + $0xc0] sm:$0xf]  ;;  %v6294_v46 = vor.u32 %v8379_v40, %v6293_v39 }
  0x8d   : > { %4028 = vmatpush.bf16.msra.mxu0 %v6102_v18  ;;  %4041 = vmatpush.bf16.msra.mxu1 %v6358_v23  ;;  %v6549_v44 = vld [vmem:[#allocation8 + $0x500] sm:$0xf] }
  0x8e   : > { %v8443_v45 = vld [vmem:[#allocation8 + $0x51c] sm:$0xf0] }
  0x8f   : > { %4054 = vmatpush.bf16.msra.mxu2 %v6614_v29  ;;  %4067 = vmatpush.bf16.msra.mxu3 %v6870_v31  ;;  %v8307_v47 = vld [vmem:[#allocation8 + $0xdc] sm:$0xf0]  ;;  %v6550_v53 = vor.u32 %v8443_v45, %v6549_v44 }
  0x90   : > { %v6805_v49 = vld [vmem:[#allocation8 + $0x700] sm:$0xf]  ;;  %v6006_v54 = vor.u32 %v8307_v47, %v6005_v42 }
  0x91   : > { %4029 = vmatpush.bf16.msra.mxu0 %v6070_v30  ;;  %4042 = vmatpush.bf16.msra.mxu1 %v6326_v35  ;;  %v8507_v50 = vld [vmem:[#allocation8 + $0x71c] sm:$0xf0] }
  0x92   : > { %v6261_v51 = vld [vmem:[#allocation8 + $0x2c0] sm:$0xf]  ;;  %v6806_v55 = vor.u32 %v8507_v50, %v6805_v49 }
  0x93   : > { %v8371_v52 = vld [vmem:[#allocation8 + $0x2dc] sm:$0xf0]  ;;  %4055 = vmatpush.bf16.msra.mxu2 %v6582_v41  ;;  %4068 = vmatpush.bf16.msra.mxu3 %v6838_v43 }
  0x94   : > { %v5973_v56 = vld [vmem:[#allocation8 + $0x80] sm:$0xf]  ;;  %v6262_v59 = vor.u32 %v8371_v52, %v6261_v51 }
  0x95   : > { %4030 = vmatpush.bf16.msra.mxu0 %v6038_v48  ;;  %v6517_v57 = vld [vmem:[#allocation8 + $0x4c0] sm:$0xf]  ;;  %4043 = vmatpush.bf16.msra.mxu1 %v6294_v46 }
  0x96   : > { %v8435_v58 = vld [vmem:[#allocation8 + $0x4dc] sm:$0xf0] }
  0x97   : > { %v8299_v60 = vld [vmem:[#allocation8 + $0x9c] sm:$0xf0]  ;;  %4056 = vmatpush.bf16.msra.mxu2 %v6550_v53  ;;  %v6518_v1 = vor.u32 %v8435_v58, %v6517_v57  ;;  %4069 = vmatpush.bf16.msra.mxu3 %v6806_v55 }
  0x98   : > { %v6773_v61 = vld [vmem:[#allocation8 + $0x6c0] sm:$0xf]  ;;  %v5974_v2 = vor.u32 %v8299_v60, %v5973_v56 }
  0x99   : > { %v8499_v62 = vld [vmem:[#allocation8 + $0x6dc] sm:$0xf0]  ;;  %4031 = vmatpush.bf16.msra.mxu0 %v6006_v54  ;;  %4044 = vmatpush.bf16.msra.mxu1 %v6262_v59 }
  0x9a   : > { %v6229_v63 = vld [vmem:[#allocation8 + $0x280] sm:$0xf]  ;;  %v6774_v3 = vor.u32 %v8499_v62, %v6773_v61 }
  0x9b   : > { %v8363_v0 = vld [vmem:[#allocation8 + $0x29c] sm:$0xf0]  ;;  %4057 = vmatpush.bf16.msra.mxu2 %v6518_v1 }
  0x9c   : > { %v5941_v4 = vld [vmem:[#allocation8 + $0x40] sm:$0xf]  ;;  %v6230_v7 = vor.u32 %v8363_v0, %v6229_v63  ;;  %4070 = vmatpush.bf16.msra.mxu3 %v6774_v3 }
  0x9d   : > { %v6485_v5 = vld [vmem:[#allocation8 + $0x480] sm:$0xf]  ;;  %4032 = vmatpush.bf16.msra.mxu0 %v5974_v2 }
  0x9e   : > { %v8427_v6 = vld [vmem:[#allocation8 + $0x49c] sm:$0xf0]  ;;  %4045 = vmatpush.bf16.msra.mxu1 %v6230_v7 }
  0x9f   : > { %v8291_v8 = vld [vmem:[#allocation8 + $0x5c] sm:$0xf0]  ;;  %v6486_v13 = vor.u32 %v8427_v6, %v6485_v5 }
  0xa0   : > { %v6741_v9 = vld [vmem:[#allocation8 + $0x680] sm:$0xf]  ;;  %v5942_v15 = vor.u32 %v8291_v8, %v5941_v4 }
  0xa1   : > { %v8491_v10 = vld [vmem:[#allocation8 + $0x69c] sm:$0xf0]  ;;  %4058 = vmatpush.bf16.msra.mxu2 %v6486_v13 }
  0xa2   : > { %v6197_v11 = vld [vmem:[#allocation8 + $0x240] sm:$0xf]  ;;  %v6742_v16 = vor.u32 %v8491_v10, %v6741_v9  ;;  %4033 = vmatpush.bf16.msra.mxu0 %v5942_v15 }
  0xa3   : > { %v8355_v12 = vld [vmem:[#allocation8 + $0x25c] sm:$0xf0] }
  0xa4   : > { %v5909_v14 = vld [vmem:[#allocation8] sm:$0xf]  ;;  %v6198_v20 = vor.u32 %v8355_v12, %v6197_v11  ;;  %4071 = vmatpush.bf16.msra.mxu3 %v6742_v16 }
  0xa5   : > { %v8283_v17 = vld [vmem:[#allocation8 + $0x1c] sm:$0xf0] }
  0xa6   : > { %v6453_v18 = vld [vmem:[#allocation8 + $0x440] sm:$0xf]  ;;  %v5910_v30 = vor.u32 %v8283_v17, %v5909_v14  ;;  %4046 = vmatpush.bf16.msra.mxu1 %v6198_v20 }
  0xa7   : > { %v8419_v19 = vld [vmem:[#allocation8 + $0x45c] sm:$0xf0] }
  0xa8   : > { %v6165_v21 = vld [vmem:[#allocation8 + $0x200] sm:$0xf]  ;;  %v6454_v29 = vor.u32 %v8419_v19, %v6453_v18  ;;  %4034 = vmatpush.bf16.msra.mxu0 %v5910_v30 }
  0xa9   : > { %v6709_v22 = vld [vmem:[#allocation8 + $0x640] sm:$0xf] }
  0xaa   : > { %v8483_v23 = vld [vmem:[#allocation8 + $0x65c] sm:$0xf0]  ;;  %4059 = vmatpush.bf16.msra.mxu2 %v6454_v29 }
  0xab   : > { %v8347_v24 = vld [vmem:[#allocation8 + $0x21c] sm:$0xf0]  ;;  %v6710_v31 = vor.u32 %v8483_v23, %v6709_v22 }
  0xac   : > { %v7157_v25 = vld [vmem:[#allocation8 + $0x9c0] sm:$0xf]  ;;  %v6166_v36 = vor.u32 %v8347_v24, %v6165_v21 }
  0xad   : > { %v8595_v26 = vld [vmem:[#allocation8 + $0x9dc] sm:$0xf0]  ;;  %4072 = vmatpush.bf16.msra.mxu3 %v6710_v31 }
  0xae   : > { %v7413_v27 = vld [vmem:[#allocation8 + $0xbc0] sm:$0xf]  ;;  %v7158_v37 = vor.u32 %v8595_v26, %v7157_v25  ;;  %4047 = vmatpush.bf16.msra.mxu1 %v6166_v36 }
  0xaf   : > { %v8659_v28 = vld [vmem:[#allocation8 + $0xbdc] sm:$0xf0] }
  0xb0   : > { %v7125_v32 = vld [vmem:[#allocation8 + $0x980] sm:$0xf]  ;;  %v7414_v41 = vor.u32 %v8659_v28, %v7413_v27  ;;  %4079 = vmatpush.bf16.msrb.mxu0 %v7158_v37 }
  0xb1   : > { %v6421_v33 = vld [vmem:[#allocation8 + $0x400] sm:$0xf] }
  0xb2   : > { %v8411_v34 = vld [vmem:[#allocation8 + $0x41c] sm:$0xf0]  ;;  %4092 = vmatpush.bf16.msrb.mxu1 %v7414_v41 }
  0xb3   : > { %v6677_v35 = vld [vmem:[#allocation8 + $0x600] sm:$0xf]  ;;  %v6422_v46 = vor.u32 %v8411_v34, %v6421_v33 }
  0xb4   : > { %v8475_v38 = vld [vmem:[#allocation8 + $0x61c] sm:$0xf0] }
  0xb5   : > { %v7669_v39 = vld [vmem:[#allocation8 + $0xdc0] sm:$0xf]  ;;  %v6678_v47 = vor.u32 %v8475_v38, %v6677_v35  ;;  %4060 = vmatpush.bf16.msra.mxu2 %v6422_v46 }
  0xb6   : > { %v8723_v40 = vld [vmem:[#allocation8 + $0xddc] sm:$0xf0] }
  0xb7   : > { %v8587_v42 = vld [vmem:[#allocation8 + $0x99c] sm:$0xf0]  ;;  %v7670_v49 = vor.u32 %v8723_v40, %v7669_v39  ;;  %4073 = vmatpush.bf16.msra.mxu3 %v6678_v47 }
  0xb8   : > { %v7925_v48 = vld [vmem:[#allocation8 + $0xfc0] sm:$0xf]  ;;  %v7126_v50 = vor.u32 %v8587_v42, %v7125_v32 }
  0xb9   : > { %v8787_v43 = vld [vmem:[#allocation8 + $0xfdc] sm:$0xf0]  ;;  %4105 = vmatpush.bf16.msrb.mxu2 %v7670_v49 }
  0xba   : > { %v7381_v44 = vld [vmem:[#allocation8 + $0xb80] sm:$0xf]  ;;  %v7926_v51 = vor.u32 %v8787_v43, %v7925_v48  ;;  %4080 = vmatpush.bf16.msrb.mxu0 %v7126_v50 }
  0xbb   : > { %v8651_v45 = vld [vmem:[#allocation8 + $0xb9c] sm:$0xf0] }
  0xbc   : > { %v7093_v52 = vld [vmem:[#allocation8 + $0x940] sm:$0xf]  ;;  %v7382_v55 = vor.u32 %v8651_v45, %v7381_v44  ;;  %4118 = vmatpush.bf16.msrb.mxu3 %v7926_v51 }
  0xbd   : > { %v7637_v53 = vld [vmem:[#allocation8 + $0xd80] sm:$0xf] }
  0xbe   : > { %v8715_v54 = vld [vmem:[#allocation8 + $0xd9c] sm:$0xf0]  ;;  %4093 = vmatpush.bf16.msrb.mxu1 %v7382_v55 }
  0xbf   : > { %v8579_v56 = vld [vmem:[#allocation8 + $0x95c] sm:$0xf0]  ;;  %v7638_v61 = vor.u32 %v8715_v54, %v7637_v53 }
  0xc0   : > { %v7893_v57 = vld [vmem:[#allocation8 + $0xf80] sm:$0xf]  ;;  %v7094_v62 = vor.u32 %v8579_v56, %v7093_v52 }
  0xc1   : > { %v8779_v58 = vld [vmem:[#allocation8 + $0xf9c] sm:$0xf0]  ;;  %4106 = vmatpush.bf16.msrb.mxu2 %v7638_v61 }
  0xc2   : > { %v7349_v59 = vld [vmem:[#allocation8 + $0xb40] sm:$0xf]  ;;  %v7894_v63 = vor.u32 %v8779_v58, %v7893_v57  ;;  %4081 = vmatpush.bf16.msrb.mxu0 %v7094_v62 }
  0xc3   : > { %v8643_v60 = vld [vmem:[#allocation8 + $0xb5c] sm:$0xf0] }
  0xc4   : > { %v7350_v0 = vor.u32 %v8643_v60, %v7349_v59  ;;  %4119 = vmatpush.bf16.msrb.mxu3 %v7894_v63  ;;  %v7061_v1 = vld [vmem:[#allocation8 + $0x900] sm:$0xf] }
  0xc5   : > { %v8571_v2 = vld [vmem:[#allocation8 + $0x91c] sm:$0xf0] }
  0xc6   : > { %4094 = vmatpush.bf16.msrb.mxu1 %v7350_v0  ;;  %v7317_v3 = vld [vmem:[#allocation8 + $0xb00] sm:$0xf]  ;;  %v7062_v4 = vor.u32 %v8571_v2, %v7061_v1 }
  0xc7   : > { %v8635_v5 = vld [vmem:[#allocation8 + $0xb1c] sm:$0xf0] }
  0xc8   : > { %v7318_v6 = vor.u32 %v8635_v5, %v7317_v3  ;;  %v7605_v7 = vld [vmem:[#allocation8 + $0xd40] sm:$0xf]  ;;  %4082 = vmatpush.bf16.msrb.mxu0 %v7062_v4  ;;  %v9488_v3 = vld [vmem:[#allocation7] sm:$0xff] }
  0xc9   : > { %v8707_v8 = vld [vmem:[#allocation8 + $0xd5c] sm:$0xf0]  ;;  %v457_v4 = vperm.slane %v9488_v3, 0  ;;  %v458_v5 = vperm.slane %v9488_v3, 1 }
  0xca   : > { %v7861_v9 = vld [vmem:[#allocation8 + $0xf40] sm:$0xf]  ;;  %v7606_v10 = vor.u32 %v8707_v8, %v7605_v7  ;;  %4095 = vmatpush.bf16.msrb.mxu1 %v7318_v6 }
  0xcb   : > { %v8771_v11 = vld [vmem:[#allocation8 + $0xf5c] sm:$0xf0] }
  0xcc   : > { %v7862_v12 = vor.u32 %v8771_v11, %v7861_v9  ;;  %v7029_v13 = vld [vmem:[#allocation8 + $0x8c0] sm:$0xf]  ;;  %4107 = vmatpush.bf16.msrb.mxu2 %v7606_v10 }
  0xcd   : > { %v8563_v14 = vld [vmem:[#allocation8 + $0x8dc] sm:$0xf0] }
  0xce   : > { %v7285_v15 = vld [vmem:[#allocation8 + $0xac0] sm:$0xf]  ;;  %v7030_v16 = vor.u32 %v8563_v14, %v7029_v13  ;;  %4120 = vmatpush.bf16.msrb.mxu3 %v7862_v12  ;;  %v459_v12 = vperm.slane %v9488_v3, 2  ;;  %v460_v13 = vperm.slane %v9488_v3, 3 }
  0xcf   : > { %v8627_v17 = vld [vmem:[#allocation8 + $0xadc] sm:$0xf0] }
  0xd0   : > { %v7286_v18 = vor.u32 %v8627_v17, %v7285_v15  ;;  %v7573_v19 = vld [vmem:[#allocation8 + $0xd00] sm:$0xf]  ;;  %4083 = vmatpush.bf16.msrb.mxu0 %v7030_v16 }
  0xd1   : > { %v8699_v20 = vld [vmem:[#allocation8 + $0xd1c] sm:$0xf0] }
  0xd2   : > { %v7829_v21 = vld [vmem:[#allocation8 + $0xf00] sm:$0xf]  ;;  %v7574_v22 = vor.u32 %v8699_v20, %v7573_v19  ;;  %4096 = vmatpush.bf16.msrb.mxu1 %v7286_v18 }
  0xd3   : > { %v8763_v23 = vld [vmem:[#allocation8 + $0xf1c] sm:$0xf0] }
  0xd4   : > { %v7830_v24 = vor.u32 %v8763_v23, %v7829_v21  ;;  %v6997_v25 = vld [vmem:[#allocation8 + $0x880] sm:$0xf]  ;;  %4108 = vmatpush.bf16.msrb.mxu2 %v7574_v22 }
  0xd5   : > { %v8555_v26 = vld [vmem:[#allocation8 + $0x89c] sm:$0xf0] }
  0xd6   : > { %v7253_v27 = vld [vmem:[#allocation8 + $0xa80] sm:$0xf]  ;;  %v6998_v28 = vor.u32 %v8555_v26, %v6997_v25  ;;  %4121 = vmatpush.bf16.msrb.mxu3 %v7830_v24  ;;  %v8335_v25 = vld [vmem:[#allocation8 + $0x1c4] sm:$0xf] }
  0xd7   : > { %v8619_v29 = vld [vmem:[#allocation8 + $0xa9c] sm:$0xf0]  ;;  %v6135_v26 = vld [vmem:[#allocation8 + $0x1e0] sm:$0xf0] }
  0xd8   : > { %v7254_v30 = vor.u32 %v8619_v29, %v7253_v27  ;;  %v7541_v31 = vld [vmem:[#allocation8 + $0xcc0] sm:$0xf]  ;;  %4084 = vmatpush.bf16.msrb.mxu0 %v6998_v28  ;;  %v8399_v28 = vld [vmem:[#allocation8 + $0x3c4] sm:$0xf] }
  0xd9   : > { %v8691_v32 = vld [vmem:[#allocation8 + $0xcdc] sm:$0xf0]  ;;  %v6391_v29 = vld [vmem:[#allocation8 + $0x3e0] sm:$0xf0] }
  0xda   : > { %v7797_v33 = vld [vmem:[#allocation8 + $0xec0] sm:$0xf]  ;;  %v7542_v34 = vor.u32 %v8691_v32, %v7541_v31  ;;  %4097 = vmatpush.bf16.msrb.mxu1 %v7254_v30 }
  0xdb   : > { %v8755_v35 = vld [vmem:[#allocation8 + $0xedc] sm:$0xf0] }
  0xdc   : > { %v7798_v36 = vor.u32 %v8755_v35, %v7797_v33  ;;  %v6965_v37 = vld [vmem:[#allocation8 + $0x840] sm:$0xf]  ;;  %4109 = vmatpush.bf16.msrb.mxu2 %v7542_v34  ;;  %v6138_v33 = vor.u32 %v8335_v25, %v6135_v26 }
  0xdd   : > { %v8547_v38 = vld [vmem:[#allocation8 + $0x85c] sm:$0xf0] }
  0xde   : > { %v7221_v39 = vld [vmem:[#allocation8 + $0xa40] sm:$0xf]  ;;  %v6966_v40 = vor.u32 %v8547_v38, %v6965_v37  ;;  %4122 = vmatpush.bf16.msrb.mxu3 %v7798_v36  ;;  %v6394_v36 = vor.u32 %v8399_v28, %v6391_v29  ;;  %v8327_v37 = vld [vmem:[#allocation8 + $0x184] sm:$0xf] }
  0xdf   : > { %v8611_v41 = vld [vmem:[#allocation8 + $0xa5c] sm:$0xf0]  ;;  %v6103_v38 = vld [vmem:[#allocation8 + $0x1a0] sm:$0xf0] }
  0xe0   : > { %v7222_v42 = vor.u32 %v8611_v41, %v7221_v39  ;;  %v7509_v48 = vld [vmem:[#allocation8 + $0xc80] sm:$0xf]  ;;  %4085 = vmatpush.bf16.msrb.mxu0 %v6966_v40  ;;  %v8391_v40 = vld [vmem:[#allocation8 + $0x384] sm:$0xf] }
  0xe1   : > { %v8683_v43 = vld [vmem:[#allocation8 + $0xc9c] sm:$0xf0]  ;;  %v6359_v41 = vld [vmem:[#allocation8 + $0x3a0] sm:$0xf0] }
  0xe2   : > { %v7765_v44 = vld [vmem:[#allocation8 + $0xe80] sm:$0xf]  ;;  %v7510_v45 = vor.u32 %v8683_v43, %v7509_v48  ;;  %4098 = vmatpush.bf16.msrb.mxu1 %v7222_v42  ;;  %v8463_v48 = vld [vmem:[#allocation8 + $0x5c4] sm:$0xf] }
  0xe3   : > { %v8747_v46 = vld [vmem:[#allocation8 + $0xe9c] sm:$0xf0]  ;;  %v6647_v43 = vld [vmem:[#allocation8 + $0x5e0] sm:$0xf0] }
  0xe4   : > { %v7766_v47 = vor.u32 %v8747_v46, %v7765_v44  ;;  %v6933_v49 = vld [vmem:[#allocation8 + $0x800] sm:$0xf]  ;;  %4110 = vmatpush.bf16.msrb.mxu2 %v7510_v45  ;;  %v6106_v46 = vor.u32 %v8327_v37, %v6103_v38  ;;  %v8295_v37 = vld [vmem:[#allocation8 + $0x84] sm:$0xf] }
  0xe5   : > { %v8539_v50 = vld [vmem:[#allocation8 + $0x81c] sm:$0xf0]  ;;  %v802_v6 = vpop.f32.mrf.mxu0  ;;  %v815_v8 = vpop.f32.mrf.mxu1  ;;  %v5975_v38 = vld [vmem:[#allocation8 + $0xa0] sm:$0xf0] }
  0xe6   : > { %v7189_v51 = vld [vmem:[#allocation8 + $0xa00] sm:$0xf]  ;;  %v6934_v52 = vor.u32 %v8539_v50, %v6933_v49  ;;  %4123 = vmatpush.bf16.msrb.mxu3 %v7766_v47  ;;  %v803_v7 = vadd.f32 %v802_v6, %v457_v4  ;;  %v816_v9 = vadd.f32 %v815_v8, %v458_v5  ;;  %v8527_v47 = vld [vmem:[#allocation8 + $0x7c4] sm:$0xf] }
  0xe7   : > { %v8603_v53 = vld [vmem:[#allocation8 + $0xa1c] sm:$0xf0]  ;;  %v6903_v49 = vld [vmem:[#allocation8 + $0x7e0] sm:$0xf0] }
  0xe8   : > { %v7190_v54 = vor.u32 %v8603_v53, %v7189_v51  ;;  %v7477_v55 = vld [vmem:[#allocation8 + $0xc40] sm:$0xf]  ;;  %4086 = vmatpush.bf16.msrb.mxu0 %v6934_v52  ;;  %v897_v10 = vmul.f32 0.5, %v803_v7  ;;  %v898_v11 = vmul.f32 0.5, %v816_v9  ;;  %v6362_v51 = vor.u32 %v8391_v40, %v6359_v41  ;;  %v8319_v52 = vld [vmem:[#allocation8 + $0x144] sm:$0xf] }
  0xe9   : > { %v8675_v56 = vld [vmem:[#allocation8 + $0xc5c] sm:$0xf0]  ;;  %v6071_v53 = vld [vmem:[#allocation8 + $0x160] sm:$0xf0]  ;;  %v463_v41 = vperm.slane %v9488_v3, 6 }
  0xea   : > { %v7733_v57 = vld [vmem:[#allocation8 + $0xe40] sm:$0xf]  ;;  %4099 = vmatpush.bf16.msrb.mxu1 %v7190_v54  ;;  %v7478_v59 = vor.u32 %v8675_v56, %v7477_v55  ;;  %8967 = vtanh.f32 %v897_v10  ;;  %v8383_v55 = vld [vmem:[#allocation8 + $0x344] sm:$0xf]  ;;  %v461_v10 = vperm.slane %v9488_v3, 4 }
  0xeb   : > { %v8739_v58 = vld [vmem:[#allocation8 + $0xe5c] sm:$0xf0]  ;;  %8969 = vtanh.f32 %v898_v11  ;;  %v6327_v56 = vld [vmem:[#allocation8 + $0x360] sm:$0xf0]  ;;  %v462_v11 = vperm.slane %v9488_v3, 5 }
  0xec   : > { %v7734_v60 = vor.u32 %v8739_v58, %v7733_v57  ;;  %4111 = vmatpush.bf16.msrb.mxu2 %v7478_v59  ;;  %v7445_v61 = vld [vmem:[#allocation8 + $0xc00] sm:$0xf]  ;;  %v6650_v58 = vor.u32 %v8463_v48, %v6647_v43  ;;  %v6871_v4 = vld [vmem:[#allocation8 + $0x7a0] sm:$0xf0]  ;;  %v464_v43 = vperm.slane %v9488_v3, 7 }
  0xed   : > { %v8667_v62 = vld [vmem:[#allocation8 + $0xc1c] sm:$0xf0]  ;;  %v841_v16 = vpop.f32.mrf.mxu3  ;;  %v804_v17 = vpop.f32.mrf.mxu0  ;;  %v8311_v5 = vld [vmem:[#allocation8 + $0x104] sm:$0xf] }
  0xee   : > { %4124 = vmatpush.bf16.msrb.mxu3 %v7734_v60  ;;  %v7446_v63 = vor.u32 %v8667_v62, %v7445_v61  ;;  %v7701_v0 = vld [vmem:[#allocation8 + $0xe00] sm:$0xf]  ;;  %v828_v14 = vpop.f32.mrf.mxu2  ;;  %v842_v18 = vadd.f32 %v841_v16, %v460_v13  ;;  %v817_v19 = vpop.f32.mrf.mxu1  ;;  %v6906_v60 = vor.u32 %v8527_v47, %v6903_v49  ;;  %v6074_v61 = vor.u32 %v8319_v52, %v6071_v53  ;;  %v8455_v62 = vld [vmem:[#allocation8 + $0x584] sm:$0xf] }
  0xef   : > { %v8731_v1 = vld [vmem:[#allocation8 + $0xe1c] sm:$0xf0]  ;;  %v829_v15 = vadd.f32 %v828_v14, %v459_v12  ;;  %v6039_v6 = vld [vmem:[#allocation8 + $0x120] sm:$0xf0] }
  0xf0   : > { %v7702_v2 = vor.u32 %v8731_v1, %v7701_v0  ;;  %4112 = vmatpush.bf16.msrb.mxu2 %v7446_v63  ;;  %v8968_v21 = vpop.eup %8967  ;;  %v900_v22 = vmul.f32 0.5, %v842_v18  ;;  %v6615_v63 = vld [vmem:[#allocation8 + $0x5a0] sm:$0xf0]  ;;  %v6042_v13 = vor.u32 %v8311_v5, %v6039_v6 }
  0xf1   : > { %v899_v20 = vmul.f32 0.5, %v829_v15  ;;  %v8970_v23 = vpop.eup %8969  ;;  %v913_v24 = vmul.f32 0.5, %v8968_v21  ;;  %v8519_v0 = vld [vmem:[#allocation8 + $0x784] sm:$0xf]  ;;  %v6618_v9 = vor.u32 %v8455_v62, %v6615_v63 }
  0xf2   : > { %4125 = vmatpush.bf16.msrb.mxu3 %v7702_v2  ;;  %v914_v27 = vmul.f32 0.5, %v8970_v23  ;;  %v6330_v2 = vor.u32 %v8383_v55, %v6327_v56  ;;  %v8375_v7 = vld [vmem:[#allocation8 + $0x304] sm:$0xf]  ;;  %v6874_v12 = vor.u32 %v8519_v0, %v6871_v4 }
  0xf3   : > { %8971 = vtanh.f32 %v899_v20  ;;  %v921_v30 = vadd.f32 0.5, %v913_v24  ;;  %v6295_v8 = vld [vmem:[#allocation8 + $0x320] sm:$0xf0] }
  0xf4   : > { %8973 = vtanh.f32 %v900_v22  ;;  %v922_v31 = vadd.f32 0.5, %v914_v27  ;;  %v8447_v14 = vld [vmem:[#allocation8 + $0x544] sm:$0xf]  ;;  %v6298_v17 = vor.u32 %v8375_v7, %v6295_v8 }
  0xf5   : > { %v9494_v34 = vpack.c.bf16 %v921_v30, %v921_v30  ;;  %v843_v35 = vpop.f32.mrf.mxu3  ;;  %v6583_v15 = vld [vmem:[#allocation8 + $0x560] sm:$0xf0] }
  0xf6   : > { %v830_v32 = vpop.f32.mrf.mxu2  ;;  %v9496_v39 = vpack.c.bf16 %v922_v31, %v922_v31  ;;  %v8511_v16 = vld [vmem:[#allocation8 + $0x744] sm:$0xf]  ;;  %v6586_v26 = vor.u32 %v8447_v14, %v6583_v15 }
  0xf7   : > { %4035 = vmatmul.bf16.vlgmr.msra.gmra.mxu0 %v9494_v34  ;;  %v6839_v18 = vld [vmem:[#allocation8 + $0x760] sm:$0xf0] }
  0xf8   : > { %4048 = vmatmul.bf16.vlgmr.msra.gmra.mxu1 %v9496_v39  ;;  %4131 = vmatpush.bf16.msra.mxu0 %v6138_v33  ;;  %v8303_v19 = vld [vmem:[#allocation8 + $0xc4] sm:$0xf]  ;;  %v6842_v29 = vor.u32 %v8511_v16, %v6839_v18 }
  0xf9   : > { %v8972_v42 = vpop.eup %8971  ;;  %4144 = vmatpush.bf16.msra.mxu1 %v6394_v36  ;;  %v6007_v20 = vld [vmem:[#allocation8 + $0xe0] sm:$0xf0] }
  0xfa   : > { %v8974_v44 = vpop.eup %8973  ;;  %v915_v45 = vmul.f32 0.5, %v8972_v42  ;;  %v8367_v22 = vld [vmem:[#allocation8 + $0x2c4] sm:$0xf]  ;;  %v6010_v30 = vor.u32 %v8303_v19, %v6007_v20 }
  0xfb   : > { %v916_v50 = vmul.f32 0.5, %v8974_v44  ;;  %v6263_v23 = vld [vmem:[#allocation8 + $0x2e0] sm:$0xf0] }
  0xfc   : > { %v923_v54 = vadd.f32 0.5, %v915_v45  ;;  %4132 = vmatpush.bf16.msra.mxu0 %v6106_v46  ;;  %v8439_v27 = vld [vmem:[#allocation8 + $0x504] sm:$0xf]  ;;  %v6266_v36 = vor.u32 %v8367_v22, %v6263_v23  ;;  %v5978_v46 = vor.u32 %v8295_v37, %v5975_v38 }
  0xfd   : > { %v924_v57 = vadd.f32 0.5, %v916_v50  ;;  %4145 = vmatpush.bf16.msra.mxu1 %v6362_v51  ;;  %v6551_v31 = vld [vmem:[#allocation8 + $0x520] sm:$0xf0] }
  0xfe   : > { %v9500_v59 = vpack.c.bf16 %v923_v54, %v923_v54  ;;  %v8503_v32 = vld [vmem:[#allocation8 + $0x704] sm:$0xf]  ;;  %v6554_v44 = vor.u32 %v8439_v27, %v6551_v31 }
  0xff   : > { %v9502_v1 = vpack.c.bf16 %v924_v57, %v924_v57  ;;  %v6807_v33 = vld [vmem:[#allocation8 + $0x720] sm:$0xf0] }
 0x100   : > { %4061 = vmatmul.bf16.vlgmr.msra.gmra.mxu2 %v9500_v59  ;;  %4133 = vmatpush.bf16.msra.mxu0 %v6074_v61  ;;  %v8359_v42 = vld [vmem:[#allocation8 + $0x284] sm:$0xf]  ;;  %v6810_v45 = vor.u32 %v8503_v32, %v6807_v33 }
 0x101   : > { %4074 = vmatmul.bf16.vlgmr.msra.gmra.mxu3 %v9502_v1  ;;  %4157 = vmatpush.bf16.msra.mxu2 %v6650_v58  ;;  %v6231_v48 = vld [vmem:[#allocation8 + $0x2a0] sm:$0xf0] }
 0x102   : > { %4170 = vmatpush.bf16.msra.mxu3 %v6906_v60  ;;  %4146 = vmatpush.bf16.msra.mxu1 %v6330_v2  ;;  %v8431_v47 = vld [vmem:[#allocation8 + $0x4c4] sm:$0xf]  ;;  %v6234_v52 = vor.u32 %v8359_v42, %v6231_v48 }
 0x103   : > { %v6519_v49 = vld [vmem:[#allocation8 + $0x4e0] sm:$0xf0] }
 0x104   : > { %4134 = vmatpush.bf16.msra.mxu0 %v6042_v13  ;;  %v8495_v50 = vld [vmem:[#allocation8 + $0x6c4] sm:$0xf]  ;;  %v6522_v0 = vor.u32 %v8431_v47, %v6519_v49 }
 0x105   : > { %v854_v21 = vpop.f32.mrf.mxu0  ;;  %4158 = vmatpush.bf16.msra.mxu2 %v6618_v9  ;;  %v867_v25 = vpop.f32.mrf.mxu1  ;;  %v6775_v53 = vld [vmem:[#allocation8 + $0x6e0] sm:$0xf0] }
 0x106   : > { %v855_v24 = vadd.f32 %v854_v21, %v461_v10  ;;  %4171 = vmatpush.bf16.msra.mxu3 %v6874_v12  ;;  %v868_v28 = vadd.f32 %v867_v25, %v462_v11  ;;  %4147 = vmatpush.bf16.msra.mxu1 %v6298_v17  ;;  %v8287_v54 = vld [vmem:[#allocation8 + $0x44] sm:$0xf]  ;;  %v6778_v7 = vor.u32 %v8495_v50, %v6775_v53 }
 0x107   : > { %v5943_v55 = vld [vmem:[#allocation8 + $0x60] sm:$0xf0] }
 0x108   : > { %v901_v35 = vmul.f32 0.5, %v855_v24  ;;  %v902_v40 = vmul.f32 0.5, %v868_v28  ;;  %4135 = vmatpush.bf16.msra.mxu0 %v6010_v30  ;;  %v8351_v60 = vld [vmem:[#allocation8 + $0x244] sm:$0xf]  ;;  %v5946_v8 = vor.u32 %v8287_v54, %v5943_v55 }
 0x109   : > { %4159 = vmatpush.bf16.msra.mxu2 %v6586_v26  ;;  %v6199_v3 = vld [vmem:[#allocation8 + $0x260] sm:$0xf0] }
 0x10a   : > { %8975 = vtanh.f32 %v901_v35  ;;  %4172 = vmatpush.bf16.msra.mxu3 %v6842_v29  ;;  %4148 = vmatpush.bf16.msra.mxu1 %v6266_v36  ;;  %v8423_v61 = vld [vmem:[#allocation8 + $0x484] sm:$0xf]  ;;  %v6202_v13 = vor.u32 %v8351_v60, %v6199_v3 }
 0x10b   : > { %8977 = vtanh.f32 %v902_v40  ;;  %v6487_v2 = vld [vmem:[#allocation8 + $0x4a0] sm:$0xf0] }
 0x10c   : > { %v8487_v4 = vld [vmem:[#allocation8 + $0x684] sm:$0xf]  ;;  %4136 = vmatpush.bf16.msra.mxu0 %v5978_v46  ;;  %v6490_v21 = vor.u32 %v8423_v61, %v6487_v2 }
 0x10d   : > { %v880_v51 = vpop.f32.mrf.mxu2  ;;  %v893_v57 = vpop.f32.mrf.mxu3  ;;  %4160 = vmatpush.bf16.msra.mxu2 %v6554_v44  ;;  %v6743_v5 = vld [vmem:[#allocation8 + $0x6a0] sm:$0xf0] }
 0x10e   : > { %v881_v56 = vadd.f32 %v880_v51, %v463_v41  ;;  %v856_v58 = vpop.f32.mrf.mxu0  ;;  %v894_v62 = vadd.f32 %v893_v57, %v464_v43  ;;  %v869_v63 = vpop.f32.mrf.mxu1  ;;  %4173 = vmatpush.bf16.msra.mxu3 %v6810_v45  ;;  %v8279_v9 = vld [vmem:[#allocation8 + $0x4] sm:$0xf]  ;;  %4149 = vmatpush.bf16.msra.mxu1 %v6234_v52  ;;  %v6746_v25 = vor.u32 %v8487_v4, %v6743_v5 }
 0x10f   : > { %v5911_v10 = vld [vmem:[#allocation8 + $0x20] sm:$0xf0] }
 0x110   : > { %v903_v6 = vmul.f32 0.5, %v881_v56  ;;  %v8976_v11 = vpop.eup %8975  ;;  %v904_v12 = vmul.f32 0.5, %v894_v62  ;;  %v8343_v14 = vld [vmem:[#allocation8 + $0x204] sm:$0xf]  ;;  %4137 = vmatpush.bf16.msra.mxu0 %v5946_v8  ;;  %v5914_v26 = vor.u32 %v8279_v9, %v5911_v10 }
 0x111   : > { %v6167_v15 = vld [vmem:[#allocation8 + $0x220] sm:$0xf0]  ;;  %v8978_v16 = vpop.eup %8977  ;;  %v917_v17 = vmul.f32 0.5, %v8976_v11  ;;  %4161 = vmatpush.bf16.msra.mxu2 %v6522_v0 }
 0x112   : > { %8979 = vtanh.f32 %v903_v6  ;;  %v8591_v18 = vld [vmem:[#allocation8 + $0x9c4] sm:$0xf]  ;;  %v918_v20 = vmul.f32 0.5, %v8978_v16  ;;  %4174 = vmatpush.bf16.msra.mxu3 %v6778_v7  ;;  %4150 = vmatpush.bf16.msra.mxu1 %v6202_v13  ;;  %v6170_v31 = vor.u32 %v8343_v14, %v6167_v15 }
 0x113   : > { %v7159_v19 = vld [vmem:[#allocation8 + $0x9e0] sm:$0xf0]  ;;  %8981 = vtanh.f32 %v904_v12  ;;  %v925_v24 = vadd.f32 0.5, %v917_v17 }
 0x114   : > { %v8655_v22 = vld [vmem:[#allocation8 + $0xbc4] sm:$0xf]  ;;  %v926_v29 = vadd.f32 0.5, %v918_v20  ;;  %v7162_v37 = vor.u32 %v8591_v18, %v7159_v19  ;;  %4138 = vmatpush.bf16.msra.mxu0 %v5914_v26 }
 0x115   : > { %v7415_v23 = vld [vmem:[#allocation8 + $0xbe0] sm:$0xf0]  ;;  %v882_v30 = vpop.f32.mrf.mxu2  ;;  %v9510_v35 = vpack.c.bf16 %v925_v24, %v925_v24  ;;  %v895_v36 = vpop.f32.mrf.mxu3  ;;  %4162 = vmatpush.bf16.msra.mxu2 %v6490_v21 }
 0x116   : > { %v8415_v27 = vld [vmem:[#allocation8 + $0x444] sm:$0xf]  ;;  %v9512_v41 = vpack.c.bf16 %v926_v29, %v926_v29  ;;  %v7418_v42 = vor.u32 %v8655_v22, %v7415_v23  ;;  %4175 = vmatpush.bf16.msra.mxu3 %v6746_v25  ;;  %4151 = vmatpush.bf16.msra.mxu1 %v6170_v31 }
 0x117   : > { %v6455_v28 = vld [vmem:[#allocation8 + $0x460] sm:$0xf0]  ;;  %4087 = vmatmul.bf16.vlgmr.msrb.gmra.mxu0 %v9510_v35 }
 0x118   : > { %v8479_v32 = vld [vmem:[#allocation8 + $0x644] sm:$0xf]  ;;  %v6458_v48 = vor.u32 %v8415_v27, %v6455_v28  ;;  %v8980_v46 = vpop.eup %8979  ;;  %4100 = vmatmul.bf16.vlgmr.msrb.gmra.mxu1 %v9512_v41  ;;  %4183 = vmatpush.bf16.msrb.mxu0 %v7162_v37 }
 0x119   : > { %v6711_v33 = vld [vmem:[#allocation8 + $0x660] sm:$0xf0]  ;;  %v8982_v52 = vpop.eup %8981  ;;  %v919_v53 = vmul.f32 0.5, %v8980_v46 }
 0x11a   : > { %v8583_v38 = vld [vmem:[#allocation8 + $0x984] sm:$0xf]  ;;  %v6714_v47 = vor.u32 %v8479_v32, %v6711_v33  ;;  %v920_v56 = vmul.f32 0.5, %v8982_v52  ;;  %4196 = vmatpush.bf16.msrb.mxu1 %v7418_v42  ;;  %4163 = vmatpush.bf16.msra.mxu2 %v6458_v48 }
 0x11b   : > { %v7127_v40 = vld [vmem:[#allocation8 + $0x9a0] sm:$0xf0]  ;;  %v927_v3 = vadd.f32 0.5, %v919_v53 }
 0x11c   : > { %v8647_v43 = vld [vmem:[#allocation8 + $0xb84] sm:$0xf]  ;;  %v7130_v57 = vor.u32 %v8583_v38, %v7127_v40  ;;  %v928_v2 = vadd.f32 0.5, %v920_v56  ;;  %4176 = vmatpush.bf16.msra.mxu3 %v6714_v47 }
 0x11d   : > { %v7383_v44 = vld [vmem:[#allocation8 + $0xba0] sm:$0xf0]  ;;  %v9516_v7 = vpack.c.bf16 %v927_v3, %v927_v3 }
 0x11e   : > { %v8407_v45 = vld [vmem:[#allocation8 + $0x404] sm:$0xf]  ;;  %v7386_v61 = vor.u32 %v8647_v43, %v7383_v44  ;;  %v9518_v9 = vpack.c.bf16 %v928_v2, %v928_v2  ;;  %4184 = vmatpush.bf16.msrb.mxu0 %v7130_v57 }
 0x11f   : > { %v6423_v49 = vld [vmem:[#allocation8 + $0x420] sm:$0xf0]  ;;  %4113 = vmatmul.bf16.vlgmr.msrb.gmra.mxu2 %v9516_v7 }
 0x120   : > { %v8471_v50 = vld [vmem:[#allocation8 + $0x604] sm:$0xf]  ;;  %v6426_v62 = vor.u32 %v8407_v45, %v6423_v49  ;;  %4197 = vmatpush.bf16.msrb.mxu1 %v7386_v61  ;;  %4126 = vmatmul.bf16.vlgmr.msrb.gmra.mxu3 %v9518_v9 }
 0x121   : > { %v6679_v51 = vld [vmem:[#allocation8 + $0x620] sm:$0xf0] }
 0x122   : > { %v8719_v54 = vld [vmem:[#allocation8 + $0xdc4] sm:$0xf]  ;;  %v6682_v4 = vor.u32 %v8471_v50, %v6679_v51  ;;  %4164 = vmatpush.bf16.msra.mxu2 %v6426_v62 }
 0x123   : > { %v7671_v55 = vld [vmem:[#allocation8 + $0xde0] sm:$0xf0] }
 0x124   : > { %v8783_v58 = vld [vmem:[#allocation8 + $0xfc4] sm:$0xf]  ;;  %v7674_v8 = vor.u32 %v8719_v54, %v7671_v55  ;;  %4177 = vmatpush.bf16.msra.mxu3 %v6682_v4 }
 0x125   : > { %v7927_v60 = vld [vmem:[#allocation8 + $0xfe0] sm:$0xf0] }
 0x126   : > { %v8575_v63 = vld [vmem:[#allocation8 + $0x944] sm:$0xf]  ;;  %v7930_v10 = vor.u32 %v8783_v58, %v7927_v60  ;;  %4209 = vmatpush.bf16.msrb.mxu2 %v7674_v8 }
 0x127   : > { %v7095_v0 = vld [vmem:[#allocation8 + $0x960] sm:$0xf0]  ;;  %4139 = vmatmul.bf16.vlgmr.msra.gmra.mxu0 %v9494_v34 }
 0x128   : > { %v8639_v5 = vld [vmem:[#allocation8 + $0xb44] sm:$0xf]  ;;  %v7098_v11 = vor.u32 %v8575_v63, %v7095_v0  ;;  %4222 = vmatpush.bf16.msrb.mxu3 %v7930_v10  ;;  %4152 = vmatmul.bf16.vlgmr.msra.gmra.mxu1 %v9496_v39 }
 0x129   : > { %v7351_v6 = vld [vmem:[#allocation8 + $0xb60] sm:$0xf0] }
 0x12a   : > { %v8711_v12 = vld [vmem:[#allocation8 + $0xd84] sm:$0xf]  ;;  %v7354_v15 = vor.u32 %v8639_v5, %v7351_v6  ;;  %4185 = vmatpush.bf16.msrb.mxu0 %v7098_v11 }
 0x12b   : > { %v7639_v13 = vld [vmem:[#allocation8 + $0xda0] sm:$0xf0] }
 0x12c   : > { %v8775_v14 = vld [vmem:[#allocation8 + $0xf84] sm:$0xf]  ;;  %v7642_v21 = vor.u32 %v8711_v12, %v7639_v13  ;;  %4198 = vmatpush.bf16.msrb.mxu1 %v7354_v15  ;;  %v6141_v13 = vld [vmem:[#allocation8 + $0x1c8] sm:$0xf] }
 0x12d   : > { %v7895_v16 = vld [vmem:[#allocation8 + $0xfa0] sm:$0xf0]  ;;  %v8340_v15 = vld [vmem:[#allocation8 + $0x1e4] sm:$0xf0] }
 0x12e   : > { %v8567_v17 = vld [vmem:[#allocation8 + $0x904] sm:$0xf]  ;;  %v7898_v22 = vor.u32 %v8775_v14, %v7895_v16  ;;  %4210 = vmatpush.bf16.msrb.mxu2 %v7642_v21  ;;  %v6397_v16 = vld [vmem:[#allocation8 + $0x3c8] sm:$0xf] }
 0x12f   : > { %v7063_v18 = vld [vmem:[#allocation8 + $0x920] sm:$0xf0]  ;;  %4165 = vmatmul.bf16.vlgmr.msra.gmra.mxu2 %v9500_v59 }
 0x130   : > { %v8631_v19 = vld [vmem:[#allocation8 + $0xb04] sm:$0xf]  ;;  %v7066_v23 = vor.u32 %v8567_v17, %v7063_v18  ;;  %4223 = vmatpush.bf16.msrb.mxu3 %v7898_v22  ;;  %v8404_v17 = vld [vmem:[#allocation8 + $0x3e4] sm:$0xf0] }
 0x131   : > { %v7319_v20 = vld [vmem:[#allocation8 + $0xb20] sm:$0xf0]  ;;  %4178 = vmatmul.bf16.vlgmr.msra.gmra.mxu3 %v9502_v1 }
 0x132   : > { %v8703_v24 = vld [vmem:[#allocation8 + $0xd44] sm:$0xf]  ;;  %v7322_v26 = vor.u32 %v8631_v19, %v7319_v20  ;;  %4186 = vmatpush.bf16.msrb.mxu0 %v7066_v23 }
 0x133   : > { %v7607_v25 = vld [vmem:[#allocation8 + $0xd60] sm:$0xf0] }
 0x134   : > { %v8767_v27 = vld [vmem:[#allocation8 + $0xf44] sm:$0xf]  ;;  %v7610_v33 = vor.u32 %v8703_v24, %v7607_v25  ;;  %4199 = vmatpush.bf16.msrb.mxu1 %v7322_v26  ;;  %v6142_v25 = vor.u32 %v8340_v15, %v6141_v13  ;;  %v6398_v26 = vor.u32 %v8404_v17, %v6397_v16  ;;  %v6013_v13 = vld [vmem:[#allocation8 + $0xc8] sm:$0xf] }
 0x135   : > { %v7863_v28 = vld [vmem:[#allocation8 + $0xf60] sm:$0xf0]  ;;  %v6269_v15 = vld [vmem:[#allocation8 + $0x2c8] sm:$0xf] }
 0x136   : > { %v8559_v29 = vld [vmem:[#allocation8 + $0x8c4] sm:$0xf]  ;;  %v7866_v36 = vor.u32 %v8767_v27, %v7863_v28  ;;  %4211 = vmatpush.bf16.msrb.mxu2 %v7610_v33  ;;  %v6109_v27 = vld [vmem:[#allocation8 + $0x188] sm:$0xf] }
 0x137   : > { %v7031_v30 = vld [vmem:[#allocation8 + $0x8e0] sm:$0xf0]  ;;  %v8372_v16 = vld [vmem:[#allocation8 + $0x2e4] sm:$0xf0] }
 0x138   : > { %v8623_v31 = vld [vmem:[#allocation8 + $0xac4] sm:$0xf]  ;;  %v7034_v40 = vor.u32 %v8559_v29, %v7031_v30  ;;  %4224 = vmatpush.bf16.msrb.mxu3 %v7866_v36  ;;  %v8332_v29 = vld [vmem:[#allocation8 + $0x1a4] sm:$0xf0] }
 0x139   : > { %v7287_v32 = vld [vmem:[#allocation8 + $0xae0] sm:$0xf0]  ;;  %v6365_v30 = vld [vmem:[#allocation8 + $0x388] sm:$0xf] }
 0x13a   : > { %v8695_v37 = vld [vmem:[#allocation8 + $0xd04] sm:$0xf]  ;;  %v7290_v42 = vor.u32 %v8623_v31, %v7287_v32  ;;  %4187 = vmatpush.bf16.msrb.mxu0 %v7034_v40  ;;  %v8396_v31 = vld [vmem:[#allocation8 + $0x3a4] sm:$0xf0] }
 0x13b   : > { %v7575_v38 = vld [vmem:[#allocation8 + $0xd20] sm:$0xf0]  ;;  %v6653_v40 = vld [vmem:[#allocation8 + $0x5c8] sm:$0xf] }
 0x13c   : > { %v8759_v48 = vld [vmem:[#allocation8 + $0xf04] sm:$0xf]  ;;  %v7578_v49 = vor.u32 %v8695_v37, %v7575_v38  ;;  %4200 = vmatpush.bf16.msrb.mxu1 %v7290_v42  ;;  %v8468_v42 = vld [vmem:[#allocation8 + $0x5e4] sm:$0xf0] }
 0x13d   : > { %v7831_v43 = vld [vmem:[#allocation8 + $0xf20] sm:$0xf0] }
 0x13e   : > { %v8551_v44 = vld [vmem:[#allocation8 + $0x884] sm:$0xf]  ;;  %v7834_v50 = vor.u32 %v8759_v48, %v7831_v43  ;;  %4212 = vmatpush.bf16.msrb.mxu2 %v7578_v49  ;;  %v6110_v48 = vor.u32 %v8332_v29, %v6109_v27  ;;  %v6366_v43 = vor.u32 %v8396_v31, %v6365_v30  ;;  %v8324_v49 = vld [vmem:[#allocation8 + $0x164] sm:$0xf0] }
 0x13f   : > { %v6999_v45 = vld [vmem:[#allocation8 + $0x8a0] sm:$0xf0]  ;;  %v6237_v27 = vld [vmem:[#allocation8 + $0x288] sm:$0xf] }
 0x140   : > { %v8615_v46 = vld [vmem:[#allocation8 + $0xa84] sm:$0xf]  ;;  %v7002_v53 = vor.u32 %v8551_v44, %v6999_v45  ;;  %4225 = vmatpush.bf16.msrb.mxu3 %v7834_v50  ;;  %v6909_v44 = vld [vmem:[#allocation8 + $0x7c8] sm:$0xf] }
 0x141   : > { %v7255_v47 = vld [vmem:[#allocation8 + $0xaa0] sm:$0xf0]  ;;  %v8532_v45 = vld [vmem:[#allocation8 + $0x7e4] sm:$0xf0] }
 0x142   : > { %v8687_v51 = vld [vmem:[#allocation8 + $0xcc4] sm:$0xf]  ;;  %v7258_v54 = vor.u32 %v8615_v46, %v7255_v47  ;;  %4188 = vmatpush.bf16.msrb.mxu0 %v7002_v53  ;;  %v6077_v46 = vld [vmem:[#allocation8 + $0x148] sm:$0xf]  ;;  %v6654_v53 = vor.u32 %v8468_v42, %v6653_v40 }
 0x143   : > { %v7543_v52 = vld [vmem:[#allocation8 + $0xce0] sm:$0xf0]  ;;  %v6333_v50 = vld [vmem:[#allocation8 + $0x348] sm:$0xf] }
 0x144   : > { %v8751_v55 = vld [vmem:[#allocation8 + $0xec4] sm:$0xf]  ;;  %v7546_v61 = vor.u32 %v8687_v51, %v7543_v52  ;;  %4201 = vmatpush.bf16.msrb.mxu1 %v7258_v54  ;;  %v8388_v51 = vld [vmem:[#allocation8 + $0x364] sm:$0xf0]  ;;  %v6910_v54 = vor.u32 %v8532_v45, %v6909_v44 }
 0x145   : > { %v7799_v56 = vld [vmem:[#allocation8 + $0xee0] sm:$0xf0]  ;;  %v6525_v31 = vld [vmem:[#allocation8 + $0x4c8] sm:$0xf] }
 0x146   : > { %v8543_v57 = vld [vmem:[#allocation8 + $0x844] sm:$0xf]  ;;  %v7802_v62 = vor.u32 %v8751_v55, %v7799_v56  ;;  %4213 = vmatpush.bf16.msrb.mxu2 %v7546_v61  ;;  %v6621_v55 = vld [vmem:[#allocation8 + $0x588] sm:$0xf] }
 0x147   : > { %v6967_v58 = vld [vmem:[#allocation8 + $0x860] sm:$0xf0]  ;;  %v8460_v56 = vld [vmem:[#allocation8 + $0x5a4] sm:$0xf0] }
 0x148   : > { %v8607_v60 = vld [vmem:[#allocation8 + $0xa44] sm:$0xf]  ;;  %v6970_v4 = vor.u32 %v8543_v57, %v6967_v58  ;;  %4226 = vmatpush.bf16.msrb.mxu3 %v7802_v62  ;;  %v6078_v57 = vor.u32 %v8324_v49, %v6077_v46  ;;  %v6334_v58 = vor.u32 %v8388_v51, %v6333_v50  ;;  %v6045_v61 = vld [vmem:[#allocation8 + $0x108] sm:$0xf] }
 0x149   : > { %v7223_v3 = vld [vmem:[#allocation8 + $0xa60] sm:$0xf0]  ;;  %v8316_v62 = vld [vmem:[#allocation8 + $0x124] sm:$0xf0] }
 0x14a   : > { %v8679_v63 = vld [vmem:[#allocation8 + $0xc84] sm:$0xf]  ;;  %v7226_v5 = vor.u32 %v8607_v60, %v7223_v3  ;;  %4189 = vmatpush.bf16.msrb.mxu0 %v6970_v4  ;;  %v6877_v60 = vld [vmem:[#allocation8 + $0x788] sm:$0xf] }
 0x14b   : > { %v7511_v0 = vld [vmem:[#allocation8 + $0xca0] sm:$0xf0]  ;;  %v8524_v3 = vld [vmem:[#allocation8 + $0x7a4] sm:$0xf0] }
 0x14c   : > { %v8743_v2 = vld [vmem:[#allocation8 + $0xe84] sm:$0xf]  ;;  %v7514_v14 = vor.u32 %v8679_v63, %v7511_v0  ;;  %4202 = vmatpush.bf16.msrb.mxu1 %v7226_v5  ;;  %v6301_v63 = vld [vmem:[#allocation8 + $0x308] sm:$0xf]  ;;  %v6878_v4 = vor.u32 %v8524_v3, %v6877_v60 }
 0x14d   : > { %v7767_v6 = vld [vmem:[#allocation8 + $0xea0] sm:$0xf0]  ;;  %v8380_v0 = vld [vmem:[#allocation8 + $0x324] sm:$0xf0] }
 0x14e   : > { %v8535_v8 = vld [vmem:[#allocation8 + $0x804] sm:$0xf]  ;;  %v7770_v18 = vor.u32 %v8743_v2, %v7767_v6  ;;  %4214 = vmatpush.bf16.msrb.mxu2 %v7514_v14  ;;  %v6622_v2 = vor.u32 %v8460_v56, %v6621_v55  ;;  %v6589_v5 = vld [vmem:[#allocation8 + $0x548] sm:$0xf] }
 0x14f   : > { %v6935_v10 = vld [vmem:[#allocation8 + $0x820] sm:$0xf0]  ;;  %v8452_v6 = vld [vmem:[#allocation8 + $0x564] sm:$0xf0] }
 0x150   : > { %v8599_v11 = vld [vmem:[#allocation8 + $0xa04] sm:$0xf]  ;;  %v6938_v21 = vor.u32 %v8535_v8, %v6935_v10  ;;  %4227 = vmatpush.bf16.msrb.mxu3 %v7770_v18  ;;  %v6046_v8 = vor.u32 %v8316_v62, %v6045_v61  ;;  %v6302_v10 = vor.u32 %v8380_v0, %v6301_v63  ;;  %v8308_v14 = vld [vmem:[#allocation8 + $0xe4] sm:$0xf0]  ;;  %v6590_v17 = vor.u32 %v8452_v6, %v6589_v5 }
 0x151   : > { %v7191_v12 = vld [vmem:[#allocation8 + $0xa20] sm:$0xf0]  ;;  %v5949_v40 = vld [vmem:[#allocation8 + $0x48] sm:$0xf] }
 0x152   : > { %v8671_v19 = vld [vmem:[#allocation8 + $0xc44] sm:$0xf]  ;;  %v7194_v22 = vor.u32 %v8599_v11, %v7191_v12  ;;  %4190 = vmatpush.bf16.msrb.mxu0 %v6938_v21  ;;  %v6845_v11 = vld [vmem:[#allocation8 + $0x748] sm:$0xf]  ;;  %v6014_v21 = vor.u32 %v8308_v14, %v6013_v13 }
 0x153   : > { %v7479_v20 = vld [vmem:[#allocation8 + $0xc60] sm:$0xf0]  ;;  %v8516_v12 = vld [vmem:[#allocation8 + $0x764] sm:$0xf0] }
 0x154   : > { %v8735_v23 = vld [vmem:[#allocation8 + $0xe44] sm:$0xf]  ;;  %v7482_v28 = vor.u32 %v8671_v19, %v7479_v20  ;;  %4203 = vmatpush.bf16.msrb.mxu1 %v7194_v22  ;;  %v6846_v18 = vor.u32 %v8516_v12, %v6845_v11  ;;  %v6557_v19 = vld [vmem:[#allocation8 + $0x508] sm:$0xf]  ;;  %v6270_v22 = vor.u32 %v8372_v16, %v6269_v15 }
 0x155   : > { %v7735_v24 = vld [vmem:[#allocation8 + $0xe60] sm:$0xf0]  ;;  %4191 = vmatmul.bf16.vlgmr.msrb.gmra.mxu0 %v9510_v35  ;;  %v8444_v20 = vld [vmem:[#allocation8 + $0x524] sm:$0xf0] }
 0x156   : > { %v7738_v32 = vor.u32 %v8735_v23, %v7735_v24  ;;  %v8663_v33 = vld [vmem:[#allocation8 + $0xc04] sm:$0xf]  ;;  %4235 = vmatpush.bf16.msra.mxu0 %v6142_v25  ;;  %4215 = vmatpush.bf16.msrb.mxu2 %v7482_v28  ;;  %v6813_v23 = vld [vmem:[#allocation8 + $0x708] sm:$0xf]  ;;  %v6558_v29 = vor.u32 %v8444_v20, %v6557_v19 }
 0x157   : > { %v7447_v36 = vld [vmem:[#allocation8 + $0xc20] sm:$0xf0]  ;;  %4204 = vmatmul.bf16.vlgmr.msrb.gmra.mxu1 %v9512_v41  ;;  %v8508_v24 = vld [vmem:[#allocation8 + $0x724] sm:$0xf0] }
 0x158   : > { %v8727_v37 = vld [vmem:[#allocation8 + $0xe04] sm:$0xf]  ;;  %4248 = vmatpush.bf16.msra.mxu1 %v6398_v26  ;;  %v7450_v47 = vor.u32 %v8663_v33, %v7447_v36  ;;  %4228 = vmatpush.bf16.msrb.mxu3 %v7738_v32  ;;  %v5981_v25 = vld [vmem:[#allocation8 + $0x88] sm:$0xf]  ;;  %v6814_v30 = vor.u32 %v8508_v24, %v6813_v23 }
 0x159   : > { %v7703_v38 = vld [vmem:[#allocation8 + $0xe20] sm:$0xf0]  ;;  %v8300_v26 = vld [vmem:[#allocation8 + $0xa4] sm:$0xf0] }
 0x15a   : > { %v7706_v52 = vor.u32 %v8727_v37, %v7703_v38  ;;  %4236 = vmatpush.bf16.msra.mxu0 %v6110_v48  ;;  %4216 = vmatpush.bf16.msrb.mxu2 %v7450_v47  ;;  %v8364_v28 = vld [vmem:[#allocation8 + $0x2a4] sm:$0xf0]  ;;  %v5982_v33 = vor.u32 %v8300_v26, %v5981_v25 }
 0x15b   : > { %v8436_v32 = vld [vmem:[#allocation8 + $0x4e4] sm:$0xf0]  ;;  %v6238_v36 = vor.u32 %v8364_v28, %v6237_v27 }
 0x15c   : > { %4249 = vmatpush.bf16.msra.mxu1 %v6366_v43  ;;  %4229 = vmatpush.bf16.msrb.mxu3 %v7706_v52  ;;  %v6781_v37 = vld [vmem:[#allocation8 + $0x6c8] sm:$0xf]  ;;  %v6526_v44 = vor.u32 %v8436_v32, %v6525_v31 }
 0x15d   : > { %4217 = vmatmul.bf16.vlgmr.msrb.gmra.mxu2 %v9516_v7  ;;  %v8500_v38 = vld [vmem:[#allocation8 + $0x6e4] sm:$0xf0] }
 0x15e   : > { %4261 = vmatpush.bf16.msra.mxu2 %v6654_v53  ;;  %4237 = vmatpush.bf16.msra.mxu0 %v6078_v57  ;;  %v8292_v42 = vld [vmem:[#allocation8 + $0x64] sm:$0xf0]  ;;  %v6782_v45 = vor.u32 %v8500_v38, %v6781_v37 }
 0x15f   : > { %4230 = vmatmul.bf16.vlgmr.msrb.gmra.mxu3 %v9518_v9  ;;  %v6205_v48 = vld [vmem:[#allocation8 + $0x248] sm:$0xf]  ;;  %v5950_v50 = vor.u32 %v8292_v42, %v5949_v40 }
 0x160   : > { %4274 = vmatpush.bf16.msra.mxu3 %v6910_v54  ;;  %4250 = vmatpush.bf16.msra.mxu1 %v6334_v58  ;;  %v8356_v43 = vld [vmem:[#allocation8 + $0x264] sm:$0xf0] }
 0x161   : > { %v6493_v46 = vld [vmem:[#allocation8 + $0x488] sm:$0xf]  ;;  %v6206_v51 = vor.u32 %v8356_v43, %v6205_v48 }
 0x162   : > { %4262 = vmatpush.bf16.msra.mxu2 %v6622_v2  ;;  %4238 = vmatpush.bf16.msra.mxu0 %v6046_v8  ;;  %v8428_v47 = vld [vmem:[#allocation8 + $0x4a4] sm:$0xf0] }
 0x163   : > { %v6749_v49 = vld [vmem:[#allocation8 + $0x688] sm:$0xf]  ;;  %v6494_v58 = vor.u32 %v8428_v47, %v6493_v46 }
 0x164   : > { %4275 = vmatpush.bf16.msra.mxu3 %v6878_v4  ;;  %4251 = vmatpush.bf16.msra.mxu1 %v6302_v10  ;;  %v8492_v52 = vld [vmem:[#allocation8 + $0x6a4] sm:$0xf0] }
 0x165   : > { %v5917_v53 = vld [vmem:[#allocation8 + $0x8] sm:$0xf]  ;;  %v6750_v62 = vor.u32 %v8492_v52, %v6749_v49 }
 0x166   : > { %4263 = vmatpush.bf16.msra.mxu2 %v6590_v17  ;;  %4239 = vmatpush.bf16.msra.mxu0 %v6014_v21  ;;  %v8284_v54 = vld [vmem:[#allocation8 + $0x24] sm:$0xf0] }
 0x167   : > { %v6173_v55 = vld [vmem:[#allocation8 + $0x208] sm:$0xf]  ;;  %v5918_v2 = vor.u32 %v8284_v54, %v5917_v53 }
 0x168   : > { %4276 = vmatpush.bf16.msra.mxu3 %v6846_v18  ;;  %4252 = vmatpush.bf16.msra.mxu1 %v6270_v22  ;;  %v8348_v56 = vld [vmem:[#allocation8 + $0x224] sm:$0xf0] }
 0x169   : > { %v7165_v57 = vld [vmem:[#allocation8 + $0x9c8] sm:$0xf]  ;;  %v6174_v4 = vor.u32 %v8348_v56, %v6173_v55 }
 0x16a   : > { %4264 = vmatpush.bf16.msra.mxu2 %v6558_v29  ;;  %4240 = vmatpush.bf16.msra.mxu0 %v5982_v33  ;;  %v8596_v60 = vld [vmem:[#allocation8 + $0x9e4] sm:$0xf0] }
 0x16b   : > { %v7421_v3 = vld [vmem:[#allocation8 + $0xbc8] sm:$0xf]  ;;  %v7166_v8 = vor.u32 %v8596_v60, %v7165_v57 }
 0x16c   : > { %4277 = vmatpush.bf16.msra.mxu3 %v6814_v30  ;;  %4253 = vmatpush.bf16.msra.mxu1 %v6238_v36  ;;  %v8660_v61 = vld [vmem:[#allocation8 + $0xbe4] sm:$0xf0] }
 0x16d   : > { %v6461_v63 = vld [vmem:[#allocation8 + $0x448] sm:$0xf]  ;;  %v7422_v10 = vor.u32 %v8660_v61, %v7421_v3 }
 0x16e   : > { %4265 = vmatpush.bf16.msra.mxu2 %v6526_v44  ;;  %v8420_v0 = vld [vmem:[#allocation8 + $0x464] sm:$0xf0]  ;;  %4241 = vmatpush.bf16.msra.mxu0 %v5950_v50 }
 0x16f   : > { %v6717_v5 = vld [vmem:[#allocation8 + $0x648] sm:$0xf]  ;;  %v6462_v12 = vor.u32 %v8420_v0, %v6461_v63 }
 0x170   : > { %4278 = vmatpush.bf16.msra.mxu3 %v6782_v45  ;;  %4254 = vmatpush.bf16.msra.mxu1 %v6206_v51  ;;  %v8484_v6 = vld [vmem:[#allocation8 + $0x664] sm:$0xf0] }
 0x171   : > { %v7133_v11 = vld [vmem:[#allocation8 + $0x988] sm:$0xf]  ;;  %v6718_v16 = vor.u32 %v8484_v6, %v6717_v5 }
 0x172   : > { %4266 = vmatpush.bf16.msra.mxu2 %v6494_v58  ;;  %v8588_v13 = vld [vmem:[#allocation8 + $0x9a4] sm:$0xf0]  ;;  %4242 = vmatpush.bf16.msra.mxu0 %v5918_v2 }
 0x173   : > { %v7389_v14 = vld [vmem:[#allocation8 + $0xb88] sm:$0xf]  ;;  %v7134_v23 = vor.u32 %v8588_v13, %v7133_v11 }
 0x174   : > { %v8652_v15 = vld [vmem:[#allocation8 + $0xba4] sm:$0xf0]  ;;  %4279 = vmatpush.bf16.msra.mxu3 %v6750_v62  ;;  %4255 = vmatpush.bf16.msra.mxu1 %v6174_v4 }
 0x175   : > { %v6429_v17 = vld [vmem:[#allocation8 + $0x408] sm:$0xf]  ;;  %v7390_v24 = vor.u32 %v8652_v15, %v7389_v14  ;;  %4243 = vmatmul.bf16.vlgmr.msra.gmra.mxu0 %v9494_v34 }
 0x176   : > { %v8412_v18 = vld [vmem:[#allocation8 + $0x424] sm:$0xf0]  ;;  %4287 = vmatpush.bf16.msrb.mxu0 %v7166_v8  ;;  %4267 = vmatpush.bf16.msra.mxu2 %v6462_v12 }
 0x177   : > { %v6685_v19 = vld [vmem:[#allocation8 + $0x608] sm:$0xf]  ;;  %v6430_v27 = vor.u32 %v8412_v18, %v6429_v17  ;;  %4256 = vmatmul.bf16.vlgmr.msra.gmra.mxu1 %v9496_v39 }
 0x178   : > { %v8476_v20 = vld [vmem:[#allocation8 + $0x624] sm:$0xf0]  ;;  %4300 = vmatpush.bf16.msrb.mxu1 %v7422_v10  ;;  %4280 = vmatpush.bf16.msra.mxu3 %v6718_v16 }
 0x179   : > { %v7677_v21 = vld [vmem:[#allocation8 + $0xdc8] sm:$0xf]  ;;  %v6686_v30 = vor.u32 %v8476_v20, %v6685_v19 }
 0x17a   : > { %v8724_v22 = vld [vmem:[#allocation8 + $0xde4] sm:$0xf0]  ;;  %4288 = vmatpush.bf16.msrb.mxu0 %v7134_v23  ;;  %4268 = vmatpush.bf16.msra.mxu2 %v6430_v27 }
 0x17b   : > { %v7933_v25 = vld [vmem:[#allocation8 + $0xfc8] sm:$0xf]  ;;  %v7678_v31 = vor.u32 %v8724_v22, %v7677_v21 }
 0x17c   : > { %v8788_v26 = vld [vmem:[#allocation8 + $0xfe4] sm:$0xf0]  ;;  %4301 = vmatpush.bf16.msrb.mxu1 %v7390_v24  ;;  %4281 = vmatpush.bf16.msra.mxu3 %v6686_v30 }
 0x17d   : > { %v7101_v28 = vld [vmem:[#allocation8 + $0x948] sm:$0xf]  ;;  %v7934_v36 = vor.u32 %v8788_v26, %v7933_v25  ;;  %4269 = vmatmul.bf16.vlgmr.msra.gmra.mxu2 %v9500_v59 }
 0x17e   : > { %v8580_v29 = vld [vmem:[#allocation8 + $0x964] sm:$0xf0]  ;;  %4313 = vmatpush.bf16.msrb.mxu2 %v7678_v31 }
 0x17f   : > { %v7357_v32 = vld [vmem:[#allocation8 + $0xb48] sm:$0xf]  ;;  %v7102_v40 = vor.u32 %v8580_v29, %v7101_v28  ;;  %4282 = vmatmul.bf16.vlgmr.msra.gmra.mxu3 %v9502_v1 }
 0x180   : > { %v8644_v33 = vld [vmem:[#allocation8 + $0xb64] sm:$0xf0]  ;;  %4326 = vmatpush.bf16.msrb.mxu3 %v7934_v36 }
 0x181   : > { %v7645_v37 = vld [vmem:[#allocation8 + $0xd88] sm:$0xf]  ;;  %v7358_v43 = vor.u32 %v8644_v33, %v7357_v32  ;;  %4289 = vmatpush.bf16.msrb.mxu0 %v7102_v40 }
 0x182   : > { %v8716_v38 = vld [vmem:[#allocation8 + $0xda4] sm:$0xf0] }
 0x183   : > { %v7901_v42 = vld [vmem:[#allocation8 + $0xf88] sm:$0xf]  ;;  %v7646_v46 = vor.u32 %v8716_v38, %v7645_v37  ;;  %4302 = vmatpush.bf16.msrb.mxu1 %v7358_v43  ;;  %v8400_v43 = vld [vmem:[#allocation8 + $0x3cc] sm:$0xf] }
 0x184   : > { %v8780_v48 = vld [vmem:[#allocation8 + $0xfa4] sm:$0xf0] }
 0x185   : > { %v7069_v44 = vld [vmem:[#allocation8 + $0x908] sm:$0xf]  ;;  %v7902_v50 = vor.u32 %v8780_v48, %v7901_v42  ;;  %4314 = vmatpush.bf16.msrb.mxu2 %v7646_v46  ;;  %v8336_v42 = vld [vmem:[#allocation8 + $0x1cc] sm:$0xf] }
 0x186   : > { %v8572_v45 = vld [vmem:[#allocation8 + $0x924] sm:$0xf0]  ;;  %v6143_v48 = vld [vmem:[#allocation8 + $0x1e8] sm:$0xf0] }
 0x187   : > { %v7325_v47 = vld [vmem:[#allocation8 + $0xb08] sm:$0xf]  ;;  %v7070_v53 = vor.u32 %v8572_v45, %v7069_v44  ;;  %4327 = vmatpush.bf16.msrb.mxu3 %v7902_v50  ;;  %v6399_v45 = vld [vmem:[#allocation8 + $0x3e8] sm:$0xf0] }
 0x188   : > { %v8636_v49 = vld [vmem:[#allocation8 + $0xb24] sm:$0xf0] }
 0x189   : > { %v7613_v51 = vld [vmem:[#allocation8 + $0xd48] sm:$0xf]  ;;  %v7326_v56 = vor.u32 %v8636_v49, %v7325_v47  ;;  %4290 = vmatpush.bf16.msrb.mxu0 %v7070_v53  ;;  %v6146_v53 = vor.u32 %v8336_v42, %v6143_v48  ;;  %v8512_v48 = vld [vmem:[#allocation8 + $0x74c] sm:$0xf] }
 0x18a   : > { %v8708_v52 = vld [vmem:[#allocation8 + $0xd64] sm:$0xf0] }
 0x18b   : > { %v7869_v54 = vld [vmem:[#allocation8 + $0xf48] sm:$0xf]  ;;  %v7614_v60 = vor.u32 %v8708_v52, %v7613_v51  ;;  %4303 = vmatpush.bf16.msrb.mxu1 %v7326_v56 }
 0x18c   : > { %v8772_v55 = vld [vmem:[#allocation8 + $0xf64] sm:$0xf0] }
 0x18d   : > { %v7037_v57 = vld [vmem:[#allocation8 + $0x8c8] sm:$0xf]  ;;  %v7870_v62 = vor.u32 %v8772_v55, %v7869_v54  ;;  %4315 = vmatpush.bf16.msrb.mxu2 %v7614_v60  ;;  %v8328_v54 = vld [vmem:[#allocation8 + $0x18c] sm:$0xf]  ;;  %v6402_v55 = vor.u32 %v8400_v43, %v6399_v45 }
 0x18e   : > { %v8564_v58 = vld [vmem:[#allocation8 + $0x8e4] sm:$0xf0]  ;;  %v6367_v60 = vld [vmem:[#allocation8 + $0x3a8] sm:$0xf0] }
 0x18f   : > { %v7293_v3 = vld [vmem:[#allocation8 + $0xac8] sm:$0xf]  ;;  %v7038_v2 = vor.u32 %v8564_v58, %v7037_v57  ;;  %4328 = vmatpush.bf16.msrb.mxu3 %v7870_v62  ;;  %v6111_v57 = vld [vmem:[#allocation8 + $0x1a8] sm:$0xf0] }
 0x190   : > { %v8628_v61 = vld [vmem:[#allocation8 + $0xae4] sm:$0xf0]  ;;  %v8392_v58 = vld [vmem:[#allocation8 + $0x38c] sm:$0xf] }
 0x191   : > { %v7581_v63 = vld [vmem:[#allocation8 + $0xd08] sm:$0xf]  ;;  %v7294_v6 = vor.u32 %v8628_v61, %v7293_v3  ;;  %4291 = vmatpush.bf16.msrb.mxu0 %v7038_v2  ;;  %v8464_v2 = vld [vmem:[#allocation8 + $0x5cc] sm:$0xf] }
 0x192   : > { %v8700_v0 = vld [vmem:[#allocation8 + $0xd24] sm:$0xf0]  ;;  %v6847_v43 = vld [vmem:[#allocation8 + $0x768] sm:$0xf0] }
 0x193   : > { %v7837_v4 = vld [vmem:[#allocation8 + $0xf08] sm:$0xf]  ;;  %v7582_v11 = vor.u32 %v8700_v0, %v7581_v63  ;;  %4304 = vmatpush.bf16.msrb.mxu1 %v7294_v6  ;;  %v8528_v6 = vld [vmem:[#allocation8 + $0x7cc] sm:$0xf] }
 0x194   : > { %v8764_v5 = vld [vmem:[#allocation8 + $0xf24] sm:$0xf0] }
 0x195   : > { %v7005_v8 = vld [vmem:[#allocation8 + $0x888] sm:$0xf]  ;;  %v7838_v14 = vor.u32 %v8764_v5, %v7837_v4  ;;  %4316 = vmatpush.bf16.msrb.mxu2 %v7582_v11  ;;  %v6655_v4 = vld [vmem:[#allocation8 + $0x5e8] sm:$0xf0]  ;;  %v6114_v5 = vor.u32 %v8328_v54, %v6111_v57  ;;  %v6370_v11 = vor.u32 %v8392_v58, %v6367_v60 }
 0x196   : > { %v8556_v10 = vld [vmem:[#allocation8 + $0x8a4] sm:$0xf0]  ;;  %v6559_v54 = vld [vmem:[#allocation8 + $0x528] sm:$0xf0] }
 0x197   : > { %v7261_v12 = vld [vmem:[#allocation8 + $0xa88] sm:$0xf]  ;;  %v7006_v17 = vor.u32 %v8556_v10, %v7005_v8  ;;  %4329 = vmatpush.bf16.msrb.mxu3 %v7838_v14  ;;  %v6911_v8 = vld [vmem:[#allocation8 + $0x7e8] sm:$0xf0]  ;;  %v9534_v10 = vld [vmem:[#allocation10] sm:$0xff] }
 0x198   : > { %v8620_v13 = vld [vmem:[#allocation8 + $0xaa4] sm:$0xf0]  ;;  %v6079_v14 = vld [vmem:[#allocation8 + $0x168] sm:$0xf0] }
 0x199   : > { %v7549_v15 = vld [vmem:[#allocation8 + $0xcc8] sm:$0xf]  ;;  %v7262_v20 = vor.u32 %v8620_v13, %v7261_v12  ;;  %4292 = vmatpush.bf16.msrb.mxu0 %v7006_v17  ;;  %v8320_v13 = vld [vmem:[#allocation8 + $0x14c] sm:$0xf] }
 0x19a   : > { %v8692_v16 = vld [vmem:[#allocation8 + $0xce4] sm:$0xf0]  ;;  %v8384_v17 = vld [vmem:[#allocation8 + $0x34c] sm:$0xf] }
 0x19b   : > { %v7805_v18 = vld [vmem:[#allocation8 + $0xec8] sm:$0xf]  ;;  %v7550_v23 = vor.u32 %v8692_v16, %v7549_v15  ;;  %4305 = vmatpush.bf16.msrb.mxu1 %v7262_v20  ;;  %v6658_v16 = vor.u32 %v8464_v2, %v6655_v4  ;;  %v1451_v20 = vperm.slane %v9534_v10, 0  ;;  %v6815_v57 = vld [vmem:[#allocation8 + $0x728] sm:$0xf0] }
 0x19c   : > { %v8756_v19 = vld [vmem:[#allocation8 + $0xee4] sm:$0xf0]  ;;  %v8296_v60 = vld [vmem:[#allocation8 + $0x8c] sm:$0xf] }
 0x19d   : > { %v6973_v21 = vld [vmem:[#allocation8 + $0x848] sm:$0xf]  ;;  %v7806_v26 = vor.u32 %v8756_v19, %v7805_v18  ;;  %4317 = vmatpush.bf16.msrb.mxu2 %v7550_v23  ;;  %v6335_v18 = vld [vmem:[#allocation8 + $0x368] sm:$0xf0]  ;;  %v6914_v19 = vor.u32 %v8528_v6, %v6911_v8  ;;  %v6082_v23 = vor.u32 %v8320_v13, %v6079_v14 }
 0x19e   : > { %v8548_v22 = vld [vmem:[#allocation8 + $0x864] sm:$0xf0]  ;;  %v6527_v6 = vld [vmem:[#allocation8 + $0x4e8] sm:$0xf0] }
 0x19f   : > { %v7229_v24 = vld [vmem:[#allocation8 + $0xa48] sm:$0xf]  ;;  %v6974_v29 = vor.u32 %v8548_v22, %v6973_v21  ;;  %4330 = vmatpush.bf16.msrb.mxu3 %v7806_v26  ;;  %v8456_v21 = vld [vmem:[#allocation8 + $0x58c] sm:$0xf]  ;;  %v6338_v26 = vor.u32 %v8384_v17, %v6335_v18 }
 0x1a0   : > { %v8612_v25 = vld [vmem:[#allocation8 + $0xa64] sm:$0xf0]  ;;  %v6623_v22 = vld [vmem:[#allocation8 + $0x5a8] sm:$0xf0] }
 0x1a1   : > { %v7517_v27 = vld [vmem:[#allocation8 + $0xc88] sm:$0xf]  ;;  %v7230_v33 = vor.u32 %v8612_v25, %v7229_v24  ;;  %4293 = vmatpush.bf16.msrb.mxu0 %v6974_v29  ;;  %v8520_v24 = vld [vmem:[#allocation8 + $0x78c] sm:$0xf]  ;;  %v4036_v29 = vpop.f32.mrf.mxu0 }
 0x1a2   : > { %v8684_v28 = vld [vmem:[#allocation8 + $0xca4] sm:$0xf0]  ;;  %v6879_v25 = vld [vmem:[#allocation8 + $0x7a8] sm:$0xf0] }
 0x1a3   : > { %v7773_v30 = vld [vmem:[#allocation8 + $0xe88] sm:$0xf]  ;;  %v7518_v40 = vor.u32 %v8684_v28, %v7517_v27  ;;  %4306 = vmatpush.bf16.msrb.mxu1 %v7230_v33  ;;  %v8312_v27 = vld [vmem:[#allocation8 + $0x10c] sm:$0xf]  ;;  %v4037_v33 = vadd.f32 %v4036_v29, %v1451_v20 }
 0x1a4   : > { %v8748_v31 = vld [vmem:[#allocation8 + $0xea4] sm:$0xf0]  ;;  %v6047_v28 = vld [vmem:[#allocation8 + $0x128] sm:$0xf0] }
 0x1a5   : > { %v6941_v32 = vld [vmem:[#allocation8 + $0x808] sm:$0xf]  ;;  %v7774_v44 = vor.u32 %v8748_v31, %v7773_v30  ;;  %4318 = vmatpush.bf16.msrb.mxu2 %v7518_v40  ;;  %v6626_v30 = vor.u32 %v8456_v21, %v6623_v22  ;;  %v8376_v31 = vld [vmem:[#allocation8 + $0x30c] sm:$0xf]  ;;  %v6050_v42 = vor.u32 %v8312_v27, %v6047_v28 }
 0x1a6   : > { %v8540_v36 = vld [vmem:[#allocation8 + $0x824] sm:$0xf0]  ;;  %v6591_v40 = vld [vmem:[#allocation8 + $0x568] sm:$0xf0] }
 0x1a7   : > { %v7197_v37 = vld [vmem:[#allocation8 + $0xa08] sm:$0xf]  ;;  %v6942_v49 = vor.u32 %v8540_v36, %v6941_v32  ;;  %4331 = vmatpush.bf16.msrb.mxu3 %v7774_v44  ;;  %v6303_v32 = vld [vmem:[#allocation8 + $0x328] sm:$0xf0]  ;;  %v6882_v36 = vor.u32 %v8520_v24, %v6879_v25  ;;  %v4075_v24 = vpop.f32.mrf.mxu3 }
 0x1a8   : > { %v8604_v38 = vld [vmem:[#allocation8 + $0xa24] sm:$0xf0]  ;;  %v6306_v45 = vor.u32 %v8376_v31, %v6303_v32  ;;  %v8288_v14 = vld [vmem:[#allocation8 + $0x4c] sm:$0xf] }
 0x1a9   : > { %v7485_v46 = vld [vmem:[#allocation8 + $0xc48] sm:$0xf]  ;;  %v7198_v52 = vor.u32 %v8604_v38, %v7197_v37  ;;  %4294 = vmatpush.bf16.msrb.mxu0 %v6942_v49  ;;  %v4049_v37 = vpop.f32.mrf.mxu1  ;;  %v8448_v38 = vld [vmem:[#allocation8 + $0x54c] sm:$0xf] }
 0x1aa   : > { %v8676_v47 = vld [vmem:[#allocation8 + $0xc64] sm:$0xf0]  ;;  %v4050_v44 = vadd.f32 %v4049_v37, %v4037_v33  ;;  %v6594_v49 = vor.u32 %v8448_v38, %v6591_v40  ;;  %v8352_v17 = vld [vmem:[#allocation8 + $0x24c] sm:$0xf] }
 0x1ab   : > { %v7741_v50 = vld [vmem:[#allocation8 + $0xe48] sm:$0xf]  ;;  %v7486_v56 = vor.u32 %v8676_v47, %v7485_v46  ;;  %4307 = vmatpush.bf16.msrb.mxu1 %v7198_v52  ;;  %v8304_v46 = vld [vmem:[#allocation8 + $0xcc] sm:$0xf]  ;;  %v6850_v52 = vor.u32 %v8512_v48, %v6847_v43 }
 0x1ac   : > { %v8740_v51 = vld [vmem:[#allocation8 + $0xe64] sm:$0xf0]  ;;  %4295 = vmatmul.bf16.vlgmr.msrb.gmra.mxu0 %v9510_v35  ;;  %v6015_v47 = vld [vmem:[#allocation8 + $0xe8] sm:$0xf0] }
 0x1ad   : > { %v7742_v3 = vor.u32 %v8740_v51, %v7741_v50  ;;  %v7453_v61 = vld [vmem:[#allocation8 + $0xc08] sm:$0xf]  ;;  %4339 = vmatpush.bf16.msra.mxu0 %v6146_v53  ;;  %4319 = vmatpush.bf16.msrb.mxu2 %v7486_v56  ;;  %v8368_v50 = vld [vmem:[#allocation8 + $0x2cc] sm:$0xf] }
 0x1ae   : > { %v8668_v62 = vld [vmem:[#allocation8 + $0xc24] sm:$0xf0]  ;;  %4308 = vmatmul.bf16.vlgmr.msrb.gmra.mxu1 %v9512_v41  ;;  %v6271_v51 = vld [vmem:[#allocation8 + $0x2e8] sm:$0xf0] }
 0x1af   : > { %v7709_v63 = vld [vmem:[#allocation8 + $0xe08] sm:$0xf]  ;;  %4352 = vmatpush.bf16.msra.mxu1 %v6402_v55  ;;  %v7454_v12 = vor.u32 %v8668_v62, %v7453_v61  ;;  %4332 = vmatpush.bf16.msrb.mxu3 %v7742_v3  ;;  %v8440_v53 = vld [vmem:[#allocation8 + $0x50c] sm:$0xf]  ;;  %v6018_v55 = vor.u32 %v8304_v46, %v6015_v47  ;;  %v6274_v58 = vor.u32 %v8368_v50, %v6271_v51  ;;  %v4038_v61 = vpop.f32.mrf.mxu0 }
 0x1b0   : > { %v8732_v0 = vld [vmem:[#allocation8 + $0xe24] sm:$0xf0]  ;;  %v8504_v56 = vld [vmem:[#allocation8 + $0x70c] sm:$0xf]  ;;  %v6562_v62 = vor.u32 %v8440_v53, %v6559_v54 }
 0x1b1   : > { %v7710_v15 = vor.u32 %v8732_v0, %v7709_v63  ;;  %4340 = vmatpush.bf16.msra.mxu0 %v6114_v5  ;;  %4320 = vmatpush.bf16.msrb.mxu2 %v7454_v12  ;;  %v5983_v3 = vld [vmem:[#allocation8 + $0xa8] sm:$0xf0]  ;;  %v6818_v2 = vor.u32 %v8504_v56, %v6815_v57  ;;  %v4051_v4 = vpop.f32.mrf.mxu1 }
 0x1b2   : > { %v8360_v63 = vld [vmem:[#allocation8 + $0x28c] sm:$0xf]  ;;  %v5986_v8 = vor.u32 %v8296_v60, %v5983_v3 }
 0x1b3   : > { %4353 = vmatpush.bf16.msra.mxu1 %v6370_v11  ;;  %4333 = vmatpush.bf16.msrb.mxu3 %v7710_v15  ;;  %v6239_v0 = vld [vmem:[#allocation8 + $0x2a8] sm:$0xf0] }
 0x1b4   : > { %4321 = vmatmul.bf16.vlgmr.msrb.gmra.mxu2 %v9516_v7  ;;  %v8432_v5 = vld [vmem:[#allocation8 + $0x4cc] sm:$0xf]  ;;  %v6242_v13 = vor.u32 %v8360_v63, %v6239_v0 }
 0x1b5   : > { %4365 = vmatpush.bf16.msra.mxu2 %v6658_v16  ;;  %4341 = vmatpush.bf16.msra.mxu0 %v6082_v23  ;;  %v8496_v11 = vld [vmem:[#allocation8 + $0x6cc] sm:$0xf]  ;;  %v6530_v16 = vor.u32 %v8432_v5, %v6527_v6 }
 0x1b6   : > { %4334 = vmatmul.bf16.vlgmr.msrb.gmra.mxu3 %v9518_v9  ;;  %v6783_v12 = vld [vmem:[#allocation8 + $0x6e8] sm:$0xf0] }
 0x1b7   : > { %4378 = vmatpush.bf16.msra.mxu3 %v6914_v19  ;;  %4354 = vmatpush.bf16.msra.mxu1 %v6338_v26  ;;  %v5951_v15 = vld [vmem:[#allocation8 + $0x68] sm:$0xf0]  ;;  %v4062_v19 = vpop.f32.mrf.mxu2  ;;  %v6786_v20 = vor.u32 %v8496_v11, %v6783_v12 }
 0x1b8   : > { %v6207_v18 = vld [vmem:[#allocation8 + $0x268] sm:$0xf0]  ;;  %v4063_v23 = vadd.f32 %v4062_v19, %v4050_v44  ;;  %v5954_v25 = vor.u32 %v8288_v14, %v5951_v15 }
 0x1b9   : > { %4366 = vmatpush.bf16.msra.mxu2 %v6626_v30  ;;  %4342 = vmatpush.bf16.msra.mxu0 %v6050_v42  ;;  %v8424_v21 = vld [vmem:[#allocation8 + $0x48c] sm:$0xf]  ;;  %v6210_v29 = vor.u32 %v8352_v17, %v6207_v18 }
 0x1ba   : > { %v6495_v22 = vld [vmem:[#allocation8 + $0x4a8] sm:$0xf0]  ;;  %v9541_v33 = vadd.f32 %v4075_v24, %v4063_v23 }
 0x1bb   : > { %4379 = vmatpush.bf16.msra.mxu3 %v6882_v36  ;;  %4355 = vmatpush.bf16.msra.mxu1 %v6306_v45  ;;  %v8488_v26 = vld [vmem:[#allocation8 + $0x68c] sm:$0xf]  ;;  %v6498_v36 = vor.u32 %v8424_v21, %v6495_v22 }
 0x1bc   : > { %v6751_v27 = vld [vmem:[#allocation8 + $0x6a8] sm:$0xf0] }
 0x1bd   : > { %4367 = vmatpush.bf16.msra.mxu2 %v6594_v49  ;;  %4343 = vmatpush.bf16.msra.mxu0 %v6018_v55  ;;  %v8280_v28 = vld [vmem:[#allocation8 + $0xc] sm:$0xf]  ;;  %v6754_v42 = vor.u32 %v8488_v26, %v6751_v27 }
 0x1be   : > { %v5919_v30 = vld [vmem:[#allocation8 + $0x28] sm:$0xf0] }
 0x1bf   : > { %4380 = vmatpush.bf16.msra.mxu3 %v6850_v52  ;;  %4356 = vmatpush.bf16.msra.mxu1 %v6274_v58  ;;  %v8344_v31 = vld [vmem:[#allocation8 + $0x20c] sm:$0xf]  ;;  %v5922_v45 = vor.u32 %v8280_v28, %v5919_v30  ;;  %v4064_v57 = vpop.f32.mrf.mxu2  ;;  %v4088_v30 = vpop.f32.mrf.mxu0 }
 0x1c0   : > { %v6175_v32 = vld [vmem:[#allocation8 + $0x228] sm:$0xf0] }
 0x1c1   : > { %4368 = vmatpush.bf16.msra.mxu2 %v6562_v62  ;;  %4344 = vmatpush.bf16.msra.mxu0 %v5986_v8  ;;  %v8592_v37 = vld [vmem:[#allocation8 + $0x9cc] sm:$0xf]  ;;  %v6178_v49 = vor.u32 %v8344_v31, %v6175_v32  ;;  %v4077_v62 = vpop.f32.mrf.mxu3 }
 0x1c2   : > { %v7167_v38 = vld [vmem:[#allocation8 + $0x9e8] sm:$0xf0] }
 0x1c3   : > { %4381 = vmatpush.bf16.msra.mxu3 %v6818_v2  ;;  %4357 = vmatpush.bf16.msra.mxu1 %v6242_v13  ;;  %v8656_v40 = vld [vmem:[#allocation8 + $0xbcc] sm:$0xf]  ;;  %v7170_v50 = vor.u32 %v8592_v37, %v7167_v38  ;;  %v4089_v37 = vadd.f32 %v4088_v30, %v9541_v33  ;;  %v4101_v38 = vpop.f32.mrf.mxu1 }
 0x1c4   : > { %v7423_v48 = vld [vmem:[#allocation8 + $0xbe8] sm:$0xf0] }
 0x1c5   : > { %4369 = vmatpush.bf16.msra.mxu2 %v6530_v16  ;;  %v8416_v43 = vld [vmem:[#allocation8 + $0x44c] sm:$0xf]  ;;  %4345 = vmatpush.bf16.msra.mxu0 %v5954_v25  ;;  %v7426_v52 = vor.u32 %v8656_v40, %v7423_v48 }
 0x1c6   : > { %v6463_v44 = vld [vmem:[#allocation8 + $0x468] sm:$0xf0] }
 0x1c7   : > { %4382 = vmatpush.bf16.msra.mxu3 %v6786_v20  ;;  %v8480_v46 = vld [vmem:[#allocation8 + $0x64c] sm:$0xf]  ;;  %4358 = vmatpush.bf16.msra.mxu1 %v6210_v29  ;;  %v6466_v53 = vor.u32 %v8416_v43, %v6463_v44  ;;  %v4090_v62 = vpop.f32.mrf.mxu0 }
 0x1c8   : > { %v6719_v47 = vld [vmem:[#allocation8 + $0x668] sm:$0xf0] }
 0x1c9   : > { %v8584_v51 = vld [vmem:[#allocation8 + $0x98c] sm:$0xf]  ;;  %4370 = vmatpush.bf16.msra.mxu2 %v6498_v36  ;;  %v6722_v58 = vor.u32 %v8480_v46, %v6719_v47  ;;  %4346 = vmatpush.bf16.msra.mxu0 %v5922_v45  ;;  %v4102_v46 = vadd.f32 %v4101_v38, %v4089_v37  ;;  %v8341_v37 = vld [vmem:[#allocation8 + $0x1ec] sm:$0xf0] }
 0x1ca   : > { %v7135_v54 = vld [vmem:[#allocation8 + $0x9a8] sm:$0xf0]  ;;  %v6405_v38 = vld [vmem:[#allocation8 + $0x3d0] sm:$0xf] }
 0x1cb   : > { %v8648_v55 = vld [vmem:[#allocation8 + $0xb8c] sm:$0xf]  ;;  %4383 = vmatpush.bf16.msra.mxu3 %v6754_v42  ;;  %4359 = vmatpush.bf16.msra.mxu1 %v6178_v49  ;;  %v7138_v4 = vor.u32 %v8584_v51, %v7135_v54 }
 0x1cc   : > { %v7391_v56 = vld [vmem:[#allocation8 + $0xba8] sm:$0xf0]  ;;  %4347 = vmatmul.bf16.vlgmr.msra.gmra.mxu0 %v9494_v34 }
 0x1cd   : > { %v8408_v60 = vld [vmem:[#allocation8 + $0x40c] sm:$0xf]  ;;  %4391 = vmatpush.bf16.msrb.mxu0 %v7170_v50  ;;  %4371 = vmatpush.bf16.msra.mxu2 %v6466_v53  ;;  %v7394_v8 = vor.u32 %v8648_v55, %v7391_v56 }
 0x1ce   : > { %v6431_v3 = vld [vmem:[#allocation8 + $0x428] sm:$0xf0]  ;;  %4360 = vmatmul.bf16.vlgmr.msra.gmra.mxu1 %v9496_v39 }
 0x1cf   : > { %v8472_v61 = vld [vmem:[#allocation8 + $0x60c] sm:$0xf]  ;;  %4404 = vmatpush.bf16.msrb.mxu1 %v7426_v52  ;;  %v6434_v11 = vor.u32 %v8408_v60, %v6431_v3  ;;  %4384 = vmatpush.bf16.msra.mxu3 %v6722_v58 }
 0x1d0   : > { %v6687_v63 = vld [vmem:[#allocation8 + $0x628] sm:$0xf0] }
 0x1d1   : > { %v8720_v0 = vld [vmem:[#allocation8 + $0xdcc] sm:$0xf]  ;;  %v6690_v14 = vor.u32 %v8472_v61, %v6687_v63  ;;  %4392 = vmatpush.bf16.msrb.mxu0 %v7138_v4  ;;  %4372 = vmatpush.bf16.msra.mxu2 %v6434_v11  ;;  %v4103_v4 = vpop.f32.mrf.mxu1 }
 0x1d2   : > { %v7679_v2 = vld [vmem:[#allocation8 + $0xde8] sm:$0xf0]  ;;  %v6661_v4 = vld [vmem:[#allocation8 + $0x5d0] sm:$0xf] }
 0x1d3   : > { %v8784_v5 = vld [vmem:[#allocation8 + $0xfcc] sm:$0xf]  ;;  %v7682_v15 = vor.u32 %v8720_v0, %v7679_v2  ;;  %4405 = vmatpush.bf16.msrb.mxu1 %v7394_v8  ;;  %4385 = vmatpush.bf16.msra.mxu3 %v6690_v14 }
 0x1d4   : > { %v7935_v6 = vld [vmem:[#allocation8 + $0xfe8] sm:$0xf0]  ;;  %4373 = vmatmul.bf16.vlgmr.msra.gmra.mxu2 %v9500_v59 }
 0x1d5   : > { %v8576_v12 = vld [vmem:[#allocation8 + $0x94c] sm:$0xf]  ;;  %v7938_v18 = vor.u32 %v8784_v5, %v7935_v6  ;;  %4417 = vmatpush.bf16.msrb.mxu2 %v7682_v15 }
 0x1d6   : > { %v7103_v13 = vld [vmem:[#allocation8 + $0x968] sm:$0xf0]  ;;  %4386 = vmatmul.bf16.vlgmr.msra.gmra.mxu3 %v9502_v1 }
 0x1d7   : > { %v8640_v16 = vld [vmem:[#allocation8 + $0xb4c] sm:$0xf]  ;;  %v7106_v21 = vor.u32 %v8576_v12, %v7103_v13  ;;  %4430 = vmatpush.bf16.msrb.mxu3 %v7938_v18 }
 0x1d8   : > { %v7359_v17 = vld [vmem:[#allocation8 + $0xb68] sm:$0xf0] }
 0x1d9   : > { %v8712_v19 = vld [vmem:[#allocation8 + $0xd8c] sm:$0xf]  ;;  %v7362_v24 = vor.u32 %v8640_v16, %v7359_v17  ;;  %4393 = vmatpush.bf16.msrb.mxu0 %v7106_v21  ;;  %v4114_v21 = vpop.f32.mrf.mxu2 }
 0x1da   : > { %v7647_v20 = vld [vmem:[#allocation8 + $0xda8] sm:$0xf0] }
 0x1db   : > { %v8776_v22 = vld [vmem:[#allocation8 + $0xf8c] sm:$0xf]  ;;  %v7650_v27 = vor.u32 %v8712_v19, %v7647_v20  ;;  %4406 = vmatpush.bf16.msrb.mxu1 %v7362_v24 }
 0x1dc   : > { %v7903_v23 = vld [vmem:[#allocation8 + $0xfa8] sm:$0xf0] }
 0x1dd   : > { %v8568_v25 = vld [vmem:[#allocation8 + $0x90c] sm:$0xf]  ;;  %v7906_v31 = vor.u32 %v8776_v22, %v7903_v23  ;;  %4418 = vmatpush.bf16.msrb.mxu2 %v7650_v27  ;;  %v1452_v23 = vperm.slane %v9534_v10, 1  ;;  %v4127_v27 = vpop.f32.mrf.mxu3 }
 0x1de   : > { %v7071_v26 = vld [vmem:[#allocation8 + $0x928] sm:$0xf0] }
 0x1df   : > { %v8632_v28 = vld [vmem:[#allocation8 + $0xb0c] sm:$0xf]  ;;  %v7074_v40 = vor.u32 %v8568_v25, %v7071_v26  ;;  %4431 = vmatpush.bf16.msrb.mxu3 %v7906_v31  ;;  %v4115_v26 = vadd.f32 %v4114_v21, %v4102_v46  ;;  %v8389_v21 = vld [vmem:[#allocation8 + $0x36c] sm:$0xf0] }
 0x1e0   : > { %v7327_v29 = vld [vmem:[#allocation8 + $0xb28] sm:$0xf0] }
 0x1e1   : > { %v8704_v32 = vld [vmem:[#allocation8 + $0xd4c] sm:$0xf]  ;;  %v7330_v43 = vor.u32 %v8632_v28, %v7327_v29  ;;  %4394 = vmatpush.bf16.msrb.mxu0 %v7074_v40  ;;  %v9549_v40 = vadd.f32 %v4127_v27, %v4115_v26  ;;  %v6885_v27 = vld [vmem:[#allocation8 + $0x790] sm:$0xf] }
 0x1e2   : > { %v7615_v36 = vld [vmem:[#allocation8 + $0xd68] sm:$0xf0] }
 0x1e3   : > { %v8768_v42 = vld [vmem:[#allocation8 + $0xf4c] sm:$0xf]  ;;  %v7618_v47 = vor.u32 %v8704_v32, %v7615_v36  ;;  %4407 = vmatpush.bf16.msrb.mxu1 %v7330_v43  ;;  %v6149_v36 = vld [vmem:[#allocation8 + $0x1d0] sm:$0xf] }
 0x1e4   : > { %v7871_v48 = vld [vmem:[#allocation8 + $0xf68] sm:$0xf0]  ;;  %v8405_v43 = vld [vmem:[#allocation8 + $0x3ec] sm:$0xf0] }
 0x1e5   : > { %v8560_v44 = vld [vmem:[#allocation8 + $0x8cc] sm:$0xf]  ;;  %v7874_v51 = vor.u32 %v8768_v42, %v7871_v48  ;;  %4419 = vmatpush.bf16.msrb.mxu2 %v7618_v47  ;;  %v4140_v42 = vpop.f32.mrf.mxu0  ;;  %v4153_v47 = vpop.f32.mrf.mxu1 }
 0x1e6   : > { %v7039_v45 = vld [vmem:[#allocation8 + $0x8e8] sm:$0xf0]  ;;  %v4141_v46 = vadd.f32 %v4140_v42, %v1452_v23 }
 0x1e7   : > { %v8624_v49 = vld [vmem:[#allocation8 + $0xacc] sm:$0xf]  ;;  %v7042_v33 = vor.u32 %v8560_v44, %v7039_v45  ;;  %4432 = vmatpush.bf16.msrb.mxu3 %v7874_v51 }
 0x1e8   : > { %v7295_v50 = vld [vmem:[#allocation8 + $0xae8] sm:$0xf0] }
 0x1e9   : > { %v8696_v52 = vld [vmem:[#allocation8 + $0xd0c] sm:$0xf]  ;;  %v7298_v56 = vor.u32 %v8624_v49, %v7295_v50  ;;  %4395 = vmatpush.bf16.msrb.mxu0 %v7042_v33  ;;  %v6117_v33 = vld [vmem:[#allocation8 + $0x190] sm:$0xf] }
 0x1ea   : > { %v7583_v53 = vld [vmem:[#allocation8 + $0xd28] sm:$0xf0] }
 0x1eb   : > { %v8760_v54 = vld [vmem:[#allocation8 + $0xf0c] sm:$0xf]  ;;  %v7586_v60 = vor.u32 %v8696_v52, %v7583_v53  ;;  %4408 = vmatpush.bf16.msrb.mxu1 %v7298_v56  ;;  %v6150_v53 = vor.u32 %v8341_v37, %v6149_v36  ;;  %v6309_v36 = vld [vmem:[#allocation8 + $0x310] sm:$0xf] }
 0x1ec   : > { %v7839_v55 = vld [vmem:[#allocation8 + $0xf28] sm:$0xf0]  ;;  %v8381_v37 = vld [vmem:[#allocation8 + $0x32c] sm:$0xf0] }
 0x1ed   : > { %v8552_v57 = vld [vmem:[#allocation8 + $0x88c] sm:$0xf]  ;;  %v7842_v63 = vor.u32 %v8760_v54, %v7839_v55  ;;  %4420 = vmatpush.bf16.msrb.mxu2 %v7586_v60  ;;  %v4154_v54 = vadd.f32 %v4153_v47, %v4141_v46  ;;  %v6406_v55 = vor.u32 %v8405_v43, %v6405_v38  ;;  %v8397_v60 = vld [vmem:[#allocation8 + $0x3ac] sm:$0xf0] }
 0x1ee   : > { %v7007_v58 = vld [vmem:[#allocation8 + $0x8a8] sm:$0xf0]  ;;  %v8453_v43 = vld [vmem:[#allocation8 + $0x56c] sm:$0xf0] }
 0x1ef   : > { %v8616_v3 = vld [vmem:[#allocation8 + $0xa8c] sm:$0xf]  ;;  %v7010_v5 = vor.u32 %v8552_v57, %v7007_v58  ;;  %4433 = vmatpush.bf16.msrb.mxu3 %v7842_v63  ;;  %v8333_v57 = vld [vmem:[#allocation8 + $0x1ac] sm:$0xf0] }
 0x1f0   : > { %v7263_v61 = vld [vmem:[#allocation8 + $0xaa8] sm:$0xf0]  ;;  %v6373_v58 = vld [vmem:[#allocation8 + $0x390] sm:$0xf] }
 0x1f1   : > { %v8688_v0 = vld [vmem:[#allocation8 + $0xccc] sm:$0xf]  ;;  %v7266_v11 = vor.u32 %v8616_v3, %v7263_v61  ;;  %4396 = vmatpush.bf16.msrb.mxu0 %v7010_v5  ;;  %v8469_v5 = vld [vmem:[#allocation8 + $0x5ec] sm:$0xf0] }
 0x1f2   : > { %v7551_v2 = vld [vmem:[#allocation8 + $0xce8] sm:$0xf0]  ;;  %v6853_v47 = vld [vmem:[#allocation8 + $0x750] sm:$0xf] }
 0x1f3   : > { %v8752_v6 = vld [vmem:[#allocation8 + $0xecc] sm:$0xf]  ;;  %v7554_v14 = vor.u32 %v8688_v0, %v7551_v2  ;;  %4409 = vmatpush.bf16.msrb.mxu1 %v7266_v11  ;;  %v4116_v0 = vpop.f32.mrf.mxu2  ;;  %v6917_v11 = vld [vmem:[#allocation8 + $0x7d0] sm:$0xf] }
 0x1f4   : > { %v7807_v8 = vld [vmem:[#allocation8 + $0xee8] sm:$0xf0]  ;;  %v8509_v0 = vld [vmem:[#allocation8 + $0x72c] sm:$0xf0] }
 0x1f5   : > { %v8544_v12 = vld [vmem:[#allocation8 + $0x84c] sm:$0xf]  ;;  %v7810_v17 = vor.u32 %v8752_v6, %v7807_v8  ;;  %4421 = vmatpush.bf16.msrb.mxu2 %v7554_v14  ;;  %v4129_v6 = vpop.f32.mrf.mxu3  ;;  %v6118_v8 = vor.u32 %v8333_v57, %v6117_v33 }
 0x1f6   : > { %v6975_v13 = vld [vmem:[#allocation8 + $0x868] sm:$0xf0] }
 0x1f7   : > { %v8608_v15 = vld [vmem:[#allocation8 + $0xa4c] sm:$0xf]  ;;  %v6978_v22 = vor.u32 %v8544_v12, %v6975_v13  ;;  %4434 = vmatpush.bf16.msrb.mxu3 %v7810_v17  ;;  %v8533_v12 = vld [vmem:[#allocation8 + $0x7ec] sm:$0xf0]  ;;  %v6374_v13 = vor.u32 %v8397_v60, %v6373_v58  ;;  %v4142_v17 = vpop.f32.mrf.mxu0 }
 0x1f8   : > { %v7231_v16 = vld [vmem:[#allocation8 + $0xa68] sm:$0xf0]  ;;  %v6918_v23 = vor.u32 %v8533_v12, %v6917_v11  ;;  %v6565_v58 = vld [vmem:[#allocation8 + $0x510] sm:$0xf] }
 0x1f9   : > { %v8680_v18 = vld [vmem:[#allocation8 + $0xc8c] sm:$0xf]  ;;  %v7234_v28 = vor.u32 %v8608_v15, %v7231_v16  ;;  %4397 = vmatpush.bf16.msrb.mxu0 %v6978_v22  ;;  %v6085_v15 = vld [vmem:[#allocation8 + $0x150] sm:$0xf]  ;;  %v4155_v22 = vpop.f32.mrf.mxu1 }
 0x1fa   : > { %v7519_v19 = vld [vmem:[#allocation8 + $0xca8] sm:$0xf0]  ;;  %v8325_v16 = vld [vmem:[#allocation8 + $0x16c] sm:$0xf0] }
 0x1fb   : > { %v8744_v20 = vld [vmem:[#allocation8 + $0xe8c] sm:$0xf]  ;;  %v7522_v32 = vor.u32 %v8680_v18, %v7519_v19  ;;  %4410 = vmatpush.bf16.msrb.mxu1 %v7234_v28  ;;  %v6662_v19 = vor.u32 %v8469_v5, %v6661_v4  ;;  %v6086_v26 = vor.u32 %v8325_v16, %v6085_v15  ;;  %v8525_v28 = vld [vmem:[#allocation8 + $0x7ac] sm:$0xf0]  ;;  %v4166_v38 = vpop.f32.mrf.mxu2 }
 0x1fc   : > { %v7775_v24 = vld [vmem:[#allocation8 + $0xea8] sm:$0xf0]  ;;  %v6886_v42 = vor.u32 %v8525_v28, %v6885_v27  ;;  %v8445_v60 = vld [vmem:[#allocation8 + $0x52c] sm:$0xf0] }
 0x1fd   : > { %v8536_v25 = vld [vmem:[#allocation8 + $0x80c] sm:$0xf]  ;;  %v7778_v48 = vor.u32 %v8744_v20, %v7775_v24  ;;  %4422 = vmatpush.bf16.msrb.mxu2 %v7522_v32  ;;  %v6341_v20 = vld [vmem:[#allocation8 + $0x350] sm:$0xf] }
 0x1fe   : > { %v6943_v29 = vld [vmem:[#allocation8 + $0x828] sm:$0xf0]  ;;  %v6629_v24 = vld [vmem:[#allocation8 + $0x590] sm:$0xf] }
 0x1ff   : > { %v8600_v30 = vld [vmem:[#allocation8 + $0xa0c] sm:$0xf]  ;;  %v6946_v49 = vor.u32 %v8536_v25, %v6943_v29  ;;  %4435 = vmatpush.bf16.msrb.mxu3 %v7778_v48  ;;  %v8461_v25 = vld [vmem:[#allocation8 + $0x5ac] sm:$0xf0]  ;;  %v6342_v29 = vor.u32 %v8389_v21, %v6341_v20 }
 0x200   : > { %v7199_v31 = vld [vmem:[#allocation8 + $0xa28] sm:$0xf0]  ;;  %v6630_v32 = vor.u32 %v8461_v25, %v6629_v24  ;;  %v6597_v48 = vld [vmem:[#allocation8 + $0x550] sm:$0xf] }
 0x201   : > { %v8672_v44 = vld [vmem:[#allocation8 + $0xc4c] sm:$0xf]  ;;  %v7202_v52 = vor.u32 %v8600_v30, %v7199_v31  ;;  %4398 = vmatpush.bf16.msrb.mxu0 %v6946_v49  ;;  %v6053_v30 = vld [vmem:[#allocation8 + $0x110] sm:$0xf]  ;;  %v6598_v33 = vor.u32 %v8453_v43, %v6597_v48 }
 0x202   : > { %v7487_v45 = vld [vmem:[#allocation8 + $0xc68] sm:$0xf0]  ;;  %v8317_v31 = vld [vmem:[#allocation8 + $0x12c] sm:$0xf0] }
 0x203   : > { %v8736_v50 = vld [vmem:[#allocation8 + $0xe4c] sm:$0xf]  ;;  %v7490_v56 = vor.u32 %v8672_v44, %v7487_v45  ;;  %4411 = vmatpush.bf16.msrb.mxu1 %v7202_v52  ;;  %v4167_v44 = vadd.f32 %v4166_v38, %v4154_v54  ;;  %v4179_v45 = vpop.f32.mrf.mxu3  ;;  %v6054_v46 = vor.u32 %v8317_v31, %v6053_v30  ;;  %v8517_v49 = vld [vmem:[#allocation8 + $0x76c] sm:$0xf0]  ;;  %v4192_v54 = vpop.f32.mrf.mxu0 }
 0x204   : > { %v7743_v51 = vld [vmem:[#allocation8 + $0xe68] sm:$0xf0]  ;;  %4399 = vmatmul.bf16.vlgmr.msrb.gmra.mxu0 %v9510_v35  ;;  %v8309_v52 = vld [vmem:[#allocation8 + $0xec] sm:$0xf0]  ;;  %v6854_v57 = vor.u32 %v8517_v49, %v6853_v47 }
 0x205   : > { %v7746_v3 = vor.u32 %v8736_v50, %v7743_v51  ;;  %v8664_v61 = vld [vmem:[#allocation8 + $0xc0c] sm:$0xf]  ;;  %4443 = vmatpush.bf16.msra.mxu0 %v6150_v53  ;;  %4423 = vmatpush.bf16.msrb.mxu2 %v7490_v56  ;;  %v6310_v50 = vor.u32 %v8381_v37, %v6309_v36  ;;  %v6021_v51 = vld [vmem:[#allocation8 + $0xd0] sm:$0xf]  ;;  %v4180_v53 = vadd.f32 %v4179_v45, %v4167_v44 }
 0x206   : > { %v7455_v62 = vld [vmem:[#allocation8 + $0xc28] sm:$0xf0]  ;;  %4412 = vmatmul.bf16.vlgmr.msrb.gmra.mxu1 %v9512_v41  ;;  %v8373_v56 = vld [vmem:[#allocation8 + $0x2ec] sm:$0xf0] }
 0x207   : > { %v8728_v63 = vld [vmem:[#allocation8 + $0xe0c] sm:$0xf]  ;;  %4456 = vmatpush.bf16.msra.mxu1 %v6406_v55  ;;  %v7458_v14 = vor.u32 %v8664_v61, %v7455_v62  ;;  %4436 = vmatpush.bf16.msrb.mxu3 %v7746_v3  ;;  %v6277_v55 = vld [vmem:[#allocation8 + $0x2d0] sm:$0xf]  ;;  %v4193_v3 = vadd.f32 %v4192_v54, %v4180_v53  ;;  %v4205_v61 = vpop.f32.mrf.mxu1  ;;  %v6022_v62 = vor.u32 %v8309_v52, %v6021_v51 }
 0x208   : > { %v7711_v2 = vld [vmem:[#allocation8 + $0xe28] sm:$0xf0]  ;;  %v5989_v4 = vld [vmem:[#allocation8 + $0x90] sm:$0xf] }
 0x209   : > { %v7714_v18 = vor.u32 %v8728_v63, %v7711_v2  ;;  %4444 = vmatpush.bf16.msra.mxu0 %v6118_v8  ;;  %4424 = vmatpush.bf16.msrb.mxu2 %v7458_v14  ;;  %v6821_v63 = vld [vmem:[#allocation8 + $0x710] sm:$0xf]  ;;  %v6278_v2 = vor.u32 %v8373_v56, %v6277_v55  ;;  %v4206_v6 = vadd.f32 %v4205_v61, %v4193_v3 }
 0x20a   : > { %v8301_v5 = vld [vmem:[#allocation8 + $0xac] sm:$0xf0]  ;;  %v6566_v8 = vor.u32 %v8445_v60, %v6565_v58  ;;  %v6822_v14 = vor.u32 %v8509_v0, %v6821_v63 }
 0x20b   : > { %4457 = vmatpush.bf16.msra.mxu1 %v6374_v13  ;;  %4437 = vmatpush.bf16.msrb.mxu3 %v7714_v18  ;;  %v6245_v11 = vld [vmem:[#allocation8 + $0x290] sm:$0xf]  ;;  %v4168_v13 = vpop.f32.mrf.mxu2  ;;  %v4181_v17 = vpop.f32.mrf.mxu3  ;;  %v5990_v18 = vor.u32 %v8301_v5, %v5989_v4 }
 0x20c   : > { %4425 = vmatmul.bf16.vlgmr.msrb.gmra.mxu2 %v9516_v7  ;;  %v8365_v12 = vld [vmem:[#allocation8 + $0x2ac] sm:$0xf0]  ;;  %v4194_v27 = vpop.f32.mrf.mxu0 }
 0x20d   : > { %4469 = vmatpush.bf16.msra.mxu2 %v6662_v19  ;;  %4445 = vmatpush.bf16.msra.mxu0 %v6086_v26  ;;  %v6533_v15 = vld [vmem:[#allocation8 + $0x4d0] sm:$0xf]  ;;  %v6246_v21 = vor.u32 %v8365_v12, %v6245_v11 }
 0x20e   : > { %4438 = vmatmul.bf16.vlgmr.msrb.gmra.mxu3 %v9518_v9  ;;  %v8437_v16 = vld [vmem:[#allocation8 + $0x4ec] sm:$0xf0] }
 0x20f   : > { %4482 = vmatpush.bf16.msra.mxu3 %v6918_v23  ;;  %4458 = vmatpush.bf16.msra.mxu1 %v6342_v29  ;;  %v6789_v19 = vld [vmem:[#allocation8 + $0x6d0] sm:$0xf]  ;;  %v6534_v24 = vor.u32 %v8437_v16, %v6533_v15  ;;  %v4207_v31 = vpop.f32.mrf.mxu1 }
 0x210   : > { %v8501_v20 = vld [vmem:[#allocation8 + $0x6ec] sm:$0xf0] }
 0x211   : > { %4470 = vmatpush.bf16.msra.mxu2 %v6630_v32  ;;  %4446 = vmatpush.bf16.msra.mxu0 %v6054_v46  ;;  %v5957_v22 = vld [vmem:[#allocation8 + $0x50] sm:$0xf]  ;;  %v6790_v28 = vor.u32 %v8501_v20, %v6789_v19 }
 0x212   : > { %v8293_v23 = vld [vmem:[#allocation8 + $0x6c] sm:$0xf0] }
 0x213   : > { %4483 = vmatpush.bf16.msra.mxu3 %v6886_v42  ;;  %4459 = vmatpush.bf16.msra.mxu1 %v6310_v50  ;;  %v6213_v25 = vld [vmem:[#allocation8 + $0x250] sm:$0xf]  ;;  %v5958_v32 = vor.u32 %v8293_v23, %v5957_v22  ;;  %v4231_v55 = vpop.f32.mrf.mxu3 }
 0x214   : > { %v8357_v26 = vld [vmem:[#allocation8 + $0x26c] sm:$0xf0] }
 0x215   : > { %4471 = vmatpush.bf16.msra.mxu2 %v6598_v33  ;;  %4447 = vmatpush.bf16.msra.mxu0 %v6022_v62  ;;  %v6501_v29 = vld [vmem:[#allocation8 + $0x490] sm:$0xf]  ;;  %v6214_v42 = vor.u32 %v8357_v26, %v6213_v25  ;;  %v4218_v33 = vpop.f32.mrf.mxu2 }
 0x216   : > { %v8429_v30 = vld [vmem:[#allocation8 + $0x4ac] sm:$0xf0]  ;;  %v4219_v58 = vadd.f32 %v4218_v33, %v4206_v6 }
 0x217   : > { %4484 = vmatpush.bf16.msra.mxu3 %v6854_v57  ;;  %4460 = vmatpush.bf16.msra.mxu1 %v6278_v2  ;;  %v6757_v36 = vld [vmem:[#allocation8 + $0x690] sm:$0xf]  ;;  %v6502_v45 = vor.u32 %v8429_v30, %v6501_v29 }
 0x218   : > { %v8493_v37 = vld [vmem:[#allocation8 + $0x6ac] sm:$0xf0]  ;;  %v9555_v5 = vadd.f32 %v4231_v55, %v4219_v58 }
 0x219   : > { %4472 = vmatpush.bf16.msra.mxu2 %v6566_v8  ;;  %4448 = vmatpush.bf16.msra.mxu0 %v5990_v18  ;;  %v5925_v38 = vld [vmem:[#allocation8 + $0x10] sm:$0xf]  ;;  %v6758_v50 = vor.u32 %v8493_v37, %v6757_v36 }
 0x21a   : > { %v8285_v48 = vld [vmem:[#allocation8 + $0x2c] sm:$0xf0] }
 0x21b   : > { %4485 = vmatpush.bf16.msra.mxu3 %v6822_v14  ;;  %4461 = vmatpush.bf16.msra.mxu1 %v6246_v21  ;;  %v6181_v43 = vld [vmem:[#allocation8 + $0x210] sm:$0xf]  ;;  %v5926_v56 = vor.u32 %v8285_v48, %v5925_v38 }
 0x21c   : > { %v8349_v44 = vld [vmem:[#allocation8 + $0x22c] sm:$0xf0] }
 0x21d   : > { %4473 = vmatpush.bf16.msra.mxu2 %v6534_v24  ;;  %v7173_v46 = vld [vmem:[#allocation8 + $0x9d0] sm:$0xf]  ;;  %4449 = vmatpush.bf16.msra.mxu0 %v5958_v32  ;;  %v6182_v60 = vor.u32 %v8349_v44, %v6181_v43  ;;  %v4220_v27 = vpop.f32.mrf.mxu2 }
 0x21e   : > { %v8597_v47 = vld [vmem:[#allocation8 + $0x9ec] sm:$0xf0] }
 0x21f   : > { %v7429_v49 = vld [vmem:[#allocation8 + $0xbd0] sm:$0xf]  ;;  %4486 = vmatpush.bf16.msra.mxu3 %v6790_v28  ;;  %4462 = vmatpush.bf16.msra.mxu1 %v6214_v42  ;;  %v7174_v3 = vor.u32 %v8597_v47, %v7173_v46  ;;  %v4233_v28 = vpop.f32.mrf.mxu3 }
 0x220   : > { %v8661_v51 = vld [vmem:[#allocation8 + $0xbec] sm:$0xf0] }
 0x221   : > { %v6469_v52 = vld [vmem:[#allocation8 + $0x450] sm:$0xf]  ;;  %4474 = vmatpush.bf16.msra.mxu2 %v6502_v45  ;;  %v7430_v62 = vor.u32 %v8661_v51, %v7429_v49  ;;  %4450 = vmatpush.bf16.msra.mxu0 %v5926_v56 }
 0x222   : > { %v8421_v53 = vld [vmem:[#allocation8 + $0x46c] sm:$0xf0] }
 0x223   : > { %v6725_v54 = vld [vmem:[#allocation8 + $0x650] sm:$0xf]  ;;  %v6470_v63 = vor.u32 %v8421_v53, %v6469_v52  ;;  %4487 = vmatpush.bf16.msra.mxu3 %v6758_v50  ;;  %4463 = vmatpush.bf16.msra.mxu1 %v6182_v60  ;;  %v1453_v50 = vperm.slane %v9534_v10, 2  ;;  %v4244_v60 = vpop.f32.mrf.mxu0  ;;  %v4257_v10 = vpop.f32.mrf.mxu1 }
 0x224   : > { %v8485_v57 = vld [vmem:[#allocation8 + $0x66c] sm:$0xf0]  ;;  %4451 = vmatmul.bf16.vlgmr.msra.gmra.mxu0 %v9494_v34 }
 0x225   : > { %v7141_v61 = vld [vmem:[#allocation8 + $0x990] sm:$0xf]  ;;  %v6726_v8 = vor.u32 %v8485_v57, %v6725_v54  ;;  %4495 = vmatpush.bf16.msrb.mxu0 %v7174_v3  ;;  %4475 = vmatpush.bf16.msra.mxu2 %v6470_v63  ;;  %v4245_v63 = vadd.f32 %v4244_v60, %v1453_v50  ;;  %v8401_v50 = vld [vmem:[#allocation8 + $0x3d4] sm:$0xf] }
 0x226   : > { %v8589_v0 = vld [vmem:[#allocation8 + $0x9ac] sm:$0xf0]  ;;  %4464 = vmatmul.bf16.vlgmr.msra.gmra.mxu1 %v9496_v39 }
 0x227   : > { %v7397_v2 = vld [vmem:[#allocation8 + $0xb90] sm:$0xf]  ;;  %v7142_v16 = vor.u32 %v8589_v0, %v7141_v61  ;;  %4508 = vmatpush.bf16.msrb.mxu1 %v7430_v62  ;;  %4488 = vmatpush.bf16.msra.mxu3 %v6726_v8 }
 0x228   : > { %v8653_v4 = vld [vmem:[#allocation8 + $0xbac] sm:$0xf0] }
 0x229   : > { %v6437_v11 = vld [vmem:[#allocation8 + $0x410] sm:$0xf]  ;;  %v7398_v19 = vor.u32 %v8653_v4, %v7397_v2  ;;  %4496 = vmatpush.bf16.msrb.mxu0 %v7142_v16 }
 0x22a   : > { %v8413_v12 = vld [vmem:[#allocation8 + $0x42c] sm:$0xf0] }
 0x22b   : > { %v6693_v13 = vld [vmem:[#allocation8 + $0x610] sm:$0xf]  ;;  %v6438_v20 = vor.u32 %v8413_v12, %v6437_v11  ;;  %4509 = vmatpush.bf16.msrb.mxu1 %v7398_v19  ;;  %v4246_v28 = vpop.f32.mrf.mxu0 }
 0x22c   : > { %v8477_v14 = vld [vmem:[#allocation8 + $0x62c] sm:$0xf0]  ;;  %v6343_v28 = vld [vmem:[#allocation8 + $0x370] sm:$0xf0] }
 0x22d   : > { %v7685_v6 = vld [vmem:[#allocation8 + $0xdd0] sm:$0xf]  ;;  %v6694_v23 = vor.u32 %v8477_v14, %v6693_v13  ;;  %4476 = vmatpush.bf16.msra.mxu2 %v6438_v20  ;;  %v4258_v13 = vadd.f32 %v4257_v10, %v4245_v63 }
 0x22e   : > { %v8725_v15 = vld [vmem:[#allocation8 + $0xdec] sm:$0xf0] }
 0x22f   : > { %v7941_v17 = vld [vmem:[#allocation8 + $0xfd0] sm:$0xf]  ;;  %v7686_v24 = vor.u32 %v8725_v15, %v7685_v6  ;;  %4489 = vmatpush.bf16.msra.mxu3 %v6694_v23 }
 0x230   : > { %v8789_v18 = vld [vmem:[#allocation8 + $0xfec] sm:$0xf0]  ;;  %4477 = vmatmul.bf16.vlgmr.msra.gmra.mxu2 %v9500_v59 }
 0x231   : > { %v7109_v21 = vld [vmem:[#allocation8 + $0x950] sm:$0xf]  ;;  %v7942_v29 = vor.u32 %v8789_v18, %v7941_v17  ;;  %4521 = vmatpush.bf16.msrb.mxu2 %v7686_v24 }
 0x232   : > { %v8581_v22 = vld [vmem:[#allocation8 + $0x96c] sm:$0xf0]  ;;  %4490 = vmatmul.bf16.vlgmr.msra.gmra.mxu3 %v9502_v1 }
 0x233   : > { %v7365_v25 = vld [vmem:[#allocation8 + $0xb50] sm:$0xf]  ;;  %v7110_v32 = vor.u32 %v8581_v22, %v7109_v21  ;;  %4534 = vmatpush.bf16.msrb.mxu3 %v7942_v29 }
 0x234   : > { %v8645_v26 = vld [vmem:[#allocation8 + $0xb6c] sm:$0xf0] }
 0x235   : > { %v7653_v30 = vld [vmem:[#allocation8 + $0xd90] sm:$0xf]  ;;  %v7366_v38 = vor.u32 %v8645_v26, %v7365_v25  ;;  %4497 = vmatpush.bf16.msrb.mxu0 %v7110_v32  ;;  %v4259_v32 = vpop.f32.mrf.mxu1 }
 0x236   : > { %v8717_v31 = vld [vmem:[#allocation8 + $0xdac] sm:$0xf0]  ;;  %v6631_v32 = vld [vmem:[#allocation8 + $0x5b0] sm:$0xf0] }
 0x237   : > { %v7909_v36 = vld [vmem:[#allocation8 + $0xf90] sm:$0xf]  ;;  %v7654_v43 = vor.u32 %v8717_v31, %v7653_v30  ;;  %4510 = vmatpush.bf16.msrb.mxu1 %v7366_v38 }
 0x238   : > { %v8781_v37 = vld [vmem:[#allocation8 + $0xfac] sm:$0xf0] }
 0x239   : > { %v7077_v42 = vld [vmem:[#allocation8 + $0x910] sm:$0xf]  ;;  %v7910_v46 = vor.u32 %v8781_v37, %v7909_v36  ;;  %4522 = vmatpush.bf16.msrb.mxu2 %v7654_v43 }
 0x23a   : > { %v8573_v48 = vld [vmem:[#allocation8 + $0x92c] sm:$0xf0] }
 0x23b   : > { %v7333_v44 = vld [vmem:[#allocation8 + $0xb10] sm:$0xf]  ;;  %v7078_v51 = vor.u32 %v8573_v48, %v7077_v42  ;;  %4535 = vmatpush.bf16.msrb.mxu3 %v7910_v46 }
 0x23c   : > { %v8637_v45 = vld [vmem:[#allocation8 + $0xb2c] sm:$0xf0] }
 0x23d   : > { %v7621_v47 = vld [vmem:[#allocation8 + $0xd50] sm:$0xf]  ;;  %v7334_v33 = vor.u32 %v8637_v45, %v7333_v44  ;;  %4498 = vmatpush.bf16.msrb.mxu0 %v7078_v51  ;;  %v4270_v51 = vpop.f32.mrf.mxu2 }
 0x23e   : > { %v8709_v49 = vld [vmem:[#allocation8 + $0xd6c] sm:$0xf0] }
 0x23f   : > { %v7877_v52 = vld [vmem:[#allocation8 + $0xf50] sm:$0xf]  ;;  %v7622_v54 = vor.u32 %v8709_v49, %v7621_v47  ;;  %4511 = vmatpush.bf16.msrb.mxu1 %v7334_v33  ;;  %v8337_v47 = vld [vmem:[#allocation8 + $0x1d4] sm:$0xf] }
 0x240   : > { %v8773_v53 = vld [vmem:[#allocation8 + $0xf6c] sm:$0xf0]  ;;  %v6151_v49 = vld [vmem:[#allocation8 + $0x1f0] sm:$0xf0] }
 0x241   : > { %v7045_v55 = vld [vmem:[#allocation8 + $0x8d0] sm:$0xf]  ;;  %v7878_v3 = vor.u32 %v8773_v53, %v7877_v52  ;;  %4523 = vmatpush.bf16.msrb.mxu2 %v7622_v54  ;;  %v6407_v53 = vld [vmem:[#allocation8 + $0x3f0] sm:$0xf0]  ;;  %v4283_v54 = vpop.f32.mrf.mxu3 }
 0x242   : > { %v8565_v56 = vld [vmem:[#allocation8 + $0x8ec] sm:$0xf0]  ;;  %v6410_v10 = vor.u32 %v8401_v50, %v6407_v53  ;;  %v6599_v50 = vld [vmem:[#allocation8 + $0x570] sm:$0xf0] }
 0x243   : > { %v7301_v57 = vld [vmem:[#allocation8 + $0xad0] sm:$0xf]  ;;  %v7046_v0 = vor.u32 %v8565_v56, %v7045_v55  ;;  %4536 = vmatpush.bf16.msrb.mxu3 %v7878_v3  ;;  %v4271_v56 = vadd.f32 %v4270_v51, %v4258_v13  ;;  %v6855_v53 = vld [vmem:[#allocation8 + $0x770] sm:$0xf0] }
 0x244   : > { %v8629_v58 = vld [vmem:[#allocation8 + $0xaec] sm:$0xf0] }
 0x245   : > { %v7589_v61 = vld [vmem:[#allocation8 + $0xd10] sm:$0xf]  ;;  %v7302_v8 = vor.u32 %v8629_v58, %v7301_v57  ;;  %4499 = vmatpush.bf16.msrb.mxu0 %v7046_v0  ;;  %v9562_v63 = vadd.f32 %v4283_v54, %v4271_v56  ;;  %v6023_v56 = vld [vmem:[#allocation8 + $0xf0] sm:$0xf0] }
 0x246   : > { %v8701_v62 = vld [vmem:[#allocation8 + $0xd2c] sm:$0xf0] }
 0x247   : > { %v7845_v2 = vld [vmem:[#allocation8 + $0xf10] sm:$0xf]  ;;  %v7590_v14 = vor.u32 %v8701_v62, %v7589_v61  ;;  %4512 = vmatpush.bf16.msrb.mxu1 %v7302_v8  ;;  %v6154_v61 = vor.u32 %v8337_v47, %v6151_v49  ;;  %v8329_v62 = vld [vmem:[#allocation8 + $0x194] sm:$0xf] }
 0x248   : > { %v8765_v4 = vld [vmem:[#allocation8 + $0xf2c] sm:$0xf0]  ;;  %v6375_v8 = vld [vmem:[#allocation8 + $0x3b0] sm:$0xf0] }
 0x249   : > { %v7013_v11 = vld [vmem:[#allocation8 + $0x890] sm:$0xf]  ;;  %v7846_v16 = vor.u32 %v8765_v4, %v7845_v2  ;;  %4524 = vmatpush.bf16.msrb.mxu2 %v7590_v14  ;;  %v6119_v2 = vld [vmem:[#allocation8 + $0x1b0] sm:$0xf0] }
 0x24a   : > { %v8557_v12 = vld [vmem:[#allocation8 + $0x8ac] sm:$0xf0]  ;;  %v8393_v4 = vld [vmem:[#allocation8 + $0x394] sm:$0xf] }
 0x24b   : > { %v7269_v6 = vld [vmem:[#allocation8 + $0xa90] sm:$0xf]  ;;  %v7014_v19 = vor.u32 %v8557_v12, %v7013_v11  ;;  %4537 = vmatpush.bf16.msrb.mxu3 %v7846_v16  ;;  %v6663_v16 = vld [vmem:[#allocation8 + $0x5f0] sm:$0xf0] }
 0x24c   : > { %v8621_v15 = vld [vmem:[#allocation8 + $0xaac] sm:$0xf0]  ;;  %v8449_v49 = vld [vmem:[#allocation8 + $0x554] sm:$0xf] }
 0x24d   : > { %v7557_v17 = vld [vmem:[#allocation8 + $0xcd0] sm:$0xf]  ;;  %v7270_v22 = vor.u32 %v8621_v15, %v7269_v6  ;;  %4500 = vmatpush.bf16.msrb.mxu0 %v7014_v19  ;;  %v8465_v15 = vld [vmem:[#allocation8 + $0x5d4] sm:$0xf]  ;;  %v6602_v54 = vor.u32 %v8449_v49, %v6599_v50 }
 0x24e   : > { %v8693_v18 = vld [vmem:[#allocation8 + $0xcec] sm:$0xf0]  ;;  %v6919_v19 = vld [vmem:[#allocation8 + $0x7f0] sm:$0xf0] }
 0x24f   : > { %v7813_v20 = vld [vmem:[#allocation8 + $0xed0] sm:$0xf]  ;;  %v7558_v25 = vor.u32 %v8693_v18, %v7557_v17  ;;  %4513 = vmatpush.bf16.msrb.mxu1 %v7270_v22  ;;  %v6122_v17 = vor.u32 %v8329_v62, %v6119_v2  ;;  %v8529_v18 = vld [vmem:[#allocation8 + $0x7d4] sm:$0xf] }
 0x250   : > { %v8757_v21 = vld [vmem:[#allocation8 + $0xeec] sm:$0xf0]  ;;  %v8321_v22 = vld [vmem:[#allocation8 + $0x154] sm:$0xf] }
 0x251   : > { %v6981_v23 = vld [vmem:[#allocation8 + $0x850] sm:$0xf]  ;;  %v7814_v29 = vor.u32 %v8757_v21, %v7813_v20  ;;  %4525 = vmatpush.bf16.msrb.mxu2 %v7558_v25  ;;  %v6378_v20 = vor.u32 %v8393_v4, %v6375_v8  ;;  %v6567_v62 = vld [vmem:[#allocation8 + $0x530] sm:$0xf0] }
 0x252   : > { %v8549_v24 = vld [vmem:[#allocation8 + $0x86c] sm:$0xf0]  ;;  %v8505_v4 = vld [vmem:[#allocation8 + $0x714] sm:$0xf] }
 0x253   : > { %v7237_v26 = vld [vmem:[#allocation8 + $0xa50] sm:$0xf]  ;;  %v6982_v36 = vor.u32 %v8549_v24, %v6981_v23  ;;  %4538 = vmatpush.bf16.msrb.mxu3 %v7814_v29  ;;  %v6087_v23 = vld [vmem:[#allocation8 + $0x170] sm:$0xf0]  ;;  %v4272_v24 = vpop.f32.mrf.mxu2  ;;  %v4285_v29 = vpop.f32.mrf.mxu3 }
 0x254   : > { %v8613_v27 = vld [vmem:[#allocation8 + $0xa6c] sm:$0xf0]  ;;  %v6823_v8 = vld [vmem:[#allocation8 + $0x730] sm:$0xf0] }
 0x255   : > { %v7525_v30 = vld [vmem:[#allocation8 + $0xc90] sm:$0xf]  ;;  %v7238_v48 = vor.u32 %v8613_v27, %v7237_v26  ;;  %4501 = vmatpush.bf16.msrb.mxu0 %v6982_v36  ;;  %v6666_v26 = vor.u32 %v8465_v15, %v6663_v16  ;;  %v8385_v27 = vld [vmem:[#allocation8 + $0x354] sm:$0xf]  ;;  %v6090_v36 = vor.u32 %v8321_v22, %v6087_v23 }
 0x256   : > { %v8685_v31 = vld [vmem:[#allocation8 + $0xcac] sm:$0xf0]  ;;  %v8361_v15 = vld [vmem:[#allocation8 + $0x294] sm:$0xf] }
 0x257   : > { %v7781_v37 = vld [vmem:[#allocation8 + $0xe90] sm:$0xf]  ;;  %v7526_v46 = vor.u32 %v8685_v31, %v7525_v30  ;;  %4514 = vmatpush.bf16.msrb.mxu1 %v7238_v48  ;;  %v6922_v30 = vor.u32 %v8529_v18, %v6919_v19  ;;  %v8457_v31 = vld [vmem:[#allocation8 + $0x594] sm:$0xf] }
 0x258   : > { %v8749_v38 = vld [vmem:[#allocation8 + $0xeac] sm:$0xf0]  ;;  %v8313_v48 = vld [vmem:[#allocation8 + $0x114] sm:$0xf] }
 0x259   : > { %v6949_v42 = vld [vmem:[#allocation8 + $0x810] sm:$0xf]  ;;  %v7782_v52 = vor.u32 %v8749_v38, %v7781_v37  ;;  %4526 = vmatpush.bf16.msrb.mxu2 %v7526_v46  ;;  %v8521_v37 = vld [vmem:[#allocation8 + $0x794] sm:$0xf] }
 0x25a   : > { %v8541_v43 = vld [vmem:[#allocation8 + $0x82c] sm:$0xf0]  ;;  %v6887_v38 = vld [vmem:[#allocation8 + $0x7b0] sm:$0xf0] }
 0x25b   : > { %v7205_v44 = vld [vmem:[#allocation8 + $0xa10] sm:$0xf]  ;;  %v6950_v57 = vor.u32 %v8541_v43, %v6949_v42  ;;  %4539 = vmatpush.bf16.msrb.mxu3 %v7782_v52  ;;  %v6346_v42 = vor.u32 %v8385_v27, %v6343_v28  ;;  %v6055_v43 = vld [vmem:[#allocation8 + $0x130] sm:$0xf0]  ;;  %v6890_v47 = vor.u32 %v8521_v37, %v6887_v38 }
 0x25c   : > { %v8605_v45 = vld [vmem:[#allocation8 + $0xa2c] sm:$0xf0]  ;;  %v6311_v46 = vld [vmem:[#allocation8 + $0x330] sm:$0xf0]  ;;  %v6058_v51 = vor.u32 %v8313_v48, %v6055_v43 }
 0x25d   : > { %v7493_v33 = vld [vmem:[#allocation8 + $0xc50] sm:$0xf]  ;;  %v7206_v3 = vor.u32 %v8605_v45, %v7205_v44  ;;  %4502 = vmatpush.bf16.msrb.mxu0 %v6950_v57  ;;  %v6634_v44 = vor.u32 %v8457_v31, %v6631_v32  ;;  %v8377_v45 = vld [vmem:[#allocation8 + $0x314] sm:$0xf] }
 0x25e   : > { %v8677_v55 = vld [vmem:[#allocation8 + $0xc6c] sm:$0xf0]  ;;  %v8513_v52 = vld [vmem:[#allocation8 + $0x754] sm:$0xf] }
 0x25f   : > { %v7749_v58 = vld [vmem:[#allocation8 + $0xe50] sm:$0xf]  ;;  %v7494_v0 = vor.u32 %v8677_v55, %v7493_v33  ;;  %4515 = vmatpush.bf16.msrb.mxu1 %v7206_v3  ;;  %v6314_v33 = vor.u32 %v8377_v45, %v6311_v46  ;;  %v8305_v55 = vld [vmem:[#allocation8 + $0xd4] sm:$0xf]  ;;  %v6858_v3 = vor.u32 %v8513_v52, %v6855_v53 }
 0x260   : > { %v8741_v60 = vld [vmem:[#allocation8 + $0xe6c] sm:$0xf0]  ;;  %4503 = vmatmul.bf16.vlgmr.msrb.gmra.mxu0 %v9510_v35  ;;  %v8369_v57 = vld [vmem:[#allocation8 + $0x2d4] sm:$0xf]  ;;  %v6026_v2 = vor.u32 %v8305_v55, %v6023_v56 }
 0x261   : > { %v7750_v11 = vor.u32 %v8741_v60, %v7749_v58  ;;  %v7461_v12 = vld [vmem:[#allocation8 + $0xc10] sm:$0xf]  ;;  %4547 = vmatpush.bf16.msra.mxu0 %v6154_v61  ;;  %4527 = vmatpush.bf16.msrb.mxu2 %v7494_v0  ;;  %v6279_v58 = vld [vmem:[#allocation8 + $0x2f0] sm:$0xf0]  ;;  %v4296_v60 = vpop.f32.mrf.mxu0  ;;  %v4309_v0 = vpop.f32.mrf.mxu1 }
 0x262   : > { %v8669_v13 = vld [vmem:[#allocation8 + $0xc2c] sm:$0xf0]  ;;  %4516 = vmatmul.bf16.vlgmr.msrb.gmra.mxu1 %v9512_v41  ;;  %v8441_v61 = vld [vmem:[#allocation8 + $0x514] sm:$0xf] }
 0x263   : > { %v7717_v14 = vld [vmem:[#allocation8 + $0xe10] sm:$0xf]  ;;  %4560 = vmatpush.bf16.msra.mxu1 %v6410_v10  ;;  %v7462_v21 = vor.u32 %v8669_v13, %v7461_v12  ;;  %4540 = vmatpush.bf16.msrb.mxu3 %v7750_v11  ;;  %v4297_v10 = vadd.f32 %v4296_v60, %v9562_v63  ;;  %v6282_v11 = vor.u32 %v8369_v57, %v6279_v58  ;;  %v8297_v12 = vld [vmem:[#allocation8 + $0x94] sm:$0xf] }
 0x264   : > { %v8733_v6 = vld [vmem:[#allocation8 + $0xe2c] sm:$0xf0]  ;;  %v5991_v13 = vld [vmem:[#allocation8 + $0xb0] sm:$0xf0] }
 0x265   : > { %v7718_v25 = vor.u32 %v8733_v6, %v7717_v14  ;;  %4548 = vmatpush.bf16.msra.mxu0 %v6122_v17  ;;  %4528 = vmatpush.bf16.msrb.mxu2 %v7462_v21  ;;  %v4310_v14 = vadd.f32 %v4309_v0, %v4297_v10  ;;  %v6570_v6 = vor.u32 %v8441_v61, %v6567_v62  ;;  %v6247_v16 = vld [vmem:[#allocation8 + $0x2b0] sm:$0xf0] }
 0x266   : > { %v6826_v17 = vor.u32 %v8505_v4, %v6823_v8  ;;  %v8433_v18 = vld [vmem:[#allocation8 + $0x4d4] sm:$0xf]  ;;  %v5994_v63 = vor.u32 %v8297_v12, %v5991_v13  ;;  %v6250_v22 = vor.u32 %v8361_v15, %v6247_v16 }
 0x267   : > { %4561 = vmatpush.bf16.msra.mxu1 %v6378_v20  ;;  %4541 = vmatpush.bf16.msrb.mxu3 %v7718_v25  ;;  %v6535_v19 = vld [vmem:[#allocation8 + $0x4f0] sm:$0xf0] }
 0x268   : > { %4529 = vmatmul.bf16.vlgmr.msrb.gmra.mxu2 %v9516_v7  ;;  %v8497_v20 = vld [vmem:[#allocation8 + $0x6d4] sm:$0xf]  ;;  %v6538_v25 = vor.u32 %v8433_v18, %v6535_v19 }
 0x269   : > { %4573 = vmatpush.bf16.msra.mxu2 %v6666_v26  ;;  %4549 = vmatpush.bf16.msra.mxu0 %v6090_v36  ;;  %v6791_v21 = vld [vmem:[#allocation8 + $0x6f0] sm:$0xf0]  ;;  %v4298_v28 = vpop.f32.mrf.mxu0  ;;  %v4311_v32 = vpop.f32.mrf.mxu1 }
 0x26a   : > { %4542 = vmatmul.bf16.vlgmr.msrb.gmra.mxu3 %v9518_v9  ;;  %v8289_v23 = vld [vmem:[#allocation8 + $0x54] sm:$0xf]  ;;  %v6794_v29 = vor.u32 %v8497_v20, %v6791_v21 }
 0x26b   : > { %4586 = vmatpush.bf16.msra.mxu3 %v6922_v30  ;;  %4562 = vmatpush.bf16.msra.mxu1 %v6346_v42  ;;  %v5959_v24 = vld [vmem:[#allocation8 + $0x70] sm:$0xf0] }
 0x26c   : > { %v8353_v26 = vld [vmem:[#allocation8 + $0x254] sm:$0xf]  ;;  %v5962_v36 = vor.u32 %v8289_v23, %v5959_v24 }
 0x26d   : > { %4574 = vmatpush.bf16.msra.mxu2 %v6634_v44  ;;  %4550 = vmatpush.bf16.msra.mxu0 %v6058_v51  ;;  %v6215_v27 = vld [vmem:[#allocation8 + $0x270] sm:$0xf0]  ;;  %v4322_v51 = vpop.f32.mrf.mxu2 }
 0x26e   : > { %v8425_v30 = vld [vmem:[#allocation8 + $0x494] sm:$0xf]  ;;  %v6218_v48 = vor.u32 %v8353_v26, %v6215_v27  ;;  %v4323_v56 = vadd.f32 %v4322_v51, %v4310_v14  ;;  %v9574_v51 = vld [vmem:[#allocation10] sm:$0xff] }
 0x26f   : > { %4587 = vmatpush.bf16.msra.mxu3 %v6890_v47  ;;  %4563 = vmatpush.bf16.msra.mxu1 %v6314_v33  ;;  %v6503_v31 = vld [vmem:[#allocation8 + $0x4b0] sm:$0xf0] }
 0x270   : > { %v8489_v37 = vld [vmem:[#allocation8 + $0x694] sm:$0xf]  ;;  %v6506_v46 = vor.u32 %v8425_v30, %v6503_v31 }
 0x271   : > { %4575 = vmatpush.bf16.msra.mxu2 %v6602_v54  ;;  %4551 = vmatpush.bf16.msra.mxu0 %v6026_v2  ;;  %v6759_v38 = vld [vmem:[#allocation8 + $0x6b0] sm:$0xf0]  ;;  %v4335_v54 = vpop.f32.mrf.mxu3 }
 0x272   : > { %v8281_v42 = vld [vmem:[#allocation8 + $0x14] sm:$0xf]  ;;  %v6762_v52 = vor.u32 %v8489_v37, %v6759_v38  ;;  %v9569_v10 = vadd.f32 %v4335_v54, %v4323_v56 }
 0x273   : > { %4588 = vmatpush.bf16.msra.mxu3 %v6858_v3  ;;  %4564 = vmatpush.bf16.msra.mxu1 %v6282_v11  ;;  %v5927_v43 = vld [vmem:[#allocation8 + $0x30] sm:$0xf0] }
 0x274   : > { %v8345_v44 = vld [vmem:[#allocation8 + $0x214] sm:$0xf]  ;;  %v5930_v57 = vor.u32 %v8281_v42, %v5927_v43 }
 0x275   : > { %4576 = vmatpush.bf16.msra.mxu2 %v6570_v6  ;;  %4552 = vmatpush.bf16.msra.mxu0 %v5994_v63  ;;  %v6183_v45 = vld [vmem:[#allocation8 + $0x230] sm:$0xf0]  ;;  %v4324_v24 = vpop.f32.mrf.mxu2 }
 0x276   : > { %v8593_v47 = vld [vmem:[#allocation8 + $0x9d4] sm:$0xf]  ;;  %v6186_v3 = vor.u32 %v8345_v44, %v6183_v45 }
 0x277   : > { %4589 = vmatpush.bf16.msra.mxu3 %v6826_v17  ;;  %4565 = vmatpush.bf16.msra.mxu1 %v6250_v22  ;;  %v7175_v49 = vld [vmem:[#allocation8 + $0x9f0] sm:$0xf0] }
 0x278   : > { %v8657_v50 = vld [vmem:[#allocation8 + $0xbd4] sm:$0xf]  ;;  %v7178_v61 = vor.u32 %v8593_v47, %v7175_v49 }
 0x279   : > { %4577 = vmatpush.bf16.msra.mxu2 %v6538_v25  ;;  %v7431_v53 = vld [vmem:[#allocation8 + $0xbf0] sm:$0xf0]  ;;  %4553 = vmatpush.bf16.msra.mxu0 %v5962_v36 }
 0x27a   : > { %v8417_v33 = vld [vmem:[#allocation8 + $0x454] sm:$0xf]  ;;  %v7434_v0 = vor.u32 %v8657_v50, %v7431_v53 }
 0x27b   : > { %4590 = vmatpush.bf16.msra.mxu3 %v6794_v29  ;;  %v6471_v55 = vld [vmem:[#allocation8 + $0x470] sm:$0xf0]  ;;  %4566 = vmatpush.bf16.msra.mxu1 %v6218_v48  ;;  %v4337_v29 = vpop.f32.mrf.mxu3 }
 0x27c   : > { %v8481_v58 = vld [vmem:[#allocation8 + $0x654] sm:$0xf]  ;;  %v6474_v2 = vor.u32 %v8417_v33, %v6471_v55 }
 0x27d   : > { %v6727_v60 = vld [vmem:[#allocation8 + $0x670] sm:$0xf0]  ;;  %4578 = vmatpush.bf16.msra.mxu2 %v6506_v46  ;;  %4554 = vmatpush.bf16.msra.mxu0 %v5930_v57 }
 0x27e   : > { %v8585_v62 = vld [vmem:[#allocation8 + $0x994] sm:$0xf]  ;;  %v6730_v12 = vor.u32 %v8481_v58, %v6727_v60 }
 0x27f   : > { %v7143_v4 = vld [vmem:[#allocation8 + $0x9b0] sm:$0xf0]  ;;  %4591 = vmatpush.bf16.msra.mxu3 %v6762_v52  ;;  %4567 = vmatpush.bf16.msra.mxu1 %v6186_v3  ;;  %v1454_v52 = vperm.slane %v9574_v51, 3 }
 0x280   : > { %v8649_v8 = vld [vmem:[#allocation8 + $0xb94] sm:$0xf]  ;;  %v7146_v18 = vor.u32 %v8585_v62, %v7143_v4  ;;  %4555 = vmatmul.bf16.vlgmr.msra.gmra.mxu0 %v9494_v34 }
 0x281   : > { %v7399_v11 = vld [vmem:[#allocation8 + $0xbb0] sm:$0xf0]  ;;  %4599 = vmatpush.bf16.msrb.mxu0 %v7178_v61  ;;  %4579 = vmatpush.bf16.msra.mxu2 %v6474_v2  ;;  %v4348_v61 = vpop.f32.mrf.mxu0 }
 0x282   : > { %v8409_v13 = vld [vmem:[#allocation8 + $0x414] sm:$0xf]  ;;  %v7402_v20 = vor.u32 %v8649_v8, %v7399_v11  ;;  %4568 = vmatmul.bf16.vlgmr.msra.gmra.mxu1 %v9496_v39  ;;  %v4349_v4 = vadd.f32 %v4348_v61, %v1454_v52  ;;  %v4361_v8 = vpop.f32.mrf.mxu1  ;;  %v6157_v52 = vld [vmem:[#allocation8 + $0x1d8] sm:$0xf] }
 0x283   : > { %v6439_v14 = vld [vmem:[#allocation8 + $0x430] sm:$0xf0]  ;;  %4612 = vmatpush.bf16.msrb.mxu1 %v7434_v0  ;;  %4592 = vmatpush.bf16.msra.mxu3 %v6730_v12 }
 0x284   : > { %v8473_v6 = vld [vmem:[#allocation8 + $0x614] sm:$0xf]  ;;  %v6442_v21 = vor.u32 %v8409_v13, %v6439_v14 }
 0x285   : > { %v6695_v15 = vld [vmem:[#allocation8 + $0x630] sm:$0xf0]  ;;  %4600 = vmatpush.bf16.msrb.mxu0 %v7146_v18 }
 0x286   : > { %v8721_v16 = vld [vmem:[#allocation8 + $0xdd4] sm:$0xf]  ;;  %v6698_v25 = vor.u32 %v8473_v6, %v6695_v15  ;;  %4580 = vmatpush.bf16.msra.mxu2 %v6442_v21 }
 0x287   : > { %v7687_v17 = vld [vmem:[#allocation8 + $0xdf0] sm:$0xf0]  ;;  %4613 = vmatpush.bf16.msrb.mxu1 %v7402_v20 }
 0x288   : > { %v8785_v19 = vld [vmem:[#allocation8 + $0xfd4] sm:$0xf]  ;;  %v7690_v26 = vor.u32 %v8721_v16, %v7687_v17  ;;  %4593 = vmatpush.bf16.msra.mxu3 %v6698_v25  ;;  %v4362_v16 = vadd.f32 %v4361_v8, %v4349_v4  ;;  %v6125_v8 = vld [vmem:[#allocation8 + $0x198] sm:$0xf] }
 0x289   : > { %v7943_v63 = vld [vmem:[#allocation8 + $0xff0] sm:$0xf0]  ;;  %4581 = vmatmul.bf16.vlgmr.msra.gmra.mxu2 %v9500_v59 }
 0x28a   : > { %v8577_v22 = vld [vmem:[#allocation8 + $0x954] sm:$0xf]  ;;  %v7946_v30 = vor.u32 %v8785_v19, %v7943_v63  ;;  %4625 = vmatpush.bf16.msrb.mxu2 %v7690_v26 }
 0x28b   : > { %v7111_v23 = vld [vmem:[#allocation8 + $0x970] sm:$0xf0]  ;;  %4594 = vmatmul.bf16.vlgmr.msra.gmra.mxu3 %v9502_v1 }
 0x28c   : > { %v8641_v27 = vld [vmem:[#allocation8 + $0xb54] sm:$0xf]  ;;  %v7114_v36 = vor.u32 %v8577_v22, %v7111_v23  ;;  %4638 = vmatpush.bf16.msrb.mxu3 %v7946_v30 }
 0x28d   : > { %v7367_v28 = vld [vmem:[#allocation8 + $0xb70] sm:$0xf0] }
 0x28e   : > { %v8713_v31 = vld [vmem:[#allocation8 + $0xd94] sm:$0xf]  ;;  %v7370_v42 = vor.u32 %v8641_v27, %v7367_v28  ;;  %4601 = vmatpush.bf16.msrb.mxu0 %v7114_v36 }
 0x28f   : > { %v7655_v32 = vld [vmem:[#allocation8 + $0xdb0] sm:$0xf0] }
 0x290   : > { %v8777_v37 = vld [vmem:[#allocation8 + $0xf94] sm:$0xf]  ;;  %v7658_v44 = vor.u32 %v8713_v31, %v7655_v32  ;;  %4614 = vmatpush.bf16.msrb.mxu1 %v7370_v42  ;;  %v4350_v31 = vpop.f32.mrf.mxu0 }
 0x291   : > { %v7911_v38 = vld [vmem:[#allocation8 + $0xfb0] sm:$0xf0] }
 0x292   : > { %v8569_v48 = vld [vmem:[#allocation8 + $0x914] sm:$0xf]  ;;  %v7914_v47 = vor.u32 %v8777_v37, %v7911_v38  ;;  %4626 = vmatpush.bf16.msrb.mxu2 %v7658_v44  ;;  %v4363_v38 = vpop.f32.mrf.mxu1 }
 0x293   : > { %v7079_v43 = vld [vmem:[#allocation8 + $0x930] sm:$0xf0] }
 0x294   : > { %v8633_v45 = vld [vmem:[#allocation8 + $0xb14] sm:$0xf]  ;;  %v7082_v53 = vor.u32 %v8569_v48, %v7079_v43  ;;  %4639 = vmatpush.bf16.msrb.mxu3 %v7914_v47 }
 0x295   : > { %v7335_v46 = vld [vmem:[#allocation8 + $0xb30] sm:$0xf0] }
 0x296   : > { %v8705_v49 = vld [vmem:[#allocation8 + $0xd54] sm:$0xf]  ;;  %v7338_v56 = vor.u32 %v8633_v45, %v7335_v46  ;;  %4602 = vmatpush.bf16.msrb.mxu0 %v7082_v53  ;;  %v8342_v53 = vld [vmem:[#allocation8 + $0x1f4] sm:$0xf0] }
 0x297   : > { %v7623_v50 = vld [vmem:[#allocation8 + $0xd70] sm:$0xf0]  ;;  %v6158_v4 = vor.u32 %v8342_v53, %v6157_v52  ;;  %v6317_v52 = vld [vmem:[#allocation8 + $0x318] sm:$0xf] }
 0x298   : > { %v8769_v33 = vld [vmem:[#allocation8 + $0xf54] sm:$0xf]  ;;  %v7626_v58 = vor.u32 %v8705_v49, %v7623_v50  ;;  %4615 = vmatpush.bf16.msrb.mxu1 %v7338_v56  ;;  %v8382_v53 = vld [vmem:[#allocation8 + $0x334] sm:$0xf0] }
 0x299   : > { %v7879_v55 = vld [vmem:[#allocation8 + $0xf70] sm:$0xf0] }
 0x29a   : > { %v8561_v54 = vld [vmem:[#allocation8 + $0x8d4] sm:$0xf]  ;;  %v7882_v62 = vor.u32 %v8769_v33, %v7879_v55  ;;  %4627 = vmatpush.bf16.msrb.mxu2 %v7626_v58  ;;  %v6413_v33 = vld [vmem:[#allocation8 + $0x3d8] sm:$0xf]  ;;  %v4374_v55 = vpop.f32.mrf.mxu2 }
 0x29b   : > { %v7047_v57 = vld [vmem:[#allocation8 + $0x8f0] sm:$0xf0] }
 0x29c   : > { %v8625_v60 = vld [vmem:[#allocation8 + $0xad4] sm:$0xf]  ;;  %v7050_v11 = vor.u32 %v8561_v54, %v7047_v57  ;;  %4640 = vmatpush.bf16.msrb.mxu3 %v7882_v62  ;;  %v8406_v54 = vld [vmem:[#allocation8 + $0x3f4] sm:$0xf0] }
 0x29d   : > { %v7303_v3 = vld [vmem:[#allocation8 + $0xaf0] sm:$0xf0] }
 0x29e   : > { %v8697_v0 = vld [vmem:[#allocation8 + $0xd14] sm:$0xf]  ;;  %v7306_v14 = vor.u32 %v8625_v60, %v7303_v3  ;;  %4603 = vmatpush.bf16.msrb.mxu0 %v7050_v11  ;;  %v4375_v60 = vadd.f32 %v4374_v55, %v4362_v16  ;;  %v4387_v3 = vpop.f32.mrf.mxu3  ;;  %v6605_v55 = vld [vmem:[#allocation8 + $0x558] sm:$0xf] }
 0x29f   : > { %v7591_v2 = vld [vmem:[#allocation8 + $0xd30] sm:$0xf0] }
 0x2a0   : > { %v8761_v12 = vld [vmem:[#allocation8 + $0xf14] sm:$0xf]  ;;  %v7594_v17 = vor.u32 %v8697_v0, %v7591_v2  ;;  %4616 = vmatpush.bf16.msrb.mxu1 %v7306_v14  ;;  %v9578_v11 = vadd.f32 %v4387_v3, %v4375_v60  ;;  %v8334_v14 = vld [vmem:[#allocation8 + $0x1b4] sm:$0xf0]  ;;  %v6318_v60 = vor.u32 %v8382_v53, %v6317_v52 }
 0x2a1   : > { %v7847_v13 = vld [vmem:[#allocation8 + $0xf30] sm:$0xf0]  ;;  %v6029_v3 = vld [vmem:[#allocation8 + $0xd8] sm:$0xf] }
 0x2a2   : > { %v8553_v6 = vld [vmem:[#allocation8 + $0x894] sm:$0xf]  ;;  %v7850_v63 = vor.u32 %v8761_v12, %v7847_v13  ;;  %4628 = vmatpush.bf16.msrb.mxu2 %v7594_v17  ;;  %v6414_v12 = vor.u32 %v8406_v54, %v6413_v33  ;;  %v8286_v52 = vld [vmem:[#allocation8 + $0x34] sm:$0xf0] }
 0x2a3   : > { %v7015_v15 = vld [vmem:[#allocation8 + $0x8b0] sm:$0xf0]  ;;  %v6189_v53 = vld [vmem:[#allocation8 + $0x218] sm:$0xf] }
 0x2a4   : > { %v8617_v18 = vld [vmem:[#allocation8 + $0xa94] sm:$0xf]  ;;  %v7018_v22 = vor.u32 %v8553_v6, %v7015_v15  ;;  %4641 = vmatpush.bf16.msrb.mxu3 %v7850_v63  ;;  %v6381_v6 = vld [vmem:[#allocation8 + $0x398] sm:$0xf] }
 0x2a5   : > { %v7271_v19 = vld [vmem:[#allocation8 + $0xab0] sm:$0xf0]  ;;  %v8398_v15 = vld [vmem:[#allocation8 + $0x3b4] sm:$0xf0] }
 0x2a6   : > { %v8689_v20 = vld [vmem:[#allocation8 + $0xcd4] sm:$0xf]  ;;  %v7274_v25 = vor.u32 %v8617_v18, %v7271_v19  ;;  %4604 = vmatpush.bf16.msrb.mxu0 %v7018_v22  ;;  %v6126_v22 = vor.u32 %v8334_v14, %v6125_v8 }
 0x2a7   : > { %v7559_v21 = vld [vmem:[#allocation8 + $0xcf0] sm:$0xf0] }
 0x2a8   : > { %v8753_v23 = vld [vmem:[#allocation8 + $0xed4] sm:$0xf]  ;;  %v7562_v28 = vor.u32 %v8689_v20, %v7559_v21  ;;  %4617 = vmatpush.bf16.msrb.mxu1 %v7274_v25  ;;  %v6669_v20 = vld [vmem:[#allocation8 + $0x5d8] sm:$0xf]  ;;  %v6382_v25 = vor.u32 %v8398_v15, %v6381_v6  ;;  %v4413_v6 = vpop.f32.mrf.mxu1 }
 0x2a9   : > { %v7815_v24 = vld [vmem:[#allocation8 + $0xef0] sm:$0xf0]  ;;  %v8470_v21 = vld [vmem:[#allocation8 + $0x5f4] sm:$0xf0] }
 0x2aa   : > { %v8545_v26 = vld [vmem:[#allocation8 + $0x854] sm:$0xf]  ;;  %v7818_v32 = vor.u32 %v8753_v23, %v7815_v24  ;;  %4629 = vmatpush.bf16.msrb.mxu2 %v7562_v28  ;;  %v6925_v23 = vld [vmem:[#allocation8 + $0x7d8] sm:$0xf]  ;;  %v6670_v31 = vor.u32 %v8470_v21, %v6669_v20 }
 0x2ab   : > { %v6983_v27 = vld [vmem:[#allocation8 + $0x870] sm:$0xf0]  ;;  %v8534_v24 = vld [vmem:[#allocation8 + $0x7f4] sm:$0xf0] }
 0x2ac   : > { %v8609_v29 = vld [vmem:[#allocation8 + $0xa54] sm:$0xf]  ;;  %v6986_v42 = vor.u32 %v8545_v26, %v6983_v27  ;;  %4642 = vmatpush.bf16.msrb.mxu3 %v7818_v32  ;;  %v6093_v27 = vld [vmem:[#allocation8 + $0x158] sm:$0xf]  ;;  %v6926_v38 = vor.u32 %v8534_v24, %v6925_v23 }
 0x2ad   : > { %v7239_v30 = vld [vmem:[#allocation8 + $0xa70] sm:$0xf0]  ;;  %v8326_v28 = vld [vmem:[#allocation8 + $0x174] sm:$0xf0] }
 0x2ae   : > { %v8681_v36 = vld [vmem:[#allocation8 + $0xc94] sm:$0xf]  ;;  %v7242_v45 = vor.u32 %v8609_v29, %v7239_v30  ;;  %4605 = vmatpush.bf16.msrb.mxu0 %v6986_v42  ;;  %v4376_v29 = vpop.f32.mrf.mxu2  ;;  %v6349_v32 = vld [vmem:[#allocation8 + $0x358] sm:$0xf] }
 0x2af   : > { %v7527_v37 = vld [vmem:[#allocation8 + $0xcb0] sm:$0xf0]  ;;  %v6637_v42 = vld [vmem:[#allocation8 + $0x598] sm:$0xf] }
 0x2b0   : > { %v8745_v48 = vld [vmem:[#allocation8 + $0xe94] sm:$0xf]  ;;  %v7530_v50 = vor.u32 %v8681_v36, %v7527_v37  ;;  %4618 = vmatpush.bf16.msrb.mxu1 %v7242_v45  ;;  %v8390_v36 = vld [vmem:[#allocation8 + $0x374] sm:$0xf0]  ;;  %v4389_v37 = vpop.f32.mrf.mxu3 }
 0x2b1   : > { %v7783_v43 = vld [vmem:[#allocation8 + $0xeb0] sm:$0xf0]  ;;  %v8526_v45 = vld [vmem:[#allocation8 + $0x7b4] sm:$0xf0] }
 0x2b2   : > { %v8537_v44 = vld [vmem:[#allocation8 + $0x814] sm:$0xf]  ;;  %v7786_v56 = vor.u32 %v8745_v48, %v7783_v43  ;;  %4630 = vmatpush.bf16.msrb.mxu2 %v7530_v50  ;;  %v8462_v48 = vld [vmem:[#allocation8 + $0x5b4] sm:$0xf0]  ;;  %v6094_v43 = vor.u32 %v8326_v28, %v6093_v27 }
 0x2b3   : > { %v6951_v46 = vld [vmem:[#allocation8 + $0x830] sm:$0xf0]  ;;  %v6638_v50 = vor.u32 %v8462_v48, %v6637_v42  ;;  %v8366_v23 = vld [vmem:[#allocation8 + $0x2b4] sm:$0xf0] }
 0x2b4   : > { %v8601_v47 = vld [vmem:[#allocation8 + $0xa14] sm:$0xf]  ;;  %v6954_v61 = vor.u32 %v8537_v44, %v6951_v46  ;;  %4643 = vmatpush.bf16.msrb.mxu3 %v7786_v56  ;;  %v6893_v44 = vld [vmem:[#allocation8 + $0x798] sm:$0xf]  ;;  %v6350_v46 = vor.u32 %v8390_v36, %v6349_v32 }
 0x2b5   : > { %v7207_v49 = vld [vmem:[#allocation8 + $0xa30] sm:$0xf0]  ;;  %v6894_v33 = vor.u32 %v8526_v45, %v6893_v44  ;;  %v8454_v56 = vld [vmem:[#allocation8 + $0x574] sm:$0xf0]  ;;  %v4415_v44 = vpop.f32.mrf.mxu1 }
 0x2b6   : > { %v8673_v57 = vld [vmem:[#allocation8 + $0xc54] sm:$0xf]  ;;  %v7210_v2 = vor.u32 %v8601_v47, %v7207_v49  ;;  %4606 = vmatpush.bf16.msrb.mxu0 %v6954_v61  ;;  %v6061_v47 = vld [vmem:[#allocation8 + $0x118] sm:$0xf] }
 0x2b7   : > { %v7495_v58 = vld [vmem:[#allocation8 + $0xc70] sm:$0xf0]  ;;  %v8318_v49 = vld [vmem:[#allocation8 + $0x134] sm:$0xf0] }
 0x2b8   : > { %v8737_v62 = vld [vmem:[#allocation8 + $0xe54] sm:$0xf]  ;;  %v7498_v13 = vor.u32 %v8673_v57, %v7495_v58  ;;  %4619 = vmatpush.bf16.msrb.mxu1 %v7210_v2  ;;  %v6062_v54 = vor.u32 %v8318_v49, %v6061_v47  ;;  %v6861_v57 = vld [vmem:[#allocation8 + $0x758] sm:$0xf] }
 0x2b9   : > { %v7751_v0 = vld [vmem:[#allocation8 + $0xe70] sm:$0xf0]  ;;  %4607 = vmatmul.bf16.vlgmr.msrb.gmra.mxu0 %v9510_v35  ;;  %v8518_v58 = vld [vmem:[#allocation8 + $0x774] sm:$0xf0] }
 0x2ba   : > { %v7754_v17 = vor.u32 %v8737_v62, %v7751_v0  ;;  %v8665_v16 = vld [vmem:[#allocation8 + $0xc14] sm:$0xf]  ;;  %4651 = vmatpush.bf16.msra.mxu0 %v6158_v4  ;;  %4631 = vmatpush.bf16.msrb.mxu2 %v7498_v13  ;;  %v8310_v61 = vld [vmem:[#allocation8 + $0xf4] sm:$0xf0]  ;;  %v6606_v62 = vor.u32 %v8454_v56, %v6605_v55  ;;  %v4400_v4 = vpop.f32.mrf.mxu0  ;;  %v6862_v8 = vor.u32 %v8518_v58, %v6861_v57  ;;  %v4426_v58 = vpop.f32.mrf.mxu2 }
 0x2bb   : > { %v7463_v18 = vld [vmem:[#allocation8 + $0xc30] sm:$0xf0]  ;;  %4620 = vmatmul.bf16.vlgmr.msrb.gmra.mxu1 %v9512_v41  ;;  %v6285_v0 = vld [vmem:[#allocation8 + $0x2d8] sm:$0xf]  ;;  %v4401_v14 = vadd.f32 %v4400_v4, %v9578_v11  ;;  %v6030_v15 = vor.u32 %v8310_v61, %v6029_v3 }
 0x2bc   : > { %v8729_v19 = vld [vmem:[#allocation8 + $0xe14] sm:$0xf]  ;;  %4664 = vmatpush.bf16.msra.mxu1 %v6414_v12  ;;  %v7466_v26 = vor.u32 %v8665_v16, %v7463_v18  ;;  %4644 = vmatpush.bf16.msrb.mxu3 %v7754_v17  ;;  %v8374_v2 = vld [vmem:[#allocation8 + $0x2f4] sm:$0xf0] }
 0x2bd   : > { %v7719_v63 = vld [vmem:[#allocation8 + $0xe30] sm:$0xf0]  ;;  %v6573_v12 = vld [vmem:[#allocation8 + $0x518] sm:$0xf]  ;;  %v6286_v18 = vor.u32 %v8374_v2, %v6285_v0  ;;  %v4414_v20 = vadd.f32 %v4413_v6, %v4401_v14  ;;  %v4439_v2 = vpop.f32.mrf.mxu3 }
 0x2be   : > { %v7722_v30 = vor.u32 %v8729_v19, %v7719_v63  ;;  %4652 = vmatpush.bf16.msra.mxu0 %v6126_v22  ;;  %4632 = vmatpush.bf16.msrb.mxu2 %v7466_v26  ;;  %v8446_v13 = vld [vmem:[#allocation8 + $0x534] sm:$0xf0] }
 0x2bf   : > { %v6829_v17 = vld [vmem:[#allocation8 + $0x718] sm:$0xf]  ;;  %v6574_v21 = vor.u32 %v8446_v13, %v6573_v12  ;;  %v4427_v0 = vadd.f32 %v4426_v58, %v4414_v20 }
 0x2c0   : > { %4665 = vmatpush.bf16.msra.mxu1 %v6382_v25  ;;  %4645 = vmatpush.bf16.msrb.mxu3 %v7722_v30  ;;  %v8510_v16 = vld [vmem:[#allocation8 + $0x734] sm:$0xf0] }
 0x2c1   : > { %4633 = vmatmul.bf16.vlgmr.msrb.gmra.mxu2 %v9516_v7  ;;  %v5997_v19 = vld [vmem:[#allocation8 + $0x98] sm:$0xf]  ;;  %v6830_v24 = vor.u32 %v8510_v16, %v6829_v17 }
 0x2c2   : > { %4677 = vmatpush.bf16.msra.mxu2 %v6670_v31  ;;  %4653 = vmatpush.bf16.msra.mxu0 %v6094_v43  ;;  %v8302_v63 = vld [vmem:[#allocation8 + $0xb4] sm:$0xf0] }
 0x2c3   : > { %4646 = vmatmul.bf16.vlgmr.msrb.gmra.mxu3 %v9518_v9  ;;  %v6253_v22 = vld [vmem:[#allocation8 + $0x298] sm:$0xf]  ;;  %v5998_v11 = vor.u32 %v8302_v63, %v5997_v19 }
 0x2c4   : > { %4690 = vmatpush.bf16.msra.mxu3 %v6926_v38  ;;  %4666 = vmatpush.bf16.msra.mxu1 %v6350_v46  ;;  %v6541_v25 = vld [vmem:[#allocation8 + $0x4d8] sm:$0xf]  ;;  %v6254_v29 = vor.u32 %v8366_v23, %v6253_v22  ;;  %v4402_v38 = vpop.f32.mrf.mxu0 }
 0x2c5   : > { %v8438_v26 = vld [vmem:[#allocation8 + $0x4f4] sm:$0xf0] }
 0x2c6   : > { %4678 = vmatpush.bf16.msra.mxu2 %v6638_v50  ;;  %4654 = vmatpush.bf16.msra.mxu0 %v6062_v54  ;;  %v6797_v27 = vld [vmem:[#allocation8 + $0x6d8] sm:$0xf]  ;;  %v6542_v32 = vor.u32 %v8438_v26, %v6541_v25 }
 0x2c7   : > { %v8502_v28 = vld [vmem:[#allocation8 + $0x6f4] sm:$0xf0] }
 0x2c8   : > { %4691 = vmatpush.bf16.msra.mxu3 %v6894_v33  ;;  %4667 = vmatpush.bf16.msra.mxu1 %v6318_v60  ;;  %v5965_v30 = vld [vmem:[#allocation8 + $0x58] sm:$0xf]  ;;  %v6798_v42 = vor.u32 %v8502_v28, %v6797_v27 }
 0x2c9   : > { %v8294_v31 = vld [vmem:[#allocation8 + $0x74] sm:$0xf0] }
 0x2ca   : > { %4679 = vmatpush.bf16.msra.mxu2 %v6606_v62  ;;  %4655 = vmatpush.bf16.msra.mxu0 %v6030_v15  ;;  %v6221_v36 = vld [vmem:[#allocation8 + $0x258] sm:$0xf]  ;;  %v5966_v45 = vor.u32 %v8294_v31, %v5965_v30  ;;  %v9585_v15 = vadd.f32 %v4439_v2, %v4427_v0 }
 0x2cb   : > { %v8358_v37 = vld [vmem:[#allocation8 + $0x274] sm:$0xf0] }
 0x2cc   : > { %4692 = vmatpush.bf16.msra.mxu3 %v6862_v8  ;;  %4668 = vmatpush.bf16.msra.mxu1 %v6286_v18  ;;  %v6509_v48 = vld [vmem:[#allocation8 + $0x498] sm:$0xf]  ;;  %v6222_v50 = vor.u32 %v8358_v37, %v6221_v36  ;;  %v4428_v36 = vpop.f32.mrf.mxu2 }
 0x2cd   : > { %v8430_v43 = vld [vmem:[#allocation8 + $0x4b4] sm:$0xf0] }
 0x2ce   : > { %4680 = vmatpush.bf16.msra.mxu2 %v6574_v21  ;;  %4656 = vmatpush.bf16.msra.mxu0 %v5998_v11  ;;  %v6765_v46 = vld [vmem:[#allocation8 + $0x698] sm:$0xf]  ;;  %v6510_v55 = vor.u32 %v8430_v43, %v6509_v48  ;;  %v4441_v43 = vpop.f32.mrf.mxu3 }
 0x2cf   : > { %v8494_v47 = vld [vmem:[#allocation8 + $0x6b4] sm:$0xf0] }
 0x2d0   : > { %4693 = vmatpush.bf16.msra.mxu3 %v6830_v24  ;;  %v5933_v49 = vld [vmem:[#allocation8 + $0x18] sm:$0xf]  ;;  %4669 = vmatpush.bf16.msra.mxu1 %v6254_v29  ;;  %v6766_v60 = vor.u32 %v8494_v47, %v6765_v46 }
 0x2d1   : > { %v8350_v33 = vld [vmem:[#allocation8 + $0x234] sm:$0xf0]  ;;  %v5934_v4 = vor.u32 %v8286_v52, %v5933_v49 }
 0x2d2   : > { %4681 = vmatpush.bf16.msra.mxu2 %v6542_v32  ;;  %v7181_v56 = vld [vmem:[#allocation8 + $0x9d8] sm:$0xf]  ;;  %4657 = vmatpush.bf16.msra.mxu0 %v5966_v45  ;;  %v6190_v13 = vor.u32 %v8350_v33, %v6189_v53 }
 0x2d3   : > { %v8598_v54 = vld [vmem:[#allocation8 + $0x9f4] sm:$0xf0] }
 0x2d4   : > { %v7437_v57 = vld [vmem:[#allocation8 + $0xbd8] sm:$0xf]  ;;  %4694 = vmatpush.bf16.msra.mxu3 %v6798_v42  ;;  %4670 = vmatpush.bf16.msra.mxu1 %v6222_v50  ;;  %v7182_v14 = vor.u32 %v8598_v54, %v7181_v56 }
 0x2d5   : > { %v8662_v3 = vld [vmem:[#allocation8 + $0xbf4] sm:$0xf0] }
 0x2d6   : > { %v6477_v61 = vld [vmem:[#allocation8 + $0x458] sm:$0xf]  ;;  %4682 = vmatpush.bf16.msra.mxu2 %v6510_v55  ;;  %v7438_v17 = vor.u32 %v8662_v3, %v7437_v57  ;;  %4658 = vmatpush.bf16.msra.mxu0 %v5934_v4  ;;  %v1455_v3 = vperm.slane %v9574_v51, 4  ;;  %v4465_v51 = vpop.f32.mrf.mxu1 }
 0x2d7   : > { %v8422_v62 = vld [vmem:[#allocation8 + $0x474] sm:$0xf0] }
 0x2d8   : > { %v6733_v8 = vld [vmem:[#allocation8 + $0x658] sm:$0xf]  ;;  %v6478_v16 = vor.u32 %v8422_v62, %v6477_v61  ;;  %4695 = vmatpush.bf16.msra.mxu3 %v6766_v60  ;;  %4671 = vmatpush.bf16.msra.mxu1 %v6190_v13 }
 0x2d9   : > { %v8486_v12 = vld [vmem:[#allocation8 + $0x674] sm:$0xf0]  ;;  %4659 = vmatmul.bf16.vlgmr.msra.gmra.mxu0 %v9494_v34 }
 0x2da   : > { %v7149_v6 = vld [vmem:[#allocation8 + $0x998] sm:$0xf]  ;;  %v6734_v21 = vor.u32 %v8486_v12, %v6733_v8  ;;  %4703 = vmatpush.bf16.msrb.mxu0 %v7182_v14  ;;  %4683 = vmatpush.bf16.msra.mxu2 %v6478_v16 }
 0x2db   : > { %v8590_v18 = vld [vmem:[#allocation8 + $0x9b4] sm:$0xf0]  ;;  %4672 = vmatmul.bf16.vlgmr.msra.gmra.mxu1 %v9496_v39 }
 0x2dc   : > { %v7405_v19 = vld [vmem:[#allocation8 + $0xb98] sm:$0xf]  ;;  %v7150_v11 = vor.u32 %v8590_v18, %v7149_v6  ;;  %4716 = vmatpush.bf16.msrb.mxu1 %v7438_v17  ;;  %4696 = vmatpush.bf16.msra.mxu3 %v6734_v21  ;;  %v4452_v6 = vpop.f32.mrf.mxu0 }
 0x2dd   : > { %v8654_v63 = vld [vmem:[#allocation8 + $0xbb4] sm:$0xf0] }
 0x2de   : > { %v6445_v20 = vld [vmem:[#allocation8 + $0x418] sm:$0xf]  ;;  %v7406_v29 = vor.u32 %v8654_v63, %v7405_v19  ;;  %4704 = vmatpush.bf16.msrb.mxu0 %v7150_v11  ;;  %v4453_v19 = vadd.f32 %v4452_v6, %v1455_v3  ;;  %v8338_v3 = vld [vmem:[#allocation8 + $0x1dc] sm:$0xf] }
 0x2df   : > { %v8414_v22 = vld [vmem:[#allocation8 + $0x434] sm:$0xf0] }
 0x2e0   : > { %v6701_v23 = vld [vmem:[#allocation8 + $0x618] sm:$0xf]  ;;  %v6446_v30 = vor.u32 %v8414_v22, %v6445_v20  ;;  %4717 = vmatpush.bf16.msrb.mxu1 %v7406_v29 }
 0x2e1   : > { %v8478_v24 = vld [vmem:[#allocation8 + $0x634] sm:$0xf0] }
 0x2e2   : > { %v7693_v25 = vld [vmem:[#allocation8 + $0xdd8] sm:$0xf]  ;;  %v6702_v37 = vor.u32 %v8478_v24, %v6701_v23  ;;  %4684 = vmatpush.bf16.msra.mxu2 %v6446_v30 }
 0x2e3   : > { %v8726_v26 = vld [vmem:[#allocation8 + $0xdf4] sm:$0xf0] }
 0x2e4   : > { %v7949_v27 = vld [vmem:[#allocation8 + $0xfd8] sm:$0xf]  ;;  %v7694_v38 = vor.u32 %v8726_v26, %v7693_v25  ;;  %4697 = vmatpush.bf16.msra.mxu3 %v6702_v37  ;;  %v4466_v25 = vadd.f32 %v4465_v51, %v4453_v19  ;;  %v8330_v51 = vld [vmem:[#allocation8 + $0x19c] sm:$0xf] }
 0x2e5   : > { %v8790_v28 = vld [vmem:[#allocation8 + $0xff4] sm:$0xf0]  ;;  %4685 = vmatmul.bf16.vlgmr.msra.gmra.mxu2 %v9500_v59 }
 0x2e6   : > { %v7117_v31 = vld [vmem:[#allocation8 + $0x958] sm:$0xf]  ;;  %v7950_v44 = vor.u32 %v8790_v28, %v7949_v27  ;;  %4729 = vmatpush.bf16.msrb.mxu2 %v7694_v38 }
 0x2e7   : > { %v8582_v32 = vld [vmem:[#allocation8 + $0x974] sm:$0xf0]  ;;  %4698 = vmatmul.bf16.vlgmr.msra.gmra.mxu3 %v9502_v1 }
 0x2e8   : > { %v7373_v42 = vld [vmem:[#allocation8 + $0xb58] sm:$0xf]  ;;  %v7118_v47 = vor.u32 %v8582_v32, %v7117_v31  ;;  %4742 = vmatpush.bf16.msrb.mxu3 %v7950_v44 }
 0x2e9   : > { %v8646_v48 = vld [vmem:[#allocation8 + $0xb74] sm:$0xf0] }
 0x2ea   : > { %v7661_v45 = vld [vmem:[#allocation8 + $0xd98] sm:$0xf]  ;;  %v7374_v52 = vor.u32 %v8646_v48, %v7373_v42  ;;  %4705 = vmatpush.bf16.msrb.mxu0 %v7118_v47 }
 0x2eb   : > { %v8718_v46 = vld [vmem:[#allocation8 + $0xdb4] sm:$0xf0] }
 0x2ec   : > { %v7917_v49 = vld [vmem:[#allocation8 + $0xf98] sm:$0xf]  ;;  %v7662_v55 = vor.u32 %v8718_v46, %v7661_v45  ;;  %4718 = vmatpush.bf16.msrb.mxu1 %v7374_v52  ;;  %v4454_v45 = vpop.f32.mrf.mxu0 }
 0x2ed   : > { %v8782_v50 = vld [vmem:[#allocation8 + $0xfb4] sm:$0xf0] }
 0x2ee   : > { %v7085_v53 = vld [vmem:[#allocation8 + $0x918] sm:$0xf]  ;;  %v7918_v57 = vor.u32 %v8782_v50, %v7917_v49  ;;  %4730 = vmatpush.bf16.msrb.mxu2 %v7662_v55  ;;  %v4467_v50 = vpop.f32.mrf.mxu1 }
 0x2ef   : > { %v8574_v33 = vld [vmem:[#allocation8 + $0x934] sm:$0xf0] }
 0x2f0   : > { %v7341_v56 = vld [vmem:[#allocation8 + $0xb18] sm:$0xf]  ;;  %v7086_v61 = vor.u32 %v8574_v33, %v7085_v53  ;;  %4743 = vmatpush.bf16.msrb.mxu3 %v7918_v57 }
 0x2f1   : > { %v8638_v54 = vld [vmem:[#allocation8 + $0xb34] sm:$0xf0] }
 0x2f2   : > { %v7629_v58 = vld [vmem:[#allocation8 + $0xd58] sm:$0xf]  ;;  %v7342_v2 = vor.u32 %v8638_v54, %v7341_v56  ;;  %4706 = vmatpush.bf16.msrb.mxu0 %v7086_v61  ;;  %v6159_v61 = vld [vmem:[#allocation8 + $0x1f8] sm:$0xf0] }
 0x2f3   : > { %v8710_v60 = vld [vmem:[#allocation8 + $0xd74] sm:$0xf0]  ;;  %v6162_v19 = vor.u32 %v8338_v3, %v6159_v61  ;;  %v8378_v3 = vld [vmem:[#allocation8 + $0x31c] sm:$0xf] }
 0x2f4   : > { %v7885_v62 = vld [vmem:[#allocation8 + $0xf58] sm:$0xf]  ;;  %v7630_v12 = vor.u32 %v8710_v60, %v7629_v58  ;;  %4719 = vmatpush.bf16.msrb.mxu1 %v7342_v2  ;;  %v6319_v61 = vld [vmem:[#allocation8 + $0x338] sm:$0xf0] }
 0x2f5   : > { %v8774_v0 = vld [vmem:[#allocation8 + $0xf74] sm:$0xf0] }
 0x2f6   : > { %v7053_v4 = vld [vmem:[#allocation8 + $0x8d8] sm:$0xf]  ;;  %v7886_v17 = vor.u32 %v8774_v0, %v7885_v62  ;;  %4731 = vmatpush.bf16.msrb.mxu2 %v7630_v12  ;;  %v8402_v62 = vld [vmem:[#allocation8 + $0x3dc] sm:$0xf]  ;;  %v4478_v0 = vpop.f32.mrf.mxu2 }
 0x2f7   : > { %v8566_v8 = vld [vmem:[#allocation8 + $0x8f4] sm:$0xf0] }
 0x2f8   : > { %v7309_v13 = vld [vmem:[#allocation8 + $0xad8] sm:$0xf]  ;;  %v7054_v63 = vor.u32 %v8566_v8, %v7053_v4  ;;  %4744 = vmatpush.bf16.msrb.mxu3 %v7886_v17  ;;  %v6415_v4 = vld [vmem:[#allocation8 + $0x3f8] sm:$0xf0] }
 0x2f9   : > { %v8630_v14 = vld [vmem:[#allocation8 + $0xaf4] sm:$0xf0] }
 0x2fa   : > { %v7597_v16 = vld [vmem:[#allocation8 + $0xd18] sm:$0xf]  ;;  %v7310_v22 = vor.u32 %v8630_v14, %v7309_v13  ;;  %4707 = vmatpush.bf16.msrb.mxu0 %v7054_v63  ;;  %v4479_v13 = vadd.f32 %v4478_v0, %v4466_v25  ;;  %v4491_v14 = vpop.f32.mrf.mxu3  ;;  %v8450_v0 = vld [vmem:[#allocation8 + $0x55c] sm:$0xf] }
 0x2fb   : > { %v8702_v18 = vld [vmem:[#allocation8 + $0xd34] sm:$0xf0] }
 0x2fc   : > { %v7853_v21 = vld [vmem:[#allocation8 + $0xf18] sm:$0xf]  ;;  %v7598_v26 = vor.u32 %v8702_v18, %v7597_v16  ;;  %4720 = vmatpush.bf16.msrb.mxu1 %v7310_v22  ;;  %v9592_v63 = vadd.f32 %v4491_v14, %v4479_v13  ;;  %v6127_v22 = vld [vmem:[#allocation8 + $0x1b8] sm:$0xf0]  ;;  %v6322_v13 = vor.u32 %v8378_v3, %v6319_v61 }
 0x2fd   : > { %v8766_v20 = vld [vmem:[#allocation8 + $0xf34] sm:$0xf0]  ;;  %v8306_v14 = vld [vmem:[#allocation8 + $0xdc] sm:$0xf] }
 0x2fe   : > { %v7021_v23 = vld [vmem:[#allocation8 + $0x898] sm:$0xf]  ;;  %v7854_v28 = vor.u32 %v8766_v20, %v7853_v21  ;;  %4732 = vmatpush.bf16.msrb.mxu2 %v7598_v26  ;;  %v6418_v21 = vor.u32 %v8402_v62, %v6415_v4  ;;  %v5935_v3 = vld [vmem:[#allocation8 + $0x38] sm:$0xf0] }
 0x2ff   : > { %v8558_v24 = vld [vmem:[#allocation8 + $0x8b4] sm:$0xf0]  ;;  %v8346_v61 = vld [vmem:[#allocation8 + $0x21c] sm:$0xf] }
 0x300   : > { %v7277_v11 = vld [vmem:[#allocation8 + $0xa98] sm:$0xf]  ;;  %v7022_v31 = vor.u32 %v8558_v24, %v7021_v23  ;;  %4745 = vmatpush.bf16.msrb.mxu3 %v7854_v28  ;;  %v8394_v23 = vld [vmem:[#allocation8 + $0x39c] sm:$0xf] }
 0x301   : > { %v8622_v27 = vld [vmem:[#allocation8 + $0xab4] sm:$0xf0]  ;;  %v6383_v24 = vld [vmem:[#allocation8 + $0x3b8] sm:$0xf0] }
 0x302   : > { %v7565_v29 = vld [vmem:[#allocation8 + $0xcd8] sm:$0xf]  ;;  %v7278_v37 = vor.u32 %v8622_v27, %v7277_v11  ;;  %4708 = vmatpush.bf16.msrb.mxu0 %v7022_v31  ;;  %v6130_v31 = vor.u32 %v8330_v51, %v6127_v22 }
 0x303   : > { %v8694_v30 = vld [vmem:[#allocation8 + $0xcf4] sm:$0xf0] }
 0x304   : > { %v7821_v32 = vld [vmem:[#allocation8 + $0xed8] sm:$0xf]  ;;  %v7566_v48 = vor.u32 %v8694_v30, %v7565_v29  ;;  %4721 = vmatpush.bf16.msrb.mxu1 %v7278_v37  ;;  %v8466_v29 = vld [vmem:[#allocation8 + $0x5dc] sm:$0xf]  ;;  %v6386_v37 = vor.u32 %v8394_v23, %v6383_v24  ;;  %v4517_v23 = vpop.f32.mrf.mxu1 }
 0x305   : > { %v8758_v36 = vld [vmem:[#allocation8 + $0xef4] sm:$0xf0]  ;;  %v6671_v30 = vld [vmem:[#allocation8 + $0x5f8] sm:$0xf0] }
 0x306   : > { %v6989_v38 = vld [vmem:[#allocation8 + $0x858] sm:$0xf]  ;;  %v7822_v46 = vor.u32 %v8758_v36, %v7821_v32  ;;  %4733 = vmatpush.bf16.msrb.mxu2 %v7566_v48  ;;  %v8530_v32 = vld [vmem:[#allocation8 + $0x7dc] sm:$0xf]  ;;  %v6674_v45 = vor.u32 %v8466_v29, %v6671_v30 }
 0x307   : > { %v8550_v42 = vld [vmem:[#allocation8 + $0x874] sm:$0xf0]  ;;  %v6927_v36 = vld [vmem:[#allocation8 + $0x7f8] sm:$0xf0] }
 0x308   : > { %v7245_v43 = vld [vmem:[#allocation8 + $0xa58] sm:$0xf]  ;;  %v6990_v52 = vor.u32 %v8550_v42, %v6989_v38  ;;  %4746 = vmatpush.bf16.msrb.mxu3 %v7822_v46  ;;  %v8322_v42 = vld [vmem:[#allocation8 + $0x15c] sm:$0xf]  ;;  %v6930_v50 = vor.u32 %v8530_v32, %v6927_v36 }
 0x309   : > { %v8614_v44 = vld [vmem:[#allocation8 + $0xa74] sm:$0xf0]  ;;  %v6095_v48 = vld [vmem:[#allocation8 + $0x178] sm:$0xf0] }
 0x30a   : > { %v7533_v47 = vld [vmem:[#allocation8 + $0xc98] sm:$0xf]  ;;  %v7246_v56 = vor.u32 %v8614_v44, %v7245_v43  ;;  %4709 = vmatpush.bf16.msrb.mxu0 %v6990_v52  ;;  %v4480_v43 = vpop.f32.mrf.mxu2  ;;  %v8386_v46 = vld [vmem:[#allocation8 + $0x35c] sm:$0xf] }
 0x30b   : > { %v8686_v49 = vld [vmem:[#allocation8 + $0xcb4] sm:$0xf0]  ;;  %v8458_v52 = vld [vmem:[#allocation8 + $0x59c] sm:$0xf] }
 0x30c   : > { %v7789_v53 = vld [vmem:[#allocation8 + $0xe98] sm:$0xf]  ;;  %v7534_v60 = vor.u32 %v8686_v49, %v7533_v47  ;;  %4722 = vmatpush.bf16.msrb.mxu1 %v7246_v56  ;;  %v6351_v47 = vld [vmem:[#allocation8 + $0x378] sm:$0xf0]  ;;  %v4493_v49 = vpop.f32.mrf.mxu3 }
 0x30d   : > { %v8750_v33 = vld [vmem:[#allocation8 + $0xeb4] sm:$0xf0]  ;;  %v6895_v56 = vld [vmem:[#allocation8 + $0x7b8] sm:$0xf0] }
 0x30e   : > { %v6957_v55 = vld [vmem:[#allocation8 + $0x818] sm:$0xf]  ;;  %v7790_v2 = vor.u32 %v8750_v33, %v7789_v53  ;;  %4734 = vmatpush.bf16.msrb.mxu2 %v7534_v60  ;;  %v6639_v53 = vld [vmem:[#allocation8 + $0x5b8] sm:$0xf0]  ;;  %v6098_v33 = vor.u32 %v8322_v42, %v6095_v48 }
 0x30f   : > { %v8542_v54 = vld [vmem:[#allocation8 + $0x834] sm:$0xf0]  ;;  %v6642_v60 = vor.u32 %v8458_v52, %v6639_v53  ;;  %v6255_v32 = vld [vmem:[#allocation8 + $0x2b8] sm:$0xf0] }
 0x310   : > { %v7213_v57 = vld [vmem:[#allocation8 + $0xa18] sm:$0xf]  ;;  %v6958_v6 = vor.u32 %v8542_v54, %v6957_v55  ;;  %4747 = vmatpush.bf16.msrb.mxu3 %v7790_v2  ;;  %v8522_v55 = vld [vmem:[#allocation8 + $0x79c] sm:$0xf]  ;;  %v6354_v54 = vor.u32 %v8386_v46, %v6351_v47 }
 0x311   : > { %v8606_v58 = vld [vmem:[#allocation8 + $0xa34] sm:$0xf0]  ;;  %v6898_v62 = vor.u32 %v8522_v55, %v6895_v56  ;;  %v6607_v2 = vld [vmem:[#allocation8 + $0x578] sm:$0xf0]  ;;  %v4519_v55 = vpop.f32.mrf.mxu1 }
 0x312   : > { %v7501_v8 = vld [vmem:[#allocation8 + $0xc58] sm:$0xf]  ;;  %v7214_v18 = vor.u32 %v8606_v58, %v7213_v57  ;;  %4710 = vmatpush.bf16.msrb.mxu0 %v6958_v6  ;;  %v8314_v57 = vld [vmem:[#allocation8 + $0x11c] sm:$0xf] }
 0x313   : > { %v8678_v12 = vld [vmem:[#allocation8 + $0xc74] sm:$0xf0]  ;;  %v6063_v58 = vld [vmem:[#allocation8 + $0x138] sm:$0xf0] }
 0x314   : > { %v7757_v17 = vld [vmem:[#allocation8 + $0xe58] sm:$0xf]  ;;  %v7502_v20 = vor.u32 %v8678_v12, %v7501_v8  ;;  %4723 = vmatpush.bf16.msrb.mxu1 %v7214_v18  ;;  %v6066_v4 = vor.u32 %v8314_v57, %v6063_v58  ;;  %v8514_v8 = vld [vmem:[#allocation8 + $0x75c] sm:$0xf] }
 0x315   : > { %v8742_v16 = vld [vmem:[#allocation8 + $0xe74] sm:$0xf0]  ;;  %4711 = vmatmul.bf16.vlgmr.msrb.gmra.mxu0 %v9510_v35  ;;  %v6863_v12 = vld [vmem:[#allocation8 + $0x778] sm:$0xf0] }
 0x316   : > { %v7758_v26 = vor.u32 %v8742_v16, %v7757_v17  ;;  %v7469_v25 = vld [vmem:[#allocation8 + $0xc18] sm:$0xf]  ;;  %4755 = vmatpush.bf16.msra.mxu0 %v6162_v19  ;;  %4735 = vmatpush.bf16.msrb.mxu2 %v7502_v20  ;;  %v6031_v6 = vld [vmem:[#allocation8 + $0xf8] sm:$0xf0]  ;;  %v6610_v17 = vor.u32 %v8450_v0, %v6607_v2  ;;  %v4504_v19 = vpop.f32.mrf.mxu0  ;;  %v6866_v51 = vor.u32 %v8514_v8, %v6863_v12  ;;  %v4530_v12 = vpop.f32.mrf.mxu2 }
 0x317   : > { %v8670_v11 = vld [vmem:[#allocation8 + $0xc34] sm:$0xf0]  ;;  %4724 = vmatmul.bf16.vlgmr.msrb.gmra.mxu1 %v9512_v41  ;;  %v8370_v16 = vld [vmem:[#allocation8 + $0x2dc] sm:$0xf]  ;;  %v4505_v22 = vadd.f32 %v4504_v19, %v9592_v63  ;;  %v6034_v24 = vor.u32 %v8306_v14, %v6031_v6 }
 0x318   : > { %v7725_v27 = vld [vmem:[#allocation8 + $0xe18] sm:$0xf]  ;;  %4768 = vmatpush.bf16.msra.mxu1 %v6418_v21  ;;  %v7470_v38 = vor.u32 %v8670_v11, %v7469_v25  ;;  %4748 = vmatpush.bf16.msrb.mxu3 %v7758_v26  ;;  %v6287_v18 = vld [vmem:[#allocation8 + $0x2f8] sm:$0xf0] }
 0x319   : > { %v8734_v28 = vld [vmem:[#allocation8 + $0xe34] sm:$0xf0]  ;;  %v8442_v21 = vld [vmem:[#allocation8 + $0x51c] sm:$0xf]  ;;  %v6290_v11 = vor.u32 %v8370_v16, %v6287_v18  ;;  %v4518_v29 = vadd.f32 %v4517_v23, %v4505_v22  ;;  %v4543_v18 = vpop.f32.mrf.mxu3 }
 0x31a   : > { %v7726_v44 = vor.u32 %v8734_v28, %v7725_v27  ;;  %4756 = vmatpush.bf16.msra.mxu0 %v6130_v31  ;;  %4736 = vmatpush.bf16.msrb.mxu2 %v7470_v38  ;;  %v6575_v20 = vld [vmem:[#allocation8 + $0x538] sm:$0xf0] }
 0x31b   : > { %v8506_v26 = vld [vmem:[#allocation8 + $0x71c] sm:$0xf]  ;;  %v6578_v30 = vor.u32 %v8442_v21, %v6575_v20  ;;  %v4531_v16 = vadd.f32 %v4530_v12, %v4518_v29 }
 0x31c   : > { %4769 = vmatpush.bf16.msra.mxu1 %v6386_v37  ;;  %4749 = vmatpush.bf16.msrb.mxu3 %v7726_v44  ;;  %v6831_v25 = vld [vmem:[#allocation8 + $0x738] sm:$0xf0] }
 0x31d   : > { %4737 = vmatmul.bf16.vlgmr.msrb.gmra.mxu2 %v9516_v7  ;;  %v8298_v27 = vld [vmem:[#allocation8 + $0x9c] sm:$0xf]  ;;  %v6834_v36 = vor.u32 %v8506_v26, %v6831_v25 }
 0x31e   : > { %4781 = vmatpush.bf16.msra.mxu2 %v6674_v45  ;;  %4757 = vmatpush.bf16.msra.mxu0 %v6098_v33  ;;  %v5999_v28 = vld [vmem:[#allocation8 + $0xb8] sm:$0xf0] }
 0x31f   : > { %4750 = vmatmul.bf16.vlgmr.msrb.gmra.mxu3 %v9518_v9  ;;  %v8362_v31 = vld [vmem:[#allocation8 + $0x29c] sm:$0xf]  ;;  %v6002_v63 = vor.u32 %v8298_v27, %v5999_v28 }
 0x320   : > { %4794 = vmatpush.bf16.msra.mxu3 %v6930_v50  ;;  %4770 = vmatpush.bf16.msra.mxu1 %v6354_v54  ;;  %v8434_v37 = vld [vmem:[#allocation8 + $0x4dc] sm:$0xf]  ;;  %v6258_v43 = vor.u32 %v8362_v31, %v6255_v32  ;;  %v4506_v50 = vpop.f32.mrf.mxu0 }
 0x321   : > { %v6543_v38 = vld [vmem:[#allocation8 + $0x4f8] sm:$0xf0] }
 0x322   : > { %4782 = vmatpush.bf16.msra.mxu2 %v6642_v60  ;;  %4758 = vmatpush.bf16.msra.mxu0 %v6066_v4  ;;  %v8498_v42 = vld [vmem:[#allocation8 + $0x6dc] sm:$0xf]  ;;  %v6546_v46 = vor.u32 %v8434_v37, %v6543_v38 }
 0x323   : > { %v6799_v48 = vld [vmem:[#allocation8 + $0x6f8] sm:$0xf0] }
 0x324   : > { %4795 = vmatpush.bf16.msra.mxu3 %v6898_v62  ;;  %4771 = vmatpush.bf16.msra.mxu1 %v6322_v13  ;;  %v8290_v44 = vld [vmem:[#allocation8 + $0x5c] sm:$0xf]  ;;  %v6802_v52 = vor.u32 %v8498_v42, %v6799_v48 }
 0x325   : > { %v5967_v45 = vld [vmem:[#allocation8 + $0x78] sm:$0xf0] }
 0x326   : > { %4783 = vmatpush.bf16.msra.mxu2 %v6610_v17  ;;  %4759 = vmatpush.bf16.msra.mxu0 %v6034_v24  ;;  %v8354_v47 = vld [vmem:[#allocation8 + $0x25c] sm:$0xf]  ;;  %v5970_v56 = vor.u32 %v8290_v44, %v5967_v45  ;;  %v9599_v24 = vadd.f32 %v4543_v18, %v4531_v16 }
 0x327   : > { %v6223_v49 = vld [vmem:[#allocation8 + $0x278] sm:$0xf0] }
 0x328   : > { %4796 = vmatpush.bf16.msra.mxu3 %v6866_v51  ;;  %4772 = vmatpush.bf16.msra.mxu1 %v6290_v11  ;;  %v8426_v53 = vld [vmem:[#allocation8 + $0x49c] sm:$0xf]  ;;  %v6226_v60 = vor.u32 %v8354_v47, %v6223_v49  ;;  %v4532_v47 = vpop.f32.mrf.mxu2 }
 0x329   : > { %v6511_v33 = vld [vmem:[#allocation8 + $0x4b8] sm:$0xf0] }
 0x32a   : > { %4784 = vmatpush.bf16.msra.mxu2 %v6578_v30  ;;  %4760 = vmatpush.bf16.msra.mxu0 %v6002_v63  ;;  %v8490_v54 = vld [vmem:[#allocation8 + $0x69c] sm:$0xf]  ;;  %v6514_v0 = vor.u32 %v8426_v53, %v6511_v33  ;;  %v4545_v33 = vpop.f32.mrf.mxu3 }
 0x32b   : > { %v6767_v57 = vld [vmem:[#allocation8 + $0x6b8] sm:$0xf0] }
 0x32c   : > { %4797 = vmatpush.bf16.msra.mxu3 %v6834_v36  ;;  %v8282_v58 = vld [vmem:[#allocation8 + $0x1c] sm:$0xf]  ;;  %4773 = vmatpush.bf16.msra.mxu1 %v6258_v43  ;;  %v6770_v13 = vor.u32 %v8490_v54, %v6767_v57 }
 0x32d   : > { %v6191_v62 = vld [vmem:[#allocation8 + $0x238] sm:$0xf0]  ;;  %v5938_v19 = vor.u32 %v8282_v58, %v5935_v3 }
 0x32e   : > { %4785 = vmatpush.bf16.msra.mxu2 %v6546_v46  ;;  %v8594_v2 = vld [vmem:[#allocation8 + $0x9dc] sm:$0xf]  ;;  %4761 = vmatpush.bf16.msra.mxu0 %v5970_v56  ;;  %v6194_v20 = vor.u32 %v8346_v61, %v6191_v62 }
 0x32f   : > { %v7183_v4 = vld [vmem:[#allocation8 + $0x9f8] sm:$0xf0] }
 0x330   : > { %v8658_v8 = vld [vmem:[#allocation8 + $0xbdc] sm:$0xf]  ;;  %4798 = vmatpush.bf16.msra.mxu3 %v6802_v52  ;;  %4774 = vmatpush.bf16.msra.mxu1 %v6226_v60  ;;  %v7186_v22 = vor.u32 %v8594_v2, %v7183_v4 }
 0x331   : > { %v7439_v14 = vld [vmem:[#allocation8 + $0xbf8] sm:$0xf0] }
 0x332   : > { %v8418_v6 = vld [vmem:[#allocation8 + $0x45c] sm:$0xf]  ;;  %4786 = vmatpush.bf16.msra.mxu2 %v6514_v0  ;;  %v7442_v26 = vor.u32 %v8658_v8, %v7439_v14  ;;  %4762 = vmatpush.bf16.msra.mxu0 %v5938_v19 }
 0x333   : > { %v6479_v17 = vld [vmem:[#allocation8 + $0x478] sm:$0xf0] }
 0x334   : > { %v8482_v51 = vld [vmem:[#allocation8 + $0x65c] sm:$0xf]  ;;  %v6482_v25 = vor.u32 %v8418_v6, %v6479_v17  ;;  %4799 = vmatpush.bf16.msra.mxu3 %v6770_v13  ;;  %4775 = vmatpush.bf16.msra.mxu1 %v6194_v20 }
 0x335   : > { %v6735_v21 = vld [vmem:[#allocation8 + $0x678] sm:$0xf0]  ;;  %4763 = vmatmul.bf16.vlgmr.msra.gmra.mxu0 %v9494_v34 }
 0x336   : > { %v8586_v23 = vld [vmem:[#allocation8 + $0x99c] sm:$0xf]  ;;  %v6738_v30 = vor.u32 %v8482_v51, %v6735_v21  ;;  %4807 = vmatpush.bf16.msrb.mxu0 %v7186_v22  ;;  %4787 = vmatpush.bf16.msra.mxu2 %v6482_v25  ;;  %v9605_v21 = vpop.f32.mrf.mxu0 }
 0x337   : > { %v7151_v11 = vld [vmem:[#allocation8 + $0x9b8] sm:$0xf0]  ;;  %4776 = vmatmul.bf16.vlgmr.msra.gmra.mxu1 %v9496_v39 }
 0x338   : > { %v8650_v27 = vld [vmem:[#allocation8 + $0xb9c] sm:$0xf]  ;;  %v7154_v63 = vor.u32 %v8586_v23, %v7151_v11  ;;  %4820 = vmatpush.bf16.msrb.mxu1 %v7442_v26  ;;  %4800 = vmatpush.bf16.msra.mxu3 %v6738_v30  ;;  %v9607_v23 = vpop.f32.mrf.mxu1 }
 0x339   : > { %v7407_v28 = vld [vmem:[#allocation8 + $0xbb8] sm:$0xf0] }
 0x33a   : > { %v8410_v29 = vld [vmem:[#allocation8 + $0x41c] sm:$0xf]  ;;  %v7410_v43 = vor.u32 %v8650_v27, %v7407_v28  ;;  %4808 = vmatpush.bf16.msrb.mxu0 %v7154_v63 }
 0x33b   : > { %v6447_v31 = vld [vmem:[#allocation8 + $0x438] sm:$0xf0] }
 0x33c   : > { %v8474_v32 = vld [vmem:[#allocation8 + $0x61c] sm:$0xf]  ;;  %v6450_v44 = vor.u32 %v8410_v29, %v6447_v31  ;;  %4821 = vmatpush.bf16.msrb.mxu1 %v7410_v43 }
 0x33d   : > { %v6703_v36 = vld [vmem:[#allocation8 + $0x638] sm:$0xf0] }
 0x33e   : > { %v8722_v37 = vld [vmem:[#allocation8 + $0xddc] sm:$0xf]  ;;  %v6706_v49 = vor.u32 %v8474_v32, %v6703_v36  ;;  %4788 = vmatpush.bf16.msra.mxu2 %v6450_v44 }
 0x33f   : > { %v7695_v38 = vld [vmem:[#allocation8 + $0xdf8] sm:$0xf0] }
 0x340   : > { %v8786_v42 = vld [vmem:[#allocation8 + $0xfdc] sm:$0xf]  ;;  %v7698_v50 = vor.u32 %v8722_v37, %v7695_v38  ;;  %4801 = vmatpush.bf16.msra.mxu3 %v6706_v49  ;;  %v4558_v49 = vpop.f32.mrf.mxu0  ;;  %v4571_v33 = vpop.f32.mrf.mxu1 }
 0x341   : > { %v7951_v48 = vld [vmem:[#allocation8 + $0xff8] sm:$0xf0]  ;;  %4789 = vmatmul.bf16.vlgmr.msra.gmra.mxu2 %v9500_v59  ;;  %v8818_v49 = vld [vmem:[#allocation11 + $0xd8] sm:$0xff] }
 0x342   : > { %v8578_v45 = vld [vmem:[#allocation8 + $0x95c] sm:$0xf]  ;;  %v7954_v55 = vor.u32 %v8786_v42, %v7951_v48  ;;  %4833 = vmatpush.bf16.msrb.mxu2 %v7698_v50 }
 0x343   : > { %v7119_v46 = vld [vmem:[#allocation8 + $0x978] sm:$0xf0]  ;;  %4802 = vmatmul.bf16.vlgmr.msra.gmra.mxu3 %v9502_v1 }
 0x344   : > { %v8642_v52 = vld [vmem:[#allocation8 + $0xb5c] sm:$0xf]  ;;  %v7122_v57 = vor.u32 %v8578_v45, %v7119_v46  ;;  %4846 = vmatpush.bf16.msrb.mxu3 %v7954_v55 }
 0x345   : > { %v7375_v53 = vld [vmem:[#allocation8 + $0xb78] sm:$0xf0] }
 0x346   : > { %v8714_v56 = vld [vmem:[#allocation8 + $0xd9c] sm:$0xf]  ;;  %v7378_v3 = vor.u32 %v8642_v52, %v7375_v53  ;;  %4809 = vmatpush.bf16.msrb.mxu0 %v7122_v57 }
 0x347   : > { %v7663_v54 = vld [vmem:[#allocation8 + $0xdb8] sm:$0xf0] }
 0x348   : > { %v8778_v58 = vld [vmem:[#allocation8 + $0xf9c] sm:$0xf]  ;;  %v7666_v34 = vor.u32 %v8714_v56, %v7663_v54  ;;  %4822 = vmatpush.bf16.msrb.mxu1 %v7378_v3 }
 0x349   : > { %v7919_v60 = vld [vmem:[#allocation8 + $0xfb8] sm:$0xf0] }
 0x34a   : > { %v8570_v61 = vld [vmem:[#allocation8 + $0x91c] sm:$0xf]  ;;  %v7922_v4 = vor.u32 %v8778_v58, %v7919_v60  ;;  %4834 = vmatpush.bf16.msrb.mxu2 %v7666_v34  ;;  %v9609_v34 = vpop.f32.mrf.mxu2 }
 0x34b   : > { %v7087_v62 = vld [vmem:[#allocation8 + $0x938] sm:$0xf0] }
 0x34c   : > { %v8634_v0 = vld [vmem:[#allocation8 + $0xb1c] sm:$0xf]  ;;  %v7090_v12 = vor.u32 %v8570_v61, %v7087_v62  ;;  %4847 = vmatpush.bf16.msrb.mxu3 %v7922_v4 }
 0x34d   : > { %v7343_v2 = vld [vmem:[#allocation8 + $0xb38] sm:$0xf0] }
 0x34e   : > { %v8706_v39 = vld [vmem:[#allocation8 + $0xd5c] sm:$0xf]  ;;  %v7346_v6 = vor.u32 %v8634_v0, %v7343_v2  ;;  %4810 = vmatpush.bf16.msrb.mxu0 %v7090_v12 }
 0x34f   : > { %v7631_v8 = vld [vmem:[#allocation8 + $0xd78] sm:$0xf0] }
 0x350   : > { %v8770_v13 = vld [vmem:[#allocation8 + $0xf5c] sm:$0xf]  ;;  %v7634_v18 = vor.u32 %v8706_v39, %v7631_v8  ;;  %4823 = vmatpush.bf16.msrb.mxu1 %v7346_v6  ;;  %v9611_v39 = vpop.f32.mrf.mxu3  ;;  %v8798_v6 = vld [vmem:[#allocation11 + $0x38] sm:$0xff] }
 0x351   : > { %v7887_v14 = vld [vmem:[#allocation8 + $0xf78] sm:$0xf0] }
 0x352   : > { %v8562_v17 = vld [vmem:[#allocation8 + $0x8dc] sm:$0xf]  ;;  %v7890_v20 = vor.u32 %v8770_v13, %v7887_v14  ;;  %4835 = vmatpush.bf16.msrb.mxu2 %v7634_v18 }
 0x353   : > { %v7055_v16 = vld [vmem:[#allocation8 + $0x8f8] sm:$0xf0] }
 0x354   : > { %v8626_v19 = vld [vmem:[#allocation8 + $0xadc] sm:$0xf]  ;;  %v7058_v26 = vor.u32 %v8562_v17, %v7055_v16  ;;  %4848 = vmatpush.bf16.msrb.mxu3 %v7890_v20  ;;  %v8806_v17 = vld [vmem:[#allocation11 + $0x78] sm:$0xff] }
 0x355   : > { %v7311_v51 = vld [vmem:[#allocation8 + $0xaf8] sm:$0xf0] }
 0x356   : > { %v8698_v22 = vld [vmem:[#allocation8 + $0xd1c] sm:$0xf]  ;;  %v7314_v11 = vor.u32 %v8626_v19, %v7311_v51  ;;  %4811 = vmatpush.bf16.msrb.mxu0 %v7058_v26 }
 0x357   : > { %v7599_v59 = vld [vmem:[#allocation8 + $0xd38] sm:$0xf0] }
 0x358   : > { %v8762_v25 = vld [vmem:[#allocation8 + $0xf1c] sm:$0xf]  ;;  %v7602_v30 = vor.u32 %v8698_v22, %v7599_v59  ;;  %4824 = vmatpush.bf16.msrb.mxu1 %v7314_v11 }
 0x359   : > { %v7855_v1 = vld [vmem:[#allocation8 + $0xf38] sm:$0xf0] }
 0x35a   : > { %v8554_v27 = vld [vmem:[#allocation8 + $0x89c] sm:$0xf]  ;;  %v7858_v32 = vor.u32 %v8762_v25, %v7855_v1  ;;  %4836 = vmatpush.bf16.msrb.mxu2 %v7602_v30  ;;  %v4584_v1 = vpop.f32.mrf.mxu2  ;;  %v8822_v30 = vld [vmem:[#allocation11 + $0xf8] sm:$0xff] }
 0x35b   : > { %v7023_v28 = vld [vmem:[#allocation8 + $0x8b8] sm:$0xf0]  ;;  %v8844_v1 = vld [vmem:[#allocation11 + $0x1a8] sm:$0xff] }
 0x35c   : > { %v8618_v29 = vld [vmem:[#allocation8 + $0xa9c] sm:$0xf]  ;;  %v7026_v38 = vor.u32 %v8554_v27, %v7023_v28  ;;  %4849 = vmatpush.bf16.msrb.mxu3 %v7858_v32  ;;  %v8814_v27 = vld [vmem:[#allocation11 + $0xb8] sm:$0xff]  ;;  %v4597_v28 = vpop.f32.mrf.mxu3 }
 0x35d   : > { %v7279_v31 = vld [vmem:[#allocation8 + $0xab8] sm:$0xf0]  ;;  %v8834_v28 = vld [vmem:[#allocation11 + $0x158] sm:$0xff] }
 0x35e   : > { %v8690_v36 = vld [vmem:[#allocation8 + $0xcdc] sm:$0xf]  ;;  %v7282_v48 = vor.u32 %v8618_v29, %v7279_v31  ;;  %4812 = vmatpush.bf16.msrb.mxu0 %v7026_v38  ;;  %v8796_v29 = vld [vmem:[#allocation11 + $0x28] sm:$0xff]  ;;  %v9617_v38 = vpop.f32.mrf.mxu0 }
 0x35f   : > { %v7567_v37 = vld [vmem:[#allocation8 + $0xcf8] sm:$0xf0]  ;;  %v8804_v31 = vld [vmem:[#allocation11 + $0x68] sm:$0xff] }
 0x360   : > { %v8754_v63 = vld [vmem:[#allocation8 + $0xedc] sm:$0xf]  ;;  %v7570_v45 = vor.u32 %v8690_v36, %v7567_v37  ;;  %4825 = vmatpush.bf16.msrb.mxu1 %v7282_v48  ;;  %v8803_v37 = vld [vmem:[#allocation11 + $0x60] sm:$0xff]  ;;  %v8794_v48 = vld [vmem:[#allocation11 + $0x18] sm:$0xff] }
 0x361   : > { %v7823_v42 = vld [vmem:[#allocation8 + $0xef8] sm:$0xf0] }
 0x362   : > { %v8546_v43 = vld [vmem:[#allocation8 + $0x85c] sm:$0xf]  ;;  %v7826_v50 = vor.u32 %v8754_v63, %v7823_v42  ;;  %4837 = vmatpush.bf16.msrb.mxu2 %v7570_v45  ;;  %v8820_v63 = vld [vmem:[#allocation11 + $0xe8] sm:$0xff]  ;;  %v9619_v42 = vpop.f32.mrf.mxu1 }
 0x363   : > { %v6991_v44 = vld [vmem:[#allocation8 + $0x878] sm:$0xf0] }
 0x364   : > { %v8610_v46 = vld [vmem:[#allocation8 + $0xa5c] sm:$0xf]  ;;  %v6994_v55 = vor.u32 %v8546_v43, %v6991_v44  ;;  %4850 = vmatpush.bf16.msrb.mxu3 %v7826_v50  ;;  %v8802_v43 = vld [vmem:[#allocation11 + $0x58] sm:$0xff]  ;;  %v8819_v44 = vld [vmem:[#allocation11 + $0xe0] sm:$0xff] }
 0x365   : > { %v7247_v47 = vld [vmem:[#allocation8 + $0xa78] sm:$0xf0] }
 0x366   : > { %v8682_v52 = vld [vmem:[#allocation8 + $0xc9c] sm:$0xf]  ;;  %v7250_v57 = vor.u32 %v8610_v46, %v7247_v47  ;;  %4813 = vmatpush.bf16.msrb.mxu0 %v6994_v55  ;;  %v8810_v46 = vld [vmem:[#allocation11 + $0x98] sm:$0xff]  ;;  %v4610_v47 = vpop.f32.mrf.mxu0  ;;  %v9621_v55 = vpop.f32.mrf.mxu2 }
 0x367   : > { %v7535_v53 = vld [vmem:[#allocation8 + $0xcb8] sm:$0xf0] }
 0x368   : > { %v8746_v56 = vld [vmem:[#allocation8 + $0xe9c] sm:$0xf]  ;;  %v7538_v3 = vor.u32 %v8682_v52, %v7535_v53  ;;  %4826 = vmatpush.bf16.msrb.mxu1 %v7250_v57  ;;  %v8792_v52 = vld [vmem:[#allocation11 + $0x8] sm:$0xff]  ;;  %v8791_v57 = vld [vmem:[#allocation11] sm:$0xff] }
 0x369   : > { %v7791_v54 = vld [vmem:[#allocation8 + $0xeb8] sm:$0xf0]  ;;  %v8800_v53 = vld [vmem:[#allocation11 + $0x48] sm:$0xff] }
 0x36a   : > { %v8538_v58 = vld [vmem:[#allocation8 + $0x81c] sm:$0xf]  ;;  %v7794_v0 = vor.u32 %v8746_v56, %v7791_v54  ;;  %4838 = vmatpush.bf16.msrb.mxu2 %v7538_v3  ;;  %v4623_v50 = vpop.f32.mrf.mxu1  ;;  %v9623_v54 = vpop.f32.mrf.mxu3  ;;  %v8838_v3 = vld [vmem:[#allocation11 + $0x178] sm:$0xff] }
 0x36b   : > { %v6959_v60 = vld [vmem:[#allocation8 + $0x838] sm:$0xf0] }
 0x36c   : > { %v8602_v61 = vld [vmem:[#allocation8 + $0xa1c] sm:$0xf]  ;;  %v6962_v8 = vor.u32 %v8538_v58, %v6959_v60  ;;  %4851 = vmatpush.bf16.msrb.mxu3 %v7794_v0  ;;  %v8799_v58 = vld [vmem:[#allocation11 + $0x40] sm:$0xff]  ;;  %v8830_v60 = vld [vmem:[#allocation11 + $0x138] sm:$0xff]  ;;  %v4859_v0 = vpack.c.bf16 %v9549_v40, %v9549_v40 }
 0x36d   : > { %v7215_v62 = vld [vmem:[#allocation8 + $0xa38] sm:$0xf0] }
 0x36e   : > { %v8674_v2 = vld [vmem:[#allocation8 + $0xc5c] sm:$0xf]  ;;  %v7218_v14 = vor.u32 %v8602_v61, %v7215_v62  ;;  %4814 = vmatpush.bf16.msrb.mxu0 %v6962_v8  ;;  %v8808_v61 = vld [vmem:[#allocation11 + $0x88] sm:$0xff] }
 0x36f   : > { %v7503_v4 = vld [vmem:[#allocation8 + $0xc78] sm:$0xf0]  ;;  %v8816_v62 = vld [vmem:[#allocation11 + $0xc8] sm:$0xff] }
 0x370   : > { %v8738_v12 = vld [vmem:[#allocation8 + $0xe5c] sm:$0xf]  ;;  %v7506_v16 = vor.u32 %v8674_v2, %v7503_v4  ;;  %4827 = vmatpush.bf16.msrb.mxu1 %v7218_v14  ;;  %v9627_v2 = vld [vmem:[#allocation10] sm:$0xff]  ;;  %v8807_v14 = vld [vmem:[#allocation11 + $0x80] sm:$0xff] }
 0x371   : > { %v7759_v13 = vld [vmem:[#allocation8 + $0xe78] sm:$0xf0]  ;;  %4815 = vmatmul.bf16.vlgmr.msrb.gmra.mxu0 %v9510_v35  ;;  %v8795_v35 = vld [vmem:[#allocation11 + $0x20] sm:$0xff]  ;;  %v1456_v4 = vperm.slane %v9627_v2, 5  ;;  %v1457_v47 = vperm.slane %v9627_v2, 6 }
 0x372   : > { %v7762_v18 = vor.u32 %v8738_v12, %v7759_v13  ;;  %v8666_v19 = vld [vmem:[#allocation8 + $0xc1c] sm:$0xf]  ;;  %5383 = vmatpush.bf16.msra.mxu0 %v8798_v6  ;;  %4839 = vmatpush.bf16.msrb.mxu2 %v7506_v16  ;;  %v4860_v12 = vpack.c.bf16 %v9555_v5, %v9555_v5  ;;  %v4636_v6 = vpop.f32.mrf.mxu2  ;;  %v8846_v16 = vld [vmem:[#allocation11 + $0x1b8] sm:$0xff]  ;;  %v4649_v40 = vpop.f32.mrf.mxu3  ;;  %v4861_v5 = vpack.c.bf16 %v9569_v10, %v9569_v10 }
 0x373   : > { %v7471_v51 = vld [vmem:[#allocation8 + $0xc38] sm:$0xf0]  ;;  %4828 = vmatmul.bf16.vlgmr.msrb.gmra.mxu1 %v9512_v41  ;;  %v8812_v41 = vld [vmem:[#allocation11 + $0xa8] sm:$0xff]  ;;  %v4673_v10 = vpop.f32.mrf.mxu1  ;;  %v8850_v40 = vld [vmem:[#allocation11 + $0x1d8] sm:$0xff] }
 0x374   : > { %v8730_v20 = vld [vmem:[#allocation8 + $0xe1c] sm:$0xf]  ;;  %5396 = vmatpush.bf16.msra.mxu1 %v8806_v17  ;;  %v7474_v25 = vor.u32 %v8666_v19, %v7471_v51  ;;  %4852 = vmatpush.bf16.msrb.mxu3 %v7762_v18  ;;  %v8815_v17 = vld [vmem:[#allocation11 + $0xc0] sm:$0xff]  ;;  %v4557_v18 = vadd.f32 %v9605_v21, %v1456_v4  ;;  %v8828_v19 = vld [vmem:[#allocation11 + $0x128] sm:$0xff] }
 0x375   : > { %v7727_v22 = vld [vmem:[#allocation8 + $0xe38] sm:$0xf0]  ;;  %v8836_v51 = vld [vmem:[#allocation11 + $0x168] sm:$0xff]  ;;  %v8835_v21 = vld [vmem:[#allocation11 + $0x160] sm:$0xff] }
 0x376   : > { %v8797_v59 = vld [vmem:[#allocation11 + $0x30] sm:$0xff]  ;;  %v7730_v11 = vor.u32 %v8730_v20, %v7727_v22  ;;  %4840 = vmatpush.bf16.msrb.mxu2 %v7474_v25  ;;  %v4862_v22 = vpack.c.bf16 %v9585_v15, %v9585_v15 }
 0x377   : > { %v8805_v26 = vld [vmem:[#allocation11 + $0x70] sm:$0xff]  ;;  %5384 = vmatpush.bf16.msra.mxu0 %v8797_v59  ;;  %v4570_v59 = vadd.f32 %v9607_v23, %v4557_v18  ;;  %v8843_v23 = vld [vmem:[#allocation11 + $0x1a0] sm:$0xff] }
 0x378   : > { %5397 = vmatpush.bf16.msra.mxu1 %v8805_v26  ;;  %4853 = vmatpush.bf16.msrb.mxu3 %v7730_v11  ;;  %v8813_v32 = vld [vmem:[#allocation11 + $0xb0] sm:$0xff]  ;;  %v8827_v26 = vld [vmem:[#allocation11 + $0x120] sm:$0xff]  ;;  %v4660_v11 = vpop.f32.mrf.mxu0 }
 0x379   : > { %v8821_v36 = vld [vmem:[#allocation11 + $0xf0] sm:$0xff]  ;;  %4841 = vmatmul.bf16.vlgmr.msrb.gmra.mxu2 %v9516_v7  ;;  %v8811_v7 = vld [vmem:[#allocation11 + $0xa0] sm:$0xff]  ;;  %v4583_v25 = vadd.f32 %v9609_v34, %v4570_v59  ;;  %v8842_v34 = vld [vmem:[#allocation11 + $0x198] sm:$0xff] }
 0x37a   : > { %5409 = vmatpush.bf16.msra.mxu2 %v8814_v27  ;;  %v8801_v45 = vld [vmem:[#allocation11 + $0x50] sm:$0xff]  ;;  %v8826_v27 = vld [vmem:[#allocation11 + $0x118] sm:$0xff]  ;;  %v8847_v59 = vld [vmem:[#allocation11 + $0x1c0] sm:$0xff] }
 0x37b   : > { %5385 = vmatpush.bf16.msra.mxu0 %v8796_v29  ;;  %4854 = vmatmul.bf16.vlgmr.msrb.gmra.mxu3 %v9518_v9  ;;  %v8793_v9 = vld [vmem:[#allocation11 + $0x10] sm:$0xff]  ;;  %v4596_v15 = vadd.f32 %v9611_v39, %v4583_v25 }
 0x37c   : > { %5422 = vmatpush.bf16.msra.mxu3 %v8822_v30  ;;  %5398 = vmatpush.bf16.msra.mxu1 %v8804_v31  ;;  %v8809_v33 = vld [vmem:[#allocation11 + $0x90] sm:$0xff] }
 0x37d   : > { %v8817_v56 = vld [vmem:[#allocation11 + $0xd0] sm:$0xff]  ;;  %v4609_v30 = vadd.f32 %v9617_v38, %v4596_v15  ;;  %v4699_v38 = vpop.f32.mrf.mxu3 }
 0x37e   : > { %5410 = vmatpush.bf16.msra.mxu2 %v8813_v32  ;;  %v8829_v8 = vld [vmem:[#allocation11 + $0x130] sm:$0xff] }
 0x37f   : > { %5386 = vmatpush.bf16.msra.mxu0 %v8795_v35  ;;  %v8837_v13 = vld [vmem:[#allocation11 + $0x170] sm:$0xff]  ;;  %v4675_v35 = vpop.f32.mrf.mxu1 }
 0x380   : > { %5423 = vmatpush.bf16.msra.mxu3 %v8821_v36  ;;  %5399 = vmatpush.bf16.msra.mxu1 %v8803_v37  ;;  %v8845_v20 = vld [vmem:[#allocation11 + $0x1b0] sm:$0xff]  ;;  %v4662_v32 = vpop.f32.mrf.mxu0  ;;  %v4622_v36 = vadd.f32 %v9619_v42, %v4609_v30  ;;  %v8824_v37 = vld [vmem:[#allocation11 + $0x108] sm:$0xff]  ;;  %v4863_v42 = vpack.c.bf16 %v9599_v24, %v9599_v24 }
 0x381   : > { %v8825_v29 = vld [vmem:[#allocation11 + $0x110] sm:$0xff] }
 0x382   : > { %5411 = vmatpush.bf16.msra.mxu2 %v8812_v41  ;;  %v8833_v31 = vld [vmem:[#allocation11 + $0x150] sm:$0xff]  ;;  %v8832_v41 = vld [vmem:[#allocation11 + $0x148] sm:$0xff]  ;;  %v4635_v39 = vadd.f32 %v9621_v55, %v4622_v36 }
 0x383   : > { %5387 = vmatpush.bf16.msra.mxu0 %v8794_v48  ;;  %v4686_v48 = vpop.f32.mrf.mxu2 }
 0x384   : > { %5424 = vmatpush.bf16.msra.mxu3 %v8820_v63  ;;  %5400 = vmatpush.bf16.msra.mxu1 %v8802_v43  ;;  %v8841_v63 = vld [vmem:[#allocation11 + $0x190] sm:$0xff]  ;;  %v8823_v43 = vld [vmem:[#allocation11 + $0x100] sm:$0xff] }
 0x385   : > { %v4701_v50 = vpop.f32.mrf.mxu3 }
 0x386   : > { %5412 = vmatpush.bf16.msra.mxu2 %v8811_v7  ;;  %v8831_v7 = vld [vmem:[#allocation11 + $0x140] sm:$0xff] }
 0x387   : > { %5388 = vmatpush.bf16.msra.mxu0 %v8793_v9  ;;  %v8840_v9 = vld [vmem:[#allocation11 + $0x188] sm:$0xff] }
 0x388   : > { %5425 = vmatpush.bf16.msra.mxu3 %v8819_v44  ;;  %5401 = vmatpush.bf16.msra.mxu1 %v8801_v45  ;;  %v4648_v44 = vadd.f32 %v9623_v54, %v4635_v39 }
 0x38a   : > { %5413 = vmatpush.bf16.msra.mxu2 %v8810_v46  ;;  %v4864_v45 = vpack.c.bf16 %v4648_v44, %v4648_v44  ;;  %v8839_v46 = vld [vmem:[#allocation11 + $0x180] sm:$0xff] }
 0x38b   : > { %5389 = vmatpush.bf16.msra.mxu0 %v8792_v52  ;;  %v4661_v52 = vadd.f32 %v4660_v11, %v1457_v47 }
 0x38c   : > { %5426 = vmatpush.bf16.msra.mxu3 %v8818_v49  ;;  %5402 = vmatpush.bf16.msra.mxu1 %v8800_v53  ;;  %v4688_v49 = vpop.f32.mrf.mxu2 }
 0x38d   : > { %v4674_v53 = vadd.f32 %v4673_v10, %v4661_v52 }
 0x38e   : > { %5414 = vmatpush.bf16.msra.mxu2 %v8809_v33 }
 0x38f   : > { %5390 = vmatpush.bf16.msra.mxu0 %v8791_v57  ;;  %v4687_v55 = vadd.f32 %v4686_v48, %v4674_v53 }
 0x390   : > { %5427 = vmatpush.bf16.msra.mxu3 %v8817_v56  ;;  %5403 = vmatpush.bf16.msra.mxu1 %v8799_v58 }
 0x391   : > { %v4700_v54 = vadd.f32 %v4699_v38, %v4687_v55 }
 0x392   : > { %5415 = vmatpush.bf16.msra.mxu2 %v8808_v61  ;;  %5391 = vmatmul.bf16.vlgmr.msra.gmra.mxu0 %v4859_v0  ;;  %v4712_v33 = vpop.f32.mrf.mxu0  ;;  %v8854_v61 = vld [vmem:[#allocation11 + $0x1f8] sm:$0xff] }
 0x393   : > { %5435 = vmatpush.bf16.msrb.mxu0 %v8830_v60  ;;  %5404 = vmatmul.bf16.vlgmr.msra.gmra.mxu1 %v4860_v12  ;;  %v4713_v57 = vadd.f32 %v4712_v33, %v4700_v54  ;;  %v8853_v12 = vld [vmem:[#allocation11 + $0x1f0] sm:$0xff] }
 0x394   : > { %5448 = vmatpush.bf16.msrb.mxu1 %v8838_v3  ;;  %5428 = vmatpush.bf16.msra.mxu3 %v8816_v62  ;;  %v4725_v56 = vpop.f32.mrf.mxu1 }
 0x395   : > { %v4726_v60 = vadd.f32 %v4725_v56, %v4713_v57 }
 0x396   : > { %5416 = vmatpush.bf16.msra.mxu2 %v8807_v14 }
 0x397   : > { %5436 = vmatpush.bf16.msrb.mxu0 %v8829_v8 }
 0x398   : > { %5449 = vmatpush.bf16.msrb.mxu1 %v8837_v13  ;;  %5429 = vmatpush.bf16.msra.mxu3 %v8815_v17  ;;  %v8852_v13 = vld [vmem:[#allocation11 + $0x1e8] sm:$0xff]  ;;  %v8851_v17 = vld [vmem:[#allocation11 + $0x1e0] sm:$0xff] }
 0x399   : > { %5417 = vmatmul.bf16.vlgmr.msra.gmra.mxu2 %v4861_v5  ;;  %v8848_v5 = vld [vmem:[#allocation11 + $0x1c8] sm:$0xff] }
 0x39a   : > { %5461 = vmatpush.bf16.msrb.mxu2 %v8846_v16  ;;  %v4714_v58 = vpop.f32.mrf.mxu0 }
 0x39b   : > { %5437 = vmatpush.bf16.msrb.mxu0 %v8828_v19  ;;  %5430 = vmatmul.bf16.vlgmr.msra.gmra.mxu3 %v4862_v22  ;;  %v8849_v19 = vld [vmem:[#allocation11 + $0x1d0] sm:$0xff] }
 0x39c   : > { %5450 = vmatpush.bf16.msrb.mxu1 %v8836_v51  ;;  %v4727_v24 = vpop.f32.mrf.mxu1  ;;  %5474 = vmatpush.bf16.msrb.mxu3 %v8854_v61 }
 0x39e   : > { %5462 = vmatpush.bf16.msrb.mxu2 %v8845_v20 }
 0x39f   : > { %5438 = vmatpush.bf16.msrb.mxu0 %v8827_v26 }
 0x3a0   : > { %5451 = vmatpush.bf16.msrb.mxu1 %v8835_v21  ;;  %v4738_v3 = vpop.f32.mrf.mxu2  ;;  %5475 = vmatpush.bf16.msrb.mxu3 %v8853_v12  ;;  %v1458_v21 = vperm.slane %v9627_v2, 7 }
 0x3a1   : > { %v4739_v62 = vadd.f32 %v4738_v3, %v4726_v60 }
 0x3a2   : > { %5463 = vmatpush.bf16.msrb.mxu2 %v8844_v1  ;;  %v4751_v0 = vpop.f32.mrf.mxu3 }
 0x3a3   : > { %5439 = vmatpush.bf16.msrb.mxu0 %v8826_v27  ;;  %v4752_v4 = vadd.f32 %v4751_v0, %v4739_v62 }
 0x3a4   : > { %5452 = vmatpush.bf16.msrb.mxu1 %v8834_v28  ;;  %5476 = vmatpush.bf16.msrb.mxu3 %v8852_v13 }
 0x3a5   : > { %v4865_v8 = vpack.c.bf16 %v4752_v4, %v4752_v4 }
 0x3a6   : > { %5464 = vmatpush.bf16.msrb.mxu2 %v8843_v23 }
 0x3a7   : > { %5440 = vmatpush.bf16.msrb.mxu0 %v8825_v29 }
 0x3a8   : > { %5453 = vmatpush.bf16.msrb.mxu1 %v8833_v31  ;;  %v4740_v14 = vpop.f32.mrf.mxu2  ;;  %5477 = vmatpush.bf16.msrb.mxu3 %v8851_v17 }
 0x3aa   : > { %5465 = vmatpush.bf16.msrb.mxu2 %v8842_v34  ;;  %v4753_v6 = vpop.f32.mrf.mxu3 }
 0x3ab   : > { %5441 = vmatpush.bf16.msrb.mxu0 %v8824_v37 }
 0x3ac   : > { %5454 = vmatpush.bf16.msrb.mxu1 %v8832_v41  ;;  %5478 = vmatpush.bf16.msrb.mxu3 %v8850_v40 }
 0x3ae   : > { %5466 = vmatpush.bf16.msrb.mxu2 %v8841_v63  ;;  %v8966_v63 = vld [vmem:[#allocation13] ss:$0 sm:$0xff] }
 0x3af   : > { %5442 = vmatpush.bf16.msrb.mxu0 %v8823_v43 }
 0x3b0   : > { %5455 = vmatpush.bf16.msrb.mxu1 %v8831_v7  ;;  %5479 = vmatpush.bf16.msrb.mxu3 %v8849_v19 }
 0x3b2   : > { %5467 = vmatpush.bf16.msrb.mxu2 %v8840_v9  ;;  %5443 = vmatmul.bf16.vlgmr.msrb.gmra.mxu0 %v4863_v42  ;;  %v4764_v16 = vpop.f32.mrf.mxu0 }
 0x3b3   : > { %5456 = vmatmul.bf16.vlgmr.msrb.gmra.mxu1 %v4864_v45  ;;  %v4765_v11 = vadd.f32 %v4764_v16, %v1458_v21 }
 0x3b4   : > { %v4777_v18 = vpop.f32.mrf.mxu1  ;;  %5480 = vmatpush.bf16.msrb.mxu3 %v8848_v5 }
 0x3b5   : > { %v4778_v10 = vadd.f32 %v4777_v18, %v4765_v11 }
 0x3b6   : > { %5468 = vmatpush.bf16.msrb.mxu2 %v8839_v46 }
 0x3b8   : > { %5481 = vmatpush.bf16.msrb.mxu3 %v8847_v59 }
 0x3b9   : > { %5469 = vmatmul.bf16.vlgmr.msrb.gmra.mxu2 %v4865_v8 }
 0x3ba   : > { %v4766_v51 = vpop.f32.mrf.mxu0 }
 0x3bc   : > { %v4779_v20 = vpop.f32.mrf.mxu1 }
 0x3c4   : > { %v4790_v22 = vpop.f32.mrf.mxu2 }
 0x3c5   : > { %v4791_v28 = vadd.f32 %v4790_v22, %v4778_v10 }
 0x3c6   : > { %v4803_v26 = vpop.f32.mrf.mxu3 }
 0x3c7   : > { %v4804_v23 = vadd.f32 %v4803_v26, %v4791_v28 }
 0x3cc   : > { %v4792_v25 = vpop.f32.mrf.mxu2 }
 0x3ce   : > { %v4805_v1 = vpop.f32.mrf.mxu3 }
 0x3ee   : > { %v4816_v27 = vpop.f32.mrf.mxu0 }
 0x3ef   : > { %v4817_v30 = vadd.f32 %v4816_v27, %v4804_v23 }
 0x3f0   : > { %v4829_v15 = vpop.f32.mrf.mxu1 }
 0x3f1   : > { %v4830_v34 = vadd.f32 %v4829_v15, %v4817_v30 }
 0x3f6   : > { %v4818_v29 = vpop.f32.mrf.mxu0 }
 0x3f8   : > { %v4831_v31 = vpop.f32.mrf.mxu1 }
 0x3fc   : > { %v4842_v32 = vpop.f32.mrf.mxu2 }
 0x3fd   : > { %v4843_v36 = vadd.f32 %v4842_v32, %v4830_v34 }
 0x3fe   : > { %v4855_v35 = vpop.f32.mrf.mxu3 }
 0x3ff   : > { %v4856_v37 = vadd.f32 %v4855_v35, %v4843_v36 }
 0x401   : > { %v4866_v41 = vpack.c.bf16 %v4856_v37, %v4856_v37 }
 0x403   : > { %5482 = vmatmul.bf16.vlgmr.msrb.gmra.mxu3 %v4866_v41 }
 0x404   : > { %v4844_v39 = vpop.f32.mrf.mxu2 }
 0x406   : > { %v4857_v2 = vpop.f32.mrf.mxu3 }
 0x40f   : > { %v5392_v48 = vpop.f32.mrf.mxu0 }
 0x410   : > { %v5393_v38 = vadd.f32 %v8966_v63, %v5392_v48  ;;  %v5405_v43 = vpop.f32.mrf.mxu1 }
 0x412   : > { %v5406_v7 = vadd.f32 %v5405_v43, %v5393_v38 }
 0x417   : > { %v5394_v44 = vpop.f32.mrf.mxu0 }
 0x418   : > { %v5407_v9 = vpop.f32.mrf.mxu1 }
 0x41c   : > { %v5418_v42 = vpop.f32.mrf.mxu2 }
 0x41d   : > { %v5419_v45 = vadd.f32 %v5418_v42, %v5406_v7 }
 0x41e   : > { %v5431_v46 = vpop.f32.mrf.mxu3 }
 0x41f   : > { %v5432_v47 = vadd.f32 %v5431_v46, %v5419_v45 }
 0x424   : > { %v5420_v49 = vpop.f32.mrf.mxu2 }
 0x426   : > { %v5433_v50 = vpop.f32.mrf.mxu3 }
 0x42f   : > { %v5444_v52 = vpop.f32.mrf.mxu0 }
 0x430   : > { %v5445_v53 = vadd.f32 %v5444_v52, %v5432_v47  ;;  %v5457_v33 = vpop.f32.mrf.mxu1 }
 0x432   : > { %v5458_v55 = vadd.f32 %v5457_v33, %v5445_v53 }
 0x437   : > { %v5446_v56 = vpop.f32.mrf.mxu0 }
 0x438   : > { %v5459_v54 = vpop.f32.mrf.mxu1 }
 0x43c   : > { %v5470_v57 = vpop.f32.mrf.mxu2 }
 0x43d   : > { %v5471_v24 = vadd.f32 %v5470_v57, %v5458_v55 }
 0x444   : > { %v5472_v58 = vpop.f32.mrf.mxu2 }
 0x486   : > { %v5483_v60 = vpop.f32.mrf.mxu3 }
 0x487   : > { %v5484_v3 = vadd.f32 %v5483_v60, %v5471_v24 }
 0x489   : > { %5487 = vst [vmem:[%s388_s13] sm:$0xff] %v5484_v3 }
 0x48a   : > { %9222 = shalt.err (!%p9219_p9)
}
 0x48b   : > { %8881 = dma.vmem_to_hbm [thread:$0]  (%p9422_p4), %s5502_s10, 128, %s5504_s16, %s5489_s20  }
 0x48e   : > { %v5485_v61 = vpop.f32.mrf.mxu3 }
 0x48f PF: > { %s5515_s17 = sand.u32 1, %s9261_s24   ;;  %p9702_p10 = scmp.ge.s32.totalorder %s9273_s27, 2 }
 0x490   : > { %s5516_s1 = scalar_lea.sflag [#allocation4], %s5515_s17 }
 0x491   : > { %p8907_p13 = pnand %p9702_p10, %p9426_p6 }
 0x493   : > { %p8908_p11 = pneg %p8907_p13 }
 0x495   : > { %9256 = dma.done.wait (%p8908_p11), %s5516_s1, 128  }
 0x496   : > { %9258 = vsyncadd (%p8908_p11), %s5516_s1, 4294967168  ;;  %p23_p0 = scmp.ge.s32.totalorder %s9396_s12, 4   ;;  %s9703_s24 = smov %s9265_s25 }
 0x497   : > { %s9704_s25 = smov %s9269_s26  ;;  %s9705_s26 = smov %s9407_s30 }
 0x498   : > { %s9706_s27 = smov %s9396_s12  ;;  %25 = sbr.rel (!%p23_p0) target bundleno = 11 (0xb), region = 117 }
 0x49d   :  { %5522 = vsyncpa [#allocation3], 1 }
 0x49e   :  { %5524 = vsyncpa [#allocation3 + $0x1], 1 }
 0x49f   :  { %5525 = vsyncpa [#allocation6], 1 }
 0x4a0   :  { %5526 = vsyncpa [#allocation9], 1 }
 0x4a1   :  { %5527 = vsyncpa [#allocation12], 1 }
 0x4a2   :  { %5528 = vsyncpa [#allocation4], 1 }
 0x4a3   :  { %5530 = vsyncpa [#allocation4 + $0x1], 1 }

</bundles_post_ra>
